<compile_context>
chip_gen: v7x
topology: tpu7x:2x2x1
jax: 0.10.0
libtpu: 0.0.40
codegen_flags: <defaults>
</compile_context>

<pallas_src>
import jax
import jax.numpy as jnp
from jax.experimental import pallas as pl
from jax.experimental.pallas import tpu as pltpu


# ----------------------------------------------------------------------------
# Tiling helpers
# ----------------------------------------------------------------------------
_GRANULE = 16  # sublane granule safe for both f32 (8) and bf16 (16)


def _pick_batch_tile(n, rows_per_sample, target_rows):
    """Samples per grid step: must divide n; block rows must be sublane-aligned
    (or the block must cover the full array)."""
    cap = max(1, min(n, max(1, target_rows // rows_per_sample)))
    for tb in range(cap, 0, -1):
        if n % tb == 0 and (tb == n or (tb * rows_per_sample) % _GRANULE == 0):
            return tb
    return n


def _pick_row_tile(n, target):
    if n <= target:
        return n
    for tm in range(min(n, target), 0, -1):
        if n % tm == 0 and tm % _GRANULE == 0:
            return tm
    return n


# ----------------------------------------------------------------------------
# XLA-side glue: pooling-quadrant im2col (NHWC)
# ----------------------------------------------------------------------------
def _im2col_pool_quadrants(x, k):
    """x: (N, H, W, C) NHWC -> 4 patch matrices, one per 2x2 pooling quadrant,
    each (N*PH*PW, k*k*C); rows ordered (n, ph, pw), columns (kh, kw, cin)."""
    N, H, W, C = x.shape
    OH, OW = H - k + 1, W - k + 1
    assert OH % 2 == 0 and OW % 2 == 0, "MaxPool2d(2) expects even conv output"
    PH, PW = OH // 2, OW // 2
    cols = [x[:, i:i + OH, j:j + OW, :] for i in range(k) for j in range(k)]
    p = jnp.stack(cols, axis=3)                 # (N, OH, OW, k*k, C)
    p = p.reshape(N, OH, OW, k * k * C)         # columns ordered (kh, kw, cin)
    quads = []
    for a in range(2):
        for b in range(2):
            q = p[:, a::2, b::2, :]             # (N, PH, PW, K)
            quads.append(q.reshape(N * PH * PW, k * k * C))
    return quads, PH, PW


# ----------------------------------------------------------------------------
# Pallas kernels
# ----------------------------------------------------------------------------
def _conv_relu_pool_kernel(q0, q1, q2, q3, w_ref, b_ref, o_ref):
    """Fused conv (as 4 quadrant matmuls) + bias + ReLU + 2x2 max-pool."""
    w = w_ref[...]
    b = b_ref[...]

    def branch(q_ref):
        y = jnp.dot(q_ref[...], w, preferred_element_type=jnp.float32) + b
        return jnp.maximum(y, 0.0)                       # ReLU before the pool

    pooled = jnp.maximum(jnp.maximum(branch(q0), branch(q1)),
                         jnp.maximum(branch(q2), branch(q3)))
    o_ref[...] = pooled.astype(o_ref.dtype)


def _mlp_head_kernel(x_ref, w1_ref, b1_ref, wc_ref, bc_ref, o_ref):
    """Fused fc1 + ReLU + classifier; hidden activation never leaves VMEM."""
    h = jnp.dot(x_ref[...], w1_ref[...], preferred_element_type=jnp.float32)
    h = jnp.maximum(h + b1_ref[...], 0.0)
    logits = jnp.dot(h.astype(wc_ref.dtype), wc_ref[...],
                     preferred_element_type=jnp.float32) + bc_ref[...]
    o_ref[...] = logits.astype(o_ref.dtype)


# ----------------------------------------------------------------------------
# Pallas wrappers
# ----------------------------------------------------------------------------
def conv_relu_pool(x_nhwc, w_mat, b, *, k, compute_dtype=jnp.bfloat16,
                   target_block_bytes=2 * 1024 * 1024):
    """Fused Conv2d(k, stride 1, valid) + ReLU + MaxPool2d(2).

    x_nhwc: (N, H, W, Cin); w_mat: (k*k*Cin, Cout) in (kh, kw, cin) row order.
    Returns ((N*PH*PW, Cout) in compute_dtype with rows ordered (n, ph, pw), PH, PW).
    """
    N = x_nhwc.shape[0]
    K, Cout = w_mat.shape
    quads, PH, PW = _im2col_pool_quadrants(x_nhwc, k)
    rows_per_sample = PH * PW
    M = N * rows_per_sample

    elt = jnp.dtype(compute_dtype).itemsize
    bytes_per_row = 4 * K * elt + Cout * elt
    target_rows = max(rows_per_sample, target_block_bytes // bytes_per_row)
    tb = _pick_batch_tile(N, rows_per_sample, target_rows)
    TM = tb * rows_per_sample
    grid = (N // tb,)

    quads = [q.astype(compute_dtype) for q in quads]
    w_mat = w_mat.astype(compute_dtype)
    b2 = b.reshape(1, Cout).astype(jnp.float32)

    out = pl.pallas_call(
        _conv_relu_pool_kernel,
        out_shape=jax.ShapeDtypeStruct((M, Cout), compute_dtype),
        grid=grid,
        in_specs=[pl.BlockSpec((TM, K), lambda i: (i, 0)) for _ in range(4)]
                + [pl.BlockSpec((K, Cout), lambda i: (0, 0)),
                   pl.BlockSpec((1, Cout), lambda i: (0, 0))],
        out_specs=pl.BlockSpec((TM, Cout), lambda i: (i, 0)),
        compiler_params=pltpu.CompilerParams(dimension_semantics=("parallel",)),
    )(*quads, w_mat, b2)
    return out, PH, PW


def mlp_head(x, w1, b1, wc_pad, bc_pad, *, compute_dtype=jnp.bfloat16,
             target_rows=512):
    """Fused fc1 + ReLU + classifier. x: (N, F) -> (N, padded_classes) f32."""
    N, F = x.shape
    _, H = w1.shape
    _, NCp = wc_pad.shape
    tm = _pick_row_tile(N, target_rows)
    grid = (N // tm,)
    return pl.pallas_call(
        _mlp_head_kernel,
        out_shape=jax.ShapeDtypeStruct((N, NCp), jnp.float32),
        grid=grid,
        in_specs=[pl.BlockSpec((tm, F), lambda i: (i, 0)),
                  pl.BlockSpec((F, H), lambda i: (0, 0)),
                  pl.BlockSpec((1, H), lambda i: (0, 0)),
                  pl.BlockSpec((H, NCp), lambda i: (0, 0)),
                  pl.BlockSpec((1, NCp), lambda i: (0, 0))],
        out_specs=pl.BlockSpec((tm, NCp), lambda i: (i, 0)),
        compiler_params=pltpu.CompilerParams(dimension_semantics=("parallel",)),
    )(x.astype(compute_dtype), w1.astype(compute_dtype),
      b1.reshape(1, H).astype(jnp.float32),
      wc_pad.astype(compute_dtype), bc_pad.reshape(1, NCp).astype(jnp.float32))


# ----------------------------------------------------------------------------
# Parameters and full forward
# ----------------------------------------------------------------------------
def init_params(key, in_channels=1, features_length=1024, num_classes=10):
    ks = jax.random.split(key, 8)
    s = 0.05
    return {
        "conv1_w": s * jax.random.normal(ks[0], (32, in_channels, 5, 5), jnp.float32),
        "conv1_b": s * jax.random.normal(ks[1], (32,), jnp.float32),
        "conv2_w": s * jax.random.normal(ks[2], (64, 32, 5, 5), jnp.float32),
        "conv2_b": s * jax.random.normal(ks[3], (64,), jnp.float32),
        "fc1_w": s * jax.random.normal(ks[4], (512, features_length), jnp.float32),
        "fc1_b": s * jax.random.normal(ks[5], (512,), jnp.float32),
        "cls_w": s * jax.random.normal(ks[6], (num_classes, 512), jnp.float32),
        "cls_b": s * jax.random.normal(ks[7], (num_classes,), jnp.float32),
    }


def _conv_weight_as_matrix(w):
    # PyTorch (Cout, Cin, kh, kw) -> (kh*kw*Cin, Cout), matching patch columns.
    Cout, Cin, kh, kw = w.shape
    return jnp.transpose(w, (2, 3, 1, 0)).reshape(kh * kw * Cin, Cout)


def fedavg_cnn_forward(params, x, *, compute_dtype=jnp.bfloat16):
    """x: (N, Cin, H, W) NCHW, as in the PyTorch module. Returns (N, num_classes) f32."""
    N = x.shape[0]
    x = jnp.transpose(x, (0, 2, 3, 1))                       # one-time NCHW -> NHWC

    # base: conv1 -> ReLU -> pool1  (single fused pallas_call)
    k1 = params["conv1_w"].shape[-1]
    h, PH1, PW1 = conv_relu_pool(x, _conv_weight_as_matrix(params["conv1_w"]),
                                 params["conv1_b"], k=k1, compute_dtype=compute_dtype)
    C1 = params["conv1_w"].shape[0]
    h = h.reshape(N, PH1, PW1, C1)                           # contiguity-preserving, free

    # base: conv2 -> ReLU -> pool2  (single fused pallas_call)
    k2 = params["conv2_w"].shape[-1]
    h, PH2, PW2 = conv_relu_pool(h, _conv_weight_as_matrix(params["conv2_w"]),
                                 params["conv2_b"], k=k2, compute_dtype=compute_dtype)
    C2 = params["conv2_w"].shape[0]
    feats = h.reshape(N, PH2 * PW2 * C2)                     # (H, W, C)-ordered flatten, free

    # fc1 weight: PyTorch flatten order is (C, H, W); fold that permutation into
    # the weight once instead of permuting activations.
    fc1_w = params["fc1_w"].reshape(-1, C2, PH2, PW2)        # (512, C, H, W)
    fc1_w = jnp.transpose(fc1_w, (2, 3, 1, 0)).reshape(PH2 * PW2 * C2, -1)   # (1024, 512)

    # classifier, padded to a lane-dense 128-wide output slab (sliced back below).
    cls_w, cls_b = params["cls_w"], params["cls_b"]
    num_classes = cls_w.shape[0]
    ncp = max(128, ((num_classes + 127) // 128) * 128)
    wc = jnp.zeros((cls_w.shape[1], ncp), cls_w.dtype).at[:, :num_classes].set(cls_w.T)
    bc = jnp.zeros((ncp,), cls_b.dtype).at[:num_classes].set(cls_b)

    # fc1 + F.relu(...) + classifier, fused into one pallas_call.
    logits = mlp_head(feats, fc1_w, params["fc1_b"], wc, bc, compute_dtype=compute_dtype)
    return logits[:, :num_classes]


# TODO(synk): DecoupledModel's forward-hook feature collection / dropout toggling
# is training/introspection plumbing with no compute in forward(); not ported.

if __name__ == "__main__":
    key = jax.random.PRNGKey(0)
    pkey, xkey = jax.random.split(key)
    # dataset = "mnist": 1 input channel, 28x28, 10 classes, features_length=1024
    params = init_params(pkey, in_channels=1, features_length=1024, num_classes=10)
    x = jax.random.normal(xkey, (2, 1, 28, 28), jnp.float32)

    logits = jax.jit(fedavg_cnn_forward)(params, x)
    logits = jax.block_until_ready(logits)
    assert logits.shape == (2, 10) and logits.dtype == jnp.float32
    print("KERNEL_OK")
</pallas_src>

<mosaic_0001>
module attributes {stable_mosaic.version = 11 : i64} {
  func.func @_conv_relu_pool_kernel(%arg0: i32, %arg1: memref<288x25xbf16, #tpu.memory_space<vmem>>, %arg2: memref<288x25xbf16, #tpu.memory_space<vmem>>, %arg3: memref<288x25xbf16, #tpu.memory_space<vmem>>, %arg4: memref<288x25xbf16, #tpu.memory_space<vmem>>, %arg5: memref<25x32xbf16, #tpu.memory_space<vmem>>, %arg6: memref<1x32xf32, #tpu.memory_space<vmem>>, %arg7: memref<288x32xbf16, #tpu.memory_space<vmem>>) attributes {dimension_semantics = [#tpu.dimension_semantics<parallel>], iteration_bounds = array<i64: 1>, scalar_prefetch = 0 : i64, scratch_operands = 0 : i64, tpu.core_type = #tpu.core_type<tc>, window_params = [{transform_indices = @transform_0, window_bounds = array<i64: 288, 25>}, {transform_indices = @transform_1, window_bounds = array<i64: 288, 25>}, {transform_indices = @transform_2, window_bounds = array<i64: 288, 25>}, {transform_indices = @transform_3, window_bounds = array<i64: 288, 25>}, {pipeline_mode = #tpu.pipeline_mode<synchronous>, transform_indices = @transform_4, window_bounds = array<i64: 25, 32>}, {pipeline_mode = #tpu.pipeline_mode<synchronous>, transform_indices = @transform_5, window_bounds = array<i64: 1, 32>}, {transform_indices = @transform_6, window_bounds = array<i64: 288, 32>}]} {
    %c0 = arith.constant 0 : index
    %c0_0 = arith.constant 0 : index
    %0 = vector.load %arg5[%c0, %c0_0] : memref<25x32xbf16, #tpu.memory_space<vmem>>, vector<25x32xbf16>
    %c0_1 = arith.constant 0 : index
    %c0_2 = arith.constant 0 : index
    %1 = vector.load %arg6[%c0_1, %c0_2] : memref<1x32xf32, #tpu.memory_space<vmem>>, vector<1x32xf32>
    %c0_3 = arith.constant 0 : index
    %c0_4 = arith.constant 0 : index
    %2 = vector.load %arg1[%c0_3, %c0_4] : memref<288x25xbf16, #tpu.memory_space<vmem>>, vector<288x25xbf16>
    %cst = arith.constant dense<0.000000e+00> : vector<288x32xf32>
    %3 = tpu.matmul %2, %0, %cst {dimension_numbers = #tpu.dot_dimension_numbers<[1], [0], [0], [1], [0, 0, 1, 1], [], []>} : vector<288x25xbf16>, vector<25x32xbf16>, vector<288x32xf32> -> vector<288x32xf32>
    %4 = vector.broadcast %1 : vector<1x32xf32> to vector<288x32xf32>
    %5 = arith.addf %3, %4 : vector<288x32xf32>
    %cst_5 = arith.constant 0.000000e+00 : f32
    %6 = vector.broadcast %cst_5 : f32 to vector<288x32xf32>
    %7 = arith.maximumf %5, %6 : vector<288x32xf32>
    %c0_6 = arith.constant 0 : index
    %c0_7 = arith.constant 0 : index
    %8 = vector.load %arg2[%c0_6, %c0_7] : memref<288x25xbf16, #tpu.memory_space<vmem>>, vector<288x25xbf16>
    %cst_8 = arith.constant dense<0.000000e+00> : vector<288x32xf32>
    %9 = tpu.matmul %8, %0, %cst_8 {dimension_numbers = #tpu.dot_dimension_numbers<[1], [0], [0], [1], [0, 0, 1, 1], [], []>} : vector<288x25xbf16>, vector<25x32xbf16>, vector<288x32xf32> -> vector<288x32xf32>
    %10 = vector.broadcast %1 : vector<1x32xf32> to vector<288x32xf32>
    %11 = arith.addf %9, %10 : vector<288x32xf32>
    %cst_9 = arith.constant 0.000000e+00 : f32
    %12 = vector.broadcast %cst_9 : f32 to vector<288x32xf32>
    %13 = arith.maximumf %11, %12 : vector<288x32xf32>
    %14 = arith.maximumf %7, %13 : vector<288x32xf32>
    %c0_10 = arith.constant 0 : index
    %c0_11 = arith.constant 0 : index
    %15 = vector.load %arg3[%c0_10, %c0_11] : memref<288x25xbf16, #tpu.memory_space<vmem>>, vector<288x25xbf16>
    %cst_12 = arith.constant dense<0.000000e+00> : vector<288x32xf32>
    %16 = tpu.matmul %15, %0, %cst_12 {dimension_numbers = #tpu.dot_dimension_numbers<[1], [0], [0], [1], [0, 0, 1, 1], [], []>} : vector<288x25xbf16>, vector<25x32xbf16>, vector<288x32xf32> -> vector<288x32xf32>
    %17 = vector.broadcast %1 : vector<1x32xf32> to vector<288x32xf32>
    %18 = arith.addf %16, %17 : vector<288x32xf32>
    %cst_13 = arith.constant 0.000000e+00 : f32
    %19 = vector.broadcast %cst_13 : f32 to vector<288x32xf32>
    %20 = arith.maximumf %18, %19 : vector<288x32xf32>
    %c0_14 = arith.constant 0 : index
    %c0_15 = arith.constant 0 : index
    %21 = vector.load %arg4[%c0_14, %c0_15] : memref<288x25xbf16, #tpu.memory_space<vmem>>, vector<288x25xbf16>
    %cst_16 = arith.constant dense<0.000000e+00> : vector<288x32xf32>
    %22 = tpu.matmul %21, %0, %cst_16 {dimension_numbers = #tpu.dot_dimension_numbers<[1], [0], [0], [1], [0, 0, 1, 1], [], []>} : vector<288x25xbf16>, vector<25x32xbf16>, vector<288x32xf32> -> vector<288x32xf32>
    %23 = vector.broadcast %1 : vector<1x32xf32> to vector<288x32xf32>
    %24 = arith.addf %22, %23 : vector<288x32xf32>
    %cst_17 = arith.constant 0.000000e+00 : f32
    %25 = vector.broadcast %cst_17 : f32 to vector<288x32xf32>
    %26 = arith.maximumf %24, %25 : vector<288x32xf32>
    %27 = arith.maximumf %20, %26 : vector<288x32xf32>
    %28 = arith.maximumf %14, %27 : vector<288x32xf32>
    %29 = arith.truncf %28 : vector<288x32xf32> to vector<288x32xbf16>
    %c0_18 = arith.constant 0 : index
    %c0_19 = arith.constant 0 : index
    %30 = vector.load %arg7[%c0_18, %c0_19] : memref<288x32xbf16, #tpu.memory_space<vmem>>, vector<288x32xbf16>
    tpu.vector_store %arg7[%c0_18, %c0_19], %29 {strides = array<i32>} : memref<288x32xbf16, #tpu.memory_space<vmem>>, vector<288x32xbf16>,
    return
  }
  func.func @transform_0(%arg0: i32) -> (i32, i32) {
    %c0_i32 = arith.constant 0 : i32
    %c0_i32_0 = arith.constant 0 : i32
    return %arg0, %c0_i32 : i32, i32
  }
  func.func @transform_1(%arg0: i32) -> (i32, i32) {
    %c0_i32 = arith.constant 0 : i32
    %c0_i32_0 = arith.constant 0 : i32
    return %arg0, %c0_i32 : i32, i32
  }
  func.func @transform_2(%arg0: i32) -> (i32, i32) {
    %c0_i32 = arith.constant 0 : i32
    %c0_i32_0 = arith.constant 0 : i32
    return %arg0, %c0_i32 : i32, i32
  }
  func.func @transform_3(%arg0: i32) -> (i32, i32) {
    %c0_i32 = arith.constant 0 : i32
    %c0_i32_0 = arith.constant 0 : i32
    return %arg0, %c0_i32 : i32, i32
  }
  func.func @transform_4(%arg0: i32) -> (i32, i32) {
    %c0_i32 = arith.constant 0 : i32
    %c0_i32_0 = arith.constant 0 : i32
    %c0_i32_1 = arith.constant 0 : i32
    return %c0_i32, %c0_i32_0 : i32, i32
  }
  func.func @transform_5(%arg0: i32) -> (i32, i32) {
    %c0_i32 = arith.constant 0 : i32
    %c0_i32_0 = arith.constant 0 : i32
    %c0_i32_1 = arith.constant 0 : i32
    return %c0_i32, %c0_i32_0 : i32, i32
  }
  func.func @transform_6(%arg0: i32) -> (i32, i32) {
    %c0_i32 = arith.constant 0 : i32
    %c0_i32_0 = arith.constant 0 : i32
    return %arg0, %c0_i32 : i32, i32
  }
}

module attributes {stable_mosaic.version = 11 : i64} {
  func.func @_conv_relu_pool_kernel(%arg0: i32, %arg1: memref<32x800xbf16, #tpu.memory_space<vmem>>, %arg2: memref<32x800xbf16, #tpu.memory_space<vmem>>, %arg3: memref<32x800xbf16, #tpu.memory_space<vmem>>, %arg4: memref<32x800xbf16, #tpu.memory_space<vmem>>, %arg5: memref<800x64xbf16, #tpu.memory_space<vmem>>, %arg6: memref<1x64xf32, #tpu.memory_space<vmem>>, %arg7: memref<32x64xbf16, #tpu.memory_space<vmem>>) attributes {dimension_semantics = [#tpu.dimension_semantics<parallel>], iteration_bounds = array<i64: 1>, scalar_prefetch = 0 : i64, scratch_operands = 0 : i64, tpu.core_type = #tpu.core_type<tc>, window_params = [{transform_indices = @transform_0, window_bounds = array<i64: 32, 800>}, {transform_indices = @transform_1, window_bounds = array<i64: 32, 800>}, {transform_indices = @transform_2, window_bounds = array<i64: 32, 800>}, {transform_indices = @transform_3, window_bounds = array<i64: 32, 800>}, {pipeline_mode = #tpu.pipeline_mode<synchronous>, transform_indices = @transform_4, window_bounds = array<i64: 800, 64>}, {pipeline_mode = #tpu.pipeline_mode<synchronous>, transform_indices = @transform_5, window_bounds = array<i64: 1, 64>}, {transform_indices = @transform_6, window_bounds = array<i64: 32, 64>}]} {
    %c0 = arith.constant 0 : index
    %c0_0 = arith.constant 0 : index
    %0 = vector.load %arg5[%c0, %c0_0] : memref<800x64xbf16, #tpu.memory_space<vmem>>, vector<800x64xbf16>
    %c0_1 = arith.constant 0 : index
    %c0_2 = arith.constant 0 : index
    %1 = vector.load %arg6[%c0_1, %c0_2] : memref<1x64xf32, #tpu.memory_space<vmem>>, vector<1x64xf32>
    %c0_3 = arith.constant 0 : index
    %c0_4 = arith.constant 0 : index
    %2 = vector.load %arg1[%c0_3, %c0_4] : memref<32x800xbf16, #tpu.memory_space<vmem>>, vector<32x800xbf16>
    %cst = arith.constant dense<0.000000e+00> : vector<32x64xf32>
    %3 = tpu.matmul %2, %0, %cst {dimension_numbers = #tpu.dot_dimension_numbers<[1], [0], [0], [1], [0, 0, 1, 1], [], []>} : vector<32x800xbf16>, vector<800x64xbf16>, vector<32x64xf32> -> vector<32x64xf32>
    %4 = vector.broadcast %1 : vector<1x64xf32> to vector<32x64xf32>
    %5 = arith.addf %3, %4 : vector<32x64xf32>
    %cst_5 = arith.constant 0.000000e+00 : f32
    %6 = vector.broadcast %cst_5 : f32 to vector<32x64xf32>
    %7 = arith.maximumf %5, %6 : vector<32x64xf32>
    %c0_6 = arith.constant 0 : index
    %c0_7 = arith.constant 0 : index
    %8 = vector.load %arg2[%c0_6, %c0_7] : memref<32x800xbf16, #tpu.memory_space<vmem>>, vector<32x800xbf16>
    %cst_8 = arith.constant dense<0.000000e+00> : vector<32x64xf32>
    %9 = tpu.matmul %8, %0, %cst_8 {dimension_numbers = #tpu.dot_dimension_numbers<[1], [0], [0], [1], [0, 0, 1, 1], [], []>} : vector<32x800xbf16>, vector<800x64xbf16>, vector<32x64xf32> -> vector<32x64xf32>
    %10 = vector.broadcast %1 : vector<1x64xf32> to vector<32x64xf32>
    %11 = arith.addf %9, %10 : vector<32x64xf32>
    %cst_9 = arith.constant 0.000000e+00 : f32
    %12 = vector.broadcast %cst_9 : f32 to vector<32x64xf32>
    %13 = arith.maximumf %11, %12 : vector<32x64xf32>
    %14 = arith.maximumf %7, %13 : vector<32x64xf32>
    %c0_10 = arith.constant 0 : index
    %c0_11 = arith.constant 0 : index
    %15 = vector.load %arg3[%c0_10, %c0_11] : memref<32x800xbf16, #tpu.memory_space<vmem>>, vector<32x800xbf16>
    %cst_12 = arith.constant dense<0.000000e+00> : vector<32x64xf32>
    %16 = tpu.matmul %15, %0, %cst_12 {dimension_numbers = #tpu.dot_dimension_numbers<[1], [0], [0], [1], [0, 0, 1, 1], [], []>} : vector<32x800xbf16>, vector<800x64xbf16>, vector<32x64xf32> -> vector<32x64xf32>
    %17 = vector.broadcast %1 : vector<1x64xf32> to vector<32x64xf32>
    %18 = arith.addf %16, %17 : vector<32x64xf32>
    %cst_13 = arith.constant 0.000000e+00 : f32
    %19 = vector.broadcast %cst_13 : f32 to vector<32x64xf32>
    %20 = arith.maximumf %18, %19 : vector<32x64xf32>
    %c0_14 = arith.constant 0 : index
    %c0_15 = arith.constant 0 : index
    %21 = vector.load %arg4[%c0_14, %c0_15] : memref<32x800xbf16, #tpu.memory_space<vmem>>, vector<32x800xbf16>
    %cst_16 = arith.constant dense<0.000000e+00> : vector<32x64xf32>
    %22 = tpu.matmul %21, %0, %cst_16 {dimension_numbers = #tpu.dot_dimension_numbers<[1], [0], [0], [1], [0, 0, 1, 1], [], []>} : vector<32x800xbf16>, vector<800x64xbf16>, vector<32x64xf32> -> vector<32x64xf32>
    %23 = vector.broadcast %1 : vector<1x64xf32> to vector<32x64xf32>
    %24 = arith.addf %22, %23 : vector<32x64xf32>
    %cst_17 = arith.constant 0.000000e+00 : f32
    %25 = vector.broadcast %cst_17 : f32 to vector<32x64xf32>
    %26 = arith.maximumf %24, %25 : vector<32x64xf32>
    %27 = arith.maximumf %20, %26 : vector<32x64xf32>
    %28 = arith.maximumf %14, %27 : vector<32x64xf32>
    %29 = arith.truncf %28 : vector<32x64xf32> to vector<32x64xbf16>
    %c0_18 = arith.constant 0 : index
    %c0_19 = arith.constant 0 : index
    %30 = vector.load %arg7[%c0_18, %c0_19] : memref<32x64xbf16, #tpu.memory_space<vmem>>, vector<32x64xbf16>
    tpu.vector_store %arg7[%c0_18, %c0_19], %29 {strides = array<i32>} : memref<32x64xbf16, #tpu.memory_space<vmem>>, vector<32x64xbf16>,
    return
  }
  func.func @transform_0(%arg0: i32) -> (i32, i32) {
    %c0_i32 = arith.constant 0 : i32
    %c0_i32_0 = arith.constant 0 : i32
    return %arg0, %c0_i32 : i32, i32
  }
  func.func @transform_1(%arg0: i32) -> (i32, i32) {
    %c0_i32 = arith.constant 0 : i32
    %c0_i32_0 = arith.constant 0 : i32
    return %arg0, %c0_i32 : i32, i32
  }
  func.func @transform_2(%arg0: i32) -> (i32, i32) {
    %c0_i32 = arith.constant 0 : i32
    %c0_i32_0 = arith.constant 0 : i32
    return %arg0, %c0_i32 : i32, i32
  }
  func.func @transform_3(%arg0: i32) -> (i32, i32) {
    %c0_i32 = arith.constant 0 : i32
    %c0_i32_0 = arith.constant 0 : i32
    return %arg0, %c0_i32 : i32, i32
  }
  func.func @transform_4(%arg0: i32) -> (i32, i32) {
    %c0_i32 = arith.constant 0 : i32
    %c0_i32_0 = arith.constant 0 : i32
    %c0_i32_1 = arith.constant 0 : i32
    return %c0_i32, %c0_i32_0 : i32, i32
  }
  func.func @transform_5(%arg0: i32) -> (i32, i32) {
    %c0_i32 = arith.constant 0 : i32
    %c0_i32_0 = arith.constant 0 : i32
    %c0_i32_1 = arith.constant 0 : i32
    return %c0_i32, %c0_i32_0 : i32, i32
  }
  func.func @transform_6(%arg0: i32) -> (i32, i32) {
    %c0_i32 = arith.constant 0 : i32
    %c0_i32_0 = arith.constant 0 : i32
    return %arg0, %c0_i32 : i32, i32
  }
}

module attributes {stable_mosaic.version = 11 : i64} {
  func.func @_mlp_head_kernel(%arg0: i32, %arg1: memref<2x1024xbf16, #tpu.memory_space<vmem>>, %arg2: memref<1024x512xbf16, #tpu.memory_space<vmem>>, %arg3: memref<1x512xf32, #tpu.memory_space<vmem>>, %arg4: memref<512x128xbf16, #tpu.memory_space<vmem>>, %arg5: memref<1x128xf32, #tpu.memory_space<vmem>>, %arg6: memref<2x128xf32, #tpu.memory_space<vmem>>) attributes {dimension_semantics = [#tpu.dimension_semantics<parallel>], iteration_bounds = array<i64: 1>, scalar_prefetch = 0 : i64, scratch_operands = 0 : i64, tpu.core_type = #tpu.core_type<tc>, window_params = [{transform_indices = @transform_0, window_bounds = array<i64: 2, 1024>}, {pipeline_mode = #tpu.pipeline_mode<synchronous>, transform_indices = @transform_1, window_bounds = array<i64: 1024, 512>}, {pipeline_mode = #tpu.pipeline_mode<synchronous>, transform_indices = @transform_2, window_bounds = array<i64: 1, 512>}, {pipeline_mode = #tpu.pipeline_mode<synchronous>, transform_indices = @transform_3, window_bounds = array<i64: 512, 128>}, {pipeline_mode = #tpu.pipeline_mode<synchronous>, transform_indices = @transform_4, window_bounds = array<i64: 1, 128>}, {transform_indices = @transform_5, window_bounds = array<i64: 2, 128>}]} {
    %c0 = arith.constant 0 : index
    %c0_0 = arith.constant 0 : index
    %0 = vector.load %arg1[%c0, %c0_0] : memref<2x1024xbf16, #tpu.memory_space<vmem>>, vector<2x1024xbf16>
    %c0_1 = arith.constant 0 : index
    %c0_2 = arith.constant 0 : index
    %1 = vector.load %arg2[%c0_1, %c0_2] : memref<1024x512xbf16, #tpu.memory_space<vmem>>, vector<1024x512xbf16>
    %cst = arith.constant dense<0.000000e+00> : vector<2x512xf32>
    %2 = tpu.matmul %0, %1, %cst {dimension_numbers = #tpu.dot_dimension_numbers<[1], [0], [0], [1], [0, 0, 1, 1], [], []>} : vector<2x1024xbf16>, vector<1024x512xbf16>, vector<2x512xf32> -> vector<2x512xf32>
    %c0_3 = arith.constant 0 : index
    %c0_4 = arith.constant 0 : index
    %3 = vector.load %arg3[%c0_3, %c0_4] : memref<1x512xf32, #tpu.memory_space<vmem>>, vector<1x512xf32>
    %4 = vector.broadcast %3 : vector<1x512xf32> to vector<2x512xf32>
    %5 = arith.addf %2, %4 : vector<2x512xf32>
    %cst_5 = arith.constant 0.000000e+00 : f32
    %6 = vector.broadcast %cst_5 : f32 to vector<2x512xf32>
    %7 = arith.maximumf %5, %6 : vector<2x512xf32>
    %8 = arith.truncf %7 : vector<2x512xf32> to vector<2x512xbf16>
    %c0_6 = arith.constant 0 : index
    %c0_7 = arith.constant 0 : index
    %9 = vector.load %arg4[%c0_6, %c0_7] : memref<512x128xbf16, #tpu.memory_space<vmem>>, vector<512x128xbf16>
    %cst_8 = arith.constant dense<0.000000e+00> : vector<2x128xf32>
    %10 = tpu.matmul %8, %9, %cst_8 {dimension_numbers = #tpu.dot_dimension_numbers<[1], [0], [0], [1], [0, 0, 1, 1], [], []>} : vector<2x512xbf16>, vector<512x128xbf16>, vector<2x128xf32> -> vector<2x128xf32>
    %c0_9 = arith.constant 0 : index
    %c0_10 = arith.constant 0 : index
    %11 = vector.load %arg5[%c0_9, %c0_10] : memref<1x128xf32, #tpu.memory_space<vmem>>, vector<1x128xf32>
    %12 = vector.broadcast %11 : vector<1x128xf32> to vector<2x128xf32>
    %13 = arith.addf %10, %12 : vector<2x128xf32>
    %c0_11 = arith.constant 0 : index
    %c0_12 = arith.constant 0 : index
    %14 = vector.load %arg6[%c0_11, %c0_12] : memref<2x128xf32, #tpu.memory_space<vmem>>, vector<2x128xf32>
    tpu.vector_store %arg6[%c0_11, %c0_12], %13 {strides = array<i32>} : memref<2x128xf32, #tpu.memory_space<vmem>>, vector<2x128xf32>,
    return
  }
  func.func @transform_0(%arg0: i32) -> (i32, i32) {
    %c0_i32 = arith.constant 0 : i32
    %c0_i32_0 = arith.constant 0 : i32
    return %arg0, %c0_i32 : i32, i32
  }
  func.func @transform_1(%arg0: i32) -> (i32, i32) {
    %c0_i32 = arith.constant 0 : i32
    %c0_i32_0 = arith.constant 0 : i32
    %c0_i32_1 = arith.constant 0 : i32
    return %c0_i32, %c0_i32_0 : i32, i32
  }
  func.func @transform_2(%arg0: i32) -> (i32, i32) {
    %c0_i32 = arith.constant 0 : i32
    %c0_i32_0 = arith.constant 0 : i32
    %c0_i32_1 = arith.constant 0 : i32
    return %c0_i32, %c0_i32_0 : i32, i32
  }
  func.func @transform_3(%arg0: i32) -> (i32, i32) {
    %c0_i32 = arith.constant 0 : i32
    %c0_i32_0 = arith.constant 0 : i32
    %c0_i32_1 = arith.constant 0 : i32
    return %c0_i32, %c0_i32_0 : i32, i32
  }
  func.func @transform_4(%arg0: i32) -> (i32, i32) {
    %c0_i32 = arith.constant 0 : i32
    %c0_i32_0 = arith.constant 0 : i32
    %c0_i32_1 = arith.constant 0 : i32
    return %c0_i32, %c0_i32_0 : i32, i32
  }
  func.func @transform_5(%arg0: i32) -> (i32, i32) {
    %c0_i32 = arith.constant 0 : i32
    %c0_i32_0 = arith.constant 0 : i32
    return %arg0, %c0_i32 : i32, i32
  }
}

</mosaic_0001>

<bundles_post_ra>
// kernel: fedavg_cnn_forward.3
= control target key start
LH: loop header
LB: loop body
LE: loop exit
PB: predicated region body
PF: predicated region fallthrough
CT: control target
= control target key end

     0   :  { %vm227_vm0 = vcmask 1043456   ;;  %vm228_vm1 = vcmask 1044480   ;;  %vm172_vm2 = vcmask 203776   ;;  %v2454_v1 = vmov 65535   ;;  %s3190_s4 = inlined_call_operand.vmem [shape: bf16[25,32], index: 4, kind: input, shape index: {}]   ;;  %s3191_s0 = inlined_call_operand.vmem [shape: bf16[288,25], index: 0, kind: input, shape index: {}]   ;;  %s3192_s1 = inlined_call_operand.vmem [shape: bf16[288,25], index: 1, kind: input, shape index: {}]   ;;  %s3193_s2 = inlined_call_operand.vmem [shape: bf16[288,25], index: 2, kind: input, shape index: {}]   ;;  %s3194_s3 = inlined_call_operand.vmem [shape: bf16[288,25], index: 3, kind: input, shape index: {}]   ;;  %s3195_s5 = inlined_call_operand.vmem [shape: f32[1,32], index: 5, kind: input, shape index: {}]   ;;  %s3196_s6 = inlined_call_operand.vmem [shape: bf16[288,32], index: 6, kind: output, shape index: {}]  }
   0x1   :  { %v2379_v0 = vld [vmem:[%s3190_s4] sm:$0xff]   ;;  %v229_v2 = vsel %vm227_vm0, 4294967295, %v2454_v1  ;;  %v2380_v3 = vld [vmem:[%s3190_s4 + $0x8] sm:$0x1f]   ;;  %v2385_v10 = vld [vmem:[%s3191_s0 + $0x10] sm:$0xff]   ;;  %vm1878_vm3 = vcmask 257024  }
   0x2   :  { %2218 = vmatprep.subr.bf16.mxu0 %v2379_v0  ;;  %2258 = vmatprep.subr.bf16.mxu1 %v2379_v0  ;;  %v230_v4 = vsel %vm228_vm1, %v229_v2, 0  ;;  %v2381_v5 = vld [vmem:[%s3191_s0] sm:$0xff]   ;;  %v2383_v8 = vld [vmem:[%s3191_s0 + $0x8] sm:$0xff]   ;;  %v2386_v11 = vld [vmem:[%s3192_s1 + $0x10] sm:$0xff]  }
   0x3   :  { %2219 = vmatpush3.bf16.msra.mxu0 %v2379_v0  ;;  %2259 = vmatpush3.bf16.msra.mxu1 %v2379_v0  ;;  %v232_v6 = vand.u32 %v2380_v3, %v230_v4  ;;  %v2382_v7 = vld [vmem:[%s3192_s1] sm:$0xff]   ;;  %v2384_v9 = vld [vmem:[%s3192_s1 + $0x8] sm:$0xff]   ;;  %v2387_v12 = vld [vmem:[%s3191_s0 + $0x18] sm:$0xff]  }
   0x4   :  { %2222 = vmatprep.mubr.msk.bf16.mxu0 %vm172_vm2, %v2381_v5  ;;  %2262 = vmatprep.mubr.msk.bf16.mxu1 %vm172_vm2, %v2382_v7  ;;  %v2388_v13 = vld [vmem:[%s3192_s1 + $0x18] sm:$0xff]   ;;  %v2389_v14 = vld [vmem:[%s3191_s0 + $0x20] sm:$0xff]   ;;  %v2391_v16 = vld [vmem:[%s3191_s0 + $0x28] sm:$0xff]  }
   0x5   :  { %2220 = vmatprep.subr.bf16.mxu0 %v232_v6  ;;  %2260 = vmatprep.subr.bf16.mxu1 %v232_v6  ;;  %v2390_v15 = vld [vmem:[%s3192_s1 + $0x20] sm:$0xff]   ;;  %v2392_v17 = vld [vmem:[%s3192_s1 + $0x28] sm:$0xff]   ;;  %v2393_v18 = vld [vmem:[%s3191_s0 + $0x30] sm:$0xff]  }
   0x6   :  { %v2394_v19 = vld [vmem:[%s3192_s1 + $0x30] sm:$0xff]   ;;  %v2395_v20 = vld [vmem:[%s3191_s0 + $0x38] sm:$0xff]   ;;  %v2397_v22 = vld [vmem:[%s3191_s0 + $0x40] sm:$0xff]  }
   0x7   :  { %2221 = vmatpush3.bf16.msra.mxu0 %v232_v6  ;;  %2261 = vmatpush3.bf16.msra.mxu1 %v232_v6  ;;  %v2396_v21 = vld [vmem:[%s3192_s1 + $0x38] sm:$0xff]   ;;  %v2398_v23 = vld [vmem:[%s3192_s1 + $0x40] sm:$0xff]   ;;  %v2399_v24 = vld [vmem:[%s3191_s0 + $0x48] sm:$0xff]  }
   0x8   :  { %2298 = vmatprep.subr.bf16.mxu0 %v2379_v0  ;;  %2338 = vmatprep.subr.bf16.mxu1 %v2379_v0  ;;  %v2400_v25 = vld [vmem:[%s3192_s1 + $0x48] sm:$0xff]   ;;  %v2401_v26 = vld [vmem:[%s3191_s0 + $0x50] sm:$0xff]   ;;  %v2403_v28 = vld [vmem:[%s3191_s0 + $0x58] sm:$0xff]  }
   0x9   :  { %v2402_v27 = vld [vmem:[%s3192_s1 + $0x50] sm:$0xff]   ;;  %v2404_v29 = vld [vmem:[%s3192_s1 + $0x58] sm:$0xff]   ;;  %v2405_v30 = vld [vmem:[%s3191_s0 + $0x60] sm:$0xff]  }
   0xa   :  { %2223 = vmatmul.mubr.msk.bf16.vlgmr.msra.gmra.mrb[0].mxu0 %vm172_vm2, %v2383_v8  ;;  %2263 = vmatmul.mubr.msk.bf16.vlgmr.msra.gmra.mrb[0].mxu1 %vm172_vm2, %v2384_v9  ;;  %v2406_v31 = vld [vmem:[%s3192_s1 + $0x60] sm:$0xff]   ;;  %v2407_v32 = vld [vmem:[%s3191_s0 + $0x68] sm:$0xff]   ;;  %v2409_v34 = vld [vmem:[%s3191_s0 + $0x70] sm:$0xff]  }
   0xb   :  { %2299 = vmatpush3.bf16.msra.mxu0 %v2379_v0  ;;  %2339 = vmatpush3.bf16.msra.mxu1 %v2379_v0  ;;  %v2408_v33 = vld [vmem:[%s3192_s1 + $0x68] sm:$0xff]   ;;  %v2410_v35 = vld [vmem:[%s3192_s1 + $0x70] sm:$0xff]   ;;  %v2411_v36 = vld [vmem:[%s3191_s0 + $0x78] sm:$0xff]  }
   0xc   :  { %2226 = vmatprep.mubr.msk.bf16.mxu0 %vm172_vm2, %v2385_v10  ;;  %2266 = vmatprep.mubr.msk.bf16.mxu1 %vm172_vm2, %v2386_v11  ;;  %v2412_v37 = vld [vmem:[%s3192_s1 + $0x78] sm:$0xff]   ;;  %v2413_v38 = vld [vmem:[%s3191_s0 + $0x80] sm:$0xff]   ;;  %v2415_v40 = vld [vmem:[%s3191_s0 + $0x88] sm:$0xff]  }
   0xd   :  { %2300 = vmatprep.subr.bf16.mxu0 %v232_v6  ;;  %2340 = vmatprep.subr.bf16.mxu1 %v232_v6  ;;  %v2414_v39 = vld [vmem:[%s3192_s1 + $0x80] sm:$0xff]   ;;  %v2416_v41 = vld [vmem:[%s3192_s1 + $0x88] sm:$0xff]   ;;  %v2421_v46 = vld [vmem:[%s3193_s2 + $0x10] sm:$0xff]  }
   0xe   :  { %v2417_v42 = vld [vmem:[%s3193_s2] sm:$0xff]   ;;  %v2419_v44 = vld [vmem:[%s3193_s2 + $0x8] sm:$0xff]   ;;  %v2422_v47 = vld [vmem:[%s3194_s3 + $0x10] sm:$0xff]  }
   0xf   :  { %2301 = vmatpush3.bf16.msra.mxu0 %v232_v6  ;;  %2341 = vmatpush3.bf16.msra.mxu1 %v232_v6  ;;  %v2418_v43 = vld [vmem:[%s3194_s3] sm:$0xff]   ;;  %v2420_v45 = vld [vmem:[%s3194_s3 + $0x8] sm:$0xff]   ;;  %v2423_v48 = vld [vmem:[%s3193_s2 + $0x18] sm:$0xff]  }
  0x10   :  { %v2424_v49 = vld [vmem:[%s3194_s3 + $0x18] sm:$0xff]   ;;  %v2425_v50 = vld [vmem:[%s3193_s2 + $0x20] sm:$0xff]   ;;  %v2427_v52 = vld [vmem:[%s3193_s2 + $0x28] sm:$0xff]  }
  0x11   :  { %v2426_v51 = vld [vmem:[%s3194_s3 + $0x20] sm:$0xff]   ;;  %v2428_v53 = vld [vmem:[%s3194_s3 + $0x28] sm:$0xff]   ;;  %v2429_v54 = vld [vmem:[%s3193_s2 + $0x30] sm:$0xff]  }
  0x12   :  { %2227 = vmatmul.mubr.msk.bf16.gmra.mrb[4].mxu0 %vm172_vm2, %v2387_v12  ;;  %2267 = vmatmul.mubr.msk.bf16.gmra.mrb[4].mxu1 %vm172_vm2, %v2388_v13  ;;  %v2430_v55 = vld [vmem:[%s3194_s3 + $0x30] sm:$0xff]   ;;  %v2431_v56 = vld [vmem:[%s3193_s2 + $0x38] sm:$0xff]   ;;  %v2433_v58 = vld [vmem:[%s3193_s2 + $0x40] sm:$0xff]  }
  0x13   :  { %2230 = vmatprep.mubr.msk.bf16.mxu0 %vm172_vm2, %v2389_v14  ;;  %2270 = vmatprep.mubr.msk.bf16.mxu1 %vm172_vm2, %v2390_v15  ;;  %v2432_v57 = vld [vmem:[%s3194_s3 + $0x38] sm:$0xff]   ;;  %v2434_v59 = vld [vmem:[%s3194_s3 + $0x40] sm:$0xff]   ;;  %v2435_v60 = vld [vmem:[%s3193_s2 + $0x48] sm:$0xff]  }
  0x14   :  { %v2436_v61 = vld [vmem:[%s3194_s3 + $0x48] sm:$0xff]   ;;  %v2437_v62 = vld [vmem:[%s3193_s2 + $0x50] sm:$0xff]   ;;  %v2439_v0 = vld [vmem:[%s3193_s2 + $0x58] sm:$0xff]  }
  0x15   :  { %v2438_v63 = vld [vmem:[%s3194_s3 + $0x50] sm:$0xff]   ;;  %v2440_v1 = vld [vmem:[%s3194_s3 + $0x58] sm:$0xff]   ;;  %v2441_v2 = vld [vmem:[%s3193_s2 + $0x60] sm:$0xff]  }
  0x16   :  { %v2442_v3 = vld [vmem:[%s3194_s3 + $0x60] sm:$0xff]   ;;  %v2443_v4 = vld [vmem:[%s3193_s2 + $0x68] sm:$0xff]   ;;  %v2445_v6 = vld [vmem:[%s3193_s2 + $0x70] sm:$0xff]  }
  0x17   :  { %v2444_v5 = vld [vmem:[%s3194_s3 + $0x68] sm:$0xff]   ;;  %v2446_v7 = vld [vmem:[%s3194_s3 + $0x70] sm:$0xff]   ;;  %v2447_v8 = vld [vmem:[%s3193_s2 + $0x78] sm:$0xff]  }
  0x18   :  { %v2448_v9 = vld [vmem:[%s3194_s3 + $0x78] sm:$0xff]   ;;  %v2449_v10 = vld [vmem:[%s3193_s2 + $0x80] sm:$0xff]   ;;  %v2451_v12 = vld [vmem:[%s3193_s2 + $0x88] sm:$0xff]  }
  0x19   :  { %v2450_v11 = vld [vmem:[%s3194_s3 + $0x80] sm:$0xff]   ;;  %v2452_v13 = vld [vmem:[%s3194_s3 + $0x88] sm:$0xff]  }
  0x1a   :  { %2231 = vmatmul.mubr.msk.bf16.gmra.mrb[8].mxu0 %vm172_vm2, %v2391_v16  ;;  %2271 = vmatmul.mubr.msk.bf16.gmra.mrb[8].mxu1 %vm172_vm2, %v2392_v17  ;;  %v2787_v14 = vld [vmem:[%s3195_s5] ss:$0 sm:$0xff] }
  0x1b   :  { %2234 = vmatprep.mubr.msk.bf16.mxu0 %vm172_vm2, %v2393_v18  ;;  %2274 = vmatprep.mubr.msk.bf16.mxu1 %vm172_vm2, %v2394_v19 }
  0x22   :  { %2235 = vmatmul.mubr.msk.bf16.gmra.mrb[12].mxu0 %vm172_vm2, %v2395_v20  ;;  %2275 = vmatmul.mubr.msk.bf16.gmra.mrb[12].mxu1 %vm172_vm2, %v2396_v21 }
  0x23   :  { %2238 = vmatprep.mubr.msk.bf16.mxu0 %vm172_vm2, %v2397_v22  ;;  %2278 = vmatprep.mubr.msk.bf16.mxu1 %vm172_vm2, %v2398_v23 }
  0x2a   :  { %2239 = vmatmul.mubr.msk.bf16.gmra.mrb[16].mxu0 %vm172_vm2, %v2399_v24  ;;  %2279 = vmatmul.mubr.msk.bf16.gmra.mrb[16].mxu1 %vm172_vm2, %v2400_v25 }
  0x2b   :  { %2242 = vmatprep.mubr.msk.bf16.mxu0 %vm172_vm2, %v2401_v26  ;;  %2282 = vmatprep.mubr.msk.bf16.mxu1 %vm172_vm2, %v2402_v27 }
  0x32   :  { %2243 = vmatmul.mubr.msk.bf16.gmra.mrb[20].mxu0 %vm172_vm2, %v2403_v28  ;;  %2283 = vmatmul.mubr.msk.bf16.gmra.mrb[20].mxu1 %vm172_vm2, %v2404_v29 }
  0x33   :  { %2246 = vmatprep.mubr.msk.bf16.mxu0 %vm172_vm2, %v2405_v30  ;;  %2286 = vmatprep.mubr.msk.bf16.mxu1 %vm172_vm2, %v2406_v31 }
  0x3a   :  { %2247 = vmatmul.mubr.msk.bf16.gmra.mrb[24].mxu0 %vm172_vm2, %v2407_v32  ;;  %2287 = vmatmul.mubr.msk.bf16.gmra.mrb[24].mxu1 %vm172_vm2, %v2408_v33 }
  0x3b   :  { %2250 = vmatprep.mubr.msk.bf16.mxu0 %vm172_vm2, %v2409_v34  ;;  %2290 = vmatprep.mubr.msk.bf16.mxu1 %vm172_vm2, %v2410_v35 }
  0x42   :  { %2251 = vmatmul.mubr.msk.bf16.gmra.mrb[28].mxu0 %vm172_vm2, %v2411_v36  ;;  %2291 = vmatmul.mubr.msk.bf16.gmra.mrb[28].mxu1 %vm172_vm2, %v2412_v37 }
  0x43   :  { %2254 = vmatprep.mubr.msk.bf16.mxu0 %vm172_vm2, %v2413_v38  ;;  %2294 = vmatprep.mubr.msk.bf16.mxu1 %vm172_vm2, %v2414_v39 }
  0x4a   :  { %2255 = vmatmul.mubr.msk.bf16.gmra.mrb[32].mxu0 %vm172_vm2, %v2415_v40  ;;  %2295 = vmatmul.mubr.msk.bf16.gmra.mrb[32].mxu1 %vm172_vm2, %v2416_v41 }
  0x4b   :  { %2302 = vmatprep.mubr.msk.bf16.mxu0 %vm172_vm2, %v2417_v42  ;;  %2342 = vmatprep.mubr.msk.bf16.mxu1 %vm172_vm2, %v2418_v43 }
  0x52   :  { %2303 = vmatmul.mubr.msk.bf16.vlgmr.msra.gmra.mrb[36].mxu0 %vm172_vm2, %v2419_v44  ;;  %2343 = vmatmul.mubr.msk.bf16.vlgmr.msra.gmra.mrb[36].mxu1 %vm172_vm2, %v2420_v45 }
  0x53   :  { %2306 = vmatprep.mubr.msk.bf16.mxu0 %vm172_vm2, %v2421_v46  ;;  %2346 = vmatprep.mubr.msk.bf16.mxu1 %vm172_vm2, %v2422_v47 }
  0x5a   :  { %2307 = vmatmul.mubr.msk.bf16.gmra.mrb[40].mxu0 %vm172_vm2, %v2423_v48  ;;  %2347 = vmatmul.mubr.msk.bf16.gmra.mrb[40].mxu1 %vm172_vm2, %v2424_v49 }
  0x5b   :  { %2310 = vmatprep.mubr.msk.bf16.mxu0 %vm172_vm2, %v2425_v50  ;;  %2350 = vmatprep.mubr.msk.bf16.mxu1 %vm172_vm2, %v2426_v51 }
  0x62   :  { %2311 = vmatmul.mubr.msk.bf16.gmra.mrb[44].mxu0 %vm172_vm2, %v2427_v52  ;;  %2351 = vmatmul.mubr.msk.bf16.gmra.mrb[44].mxu1 %vm172_vm2, %v2428_v53 }
  0x63   :  { %2314 = vmatprep.mubr.msk.bf16.mxu0 %vm172_vm2, %v2429_v54  ;;  %2354 = vmatprep.mubr.msk.bf16.mxu1 %vm172_vm2, %v2430_v55 }
  0x6a   :  { %2315 = vmatmul.mubr.msk.bf16.gmra.mrb[48].mxu0 %vm172_vm2, %v2431_v56  ;;  %2355 = vmatmul.mubr.msk.bf16.gmra.mrb[48].mxu1 %vm172_vm2, %v2432_v57 }
  0x6b   :  { %2318 = vmatprep.mubr.msk.bf16.mxu0 %vm172_vm2, %v2433_v58  ;;  %2358 = vmatprep.mubr.msk.bf16.mxu1 %vm172_vm2, %v2434_v59 }
  0x72   :  { %2319 = vmatmul.mubr.msk.bf16.gmra.mrb[52].mxu0 %vm172_vm2, %v2435_v60  ;;  %2359 = vmatmul.mubr.msk.bf16.gmra.mrb[52].mxu1 %vm172_vm2, %v2436_v61 }
  0x73   :  { %2322 = vmatprep.mubr.msk.bf16.mxu0 %vm172_vm2, %v2437_v62  ;;  %2362 = vmatprep.mubr.msk.bf16.mxu1 %vm172_vm2, %v2438_v63 }
  0x7a   :  { %2323 = vmatmul.mubr.msk.bf16.gmra.mrb[56].mxu0 %vm172_vm2, %v2439_v0  ;;  %2363 = vmatmul.mubr.msk.bf16.gmra.mrb[56].mxu1 %vm172_vm2, %v2440_v1 }
  0x7b   :  { %2326 = vmatprep.mubr.msk.bf16.mxu0 %vm172_vm2, %v2441_v2  ;;  %2366 = vmatprep.mubr.msk.bf16.mxu1 %vm172_vm2, %v2442_v3 }
  0x82   :  { %2327 = vmatmul.mubr.msk.bf16.gmra.mrb[60].mxu0 %vm172_vm2, %v2443_v4  ;;  %2367 = vmatmul.mubr.msk.bf16.gmra.mrb[60].mxu1 %vm172_vm2, %v2444_v5 }
  0x83   :  { %2330 = vmatprep.mubr.msk.bf16.mxu0 %vm172_vm2, %v2445_v6  ;;  %2370 = vmatprep.mubr.msk.bf16.mxu1 %vm172_vm2, %v2446_v7 }
  0x8a   :  { %2331 = vmatmul.mubr.msk.bf16.gmra.mrb[64].mxu0 %vm172_vm2, %v2447_v8  ;;  %2371 = vmatmul.mubr.msk.bf16.gmra.mrb[64].mxu1 %vm172_vm2, %v2448_v9 }
  0x8b   :  { %2334 = vmatprep.mubr.msk.bf16.mxu0 %vm172_vm2, %v2449_v10  ;;  %2374 = vmatprep.mubr.msk.bf16.mxu1 %vm172_vm2, %v2450_v11 }
  0x92   :  { %2335 = vmatmul.mubr.msk.bf16.gmra.mrb[68].mxu0 %vm172_vm2, %v2451_v12  ;;  %2375 = vmatmul.mubr.msk.bf16.gmra.mrb[68].mxu1 %vm172_vm2, %v2452_v13 }
  0xdd   :  { %v2224_v15 = vpop.f32.mrb[0].mxu0  ;;  %v2264_v16 = vpop.f32.mrb[0].mxu1 }
  0xde   :  { %v277_v17 = vadd.f32 %v2224_v15, %v2787_v14  ;;  %v670_v18 = vadd.f32 %v2264_v16, %v2787_v14  ;;  %v268_v19 = vpop.f32.mrb[1].mxu0  ;;  %v661_v20 = vpop.f32.mrb[1].mxu1 }
  0xdf   :  { %v269_v21 = vadd.f32 %v2787_v14, %v268_v19  ;;  %v662_v22 = vadd.f32 %v2787_v14, %v661_v20  ;;  %v2225_v23 = vpop.f32.mrb[2].mxu0  ;;  %v2265_v24 = vpop.f32.mrb[2].mxu1 }
  0xe0   :  { %v413_v25 = vmax.f32 %v277_v17, 0.0  ;;  %v806_v26 = vmax.f32 %v670_v18, 0.0  ;;  %v280_v27 = vadd.f32 %v2225_v23, %v2787_v14  ;;  %v673_v28 = vadd.f32 %v2265_v24, %v2787_v14  ;;  %v271_v29 = vpop.f32.mrb[3].mxu0  ;;  %v664_v30 = vpop.f32.mrb[3].mxu1 }
  0xe1   :  { %v411_v31 = vmax.f32 %v269_v21, 0.0  ;;  %v804_v32 = vmax.f32 %v662_v22, 0.0  ;;  %v272_v33 = vadd.f32 %v2787_v14, %v271_v29  ;;  %v665_v34 = vadd.f32 %v2787_v14, %v664_v30 }
  0xe2   :  { %v2797_v35 = vmax.f32 %v413_v25, %v806_v26  ;;  %v414_v36 = vmax.f32 %v280_v27, 0.0  ;;  %v807_v37 = vmax.f32 %v673_v28, 0.0 }
  0xe3   :  { %v2799_v38 = vmax.f32 %v411_v31, %v804_v32  ;;  %v412_v39 = vmax.f32 %v272_v33, 0.0  ;;  %v805_v40 = vmax.f32 %v665_v34, 0.0 }
  0xe4   :  { %v2801_v41 = vmax.f32 %v414_v36, %v807_v37 }
  0xe5   :  { %v2803_v42 = vmax.f32 %v412_v39, %v805_v40  ;;  %v2228_v43 = vpop.f32.mrb[4].mxu0  ;;  %v2268_v44 = vpop.f32.mrb[4].mxu1 }
  0xe6   :  { %v293_v45 = vadd.f32 %v2228_v43, %v2787_v14  ;;  %v686_v46 = vadd.f32 %v2268_v44, %v2787_v14  ;;  %v284_v47 = vpop.f32.mrb[5].mxu0  ;;  %v677_v48 = vpop.f32.mrb[5].mxu1 }
  0xe7   :  { %v285_v49 = vadd.f32 %v2787_v14, %v284_v47  ;;  %v678_v50 = vadd.f32 %v2787_v14, %v677_v48  ;;  %v2229_v51 = vpop.f32.mrb[6].mxu0  ;;  %v2269_v52 = vpop.f32.mrb[6].mxu1 }
  0xe8   :  { %v417_v53 = vmax.f32 %v293_v45, 0.0  ;;  %v810_v54 = vmax.f32 %v686_v46, 0.0  ;;  %v296_v55 = vadd.f32 %v2229_v51, %v2787_v14  ;;  %v689_v56 = vadd.f32 %v2269_v52, %v2787_v14  ;;  %v287_v57 = vpop.f32.mrb[7].mxu0  ;;  %v680_v58 = vpop.f32.mrb[7].mxu1 }
  0xe9   :  { %v415_v59 = vmax.f32 %v285_v49, 0.0  ;;  %v808_v60 = vmax.f32 %v678_v50, 0.0  ;;  %v288_v61 = vadd.f32 %v2787_v14, %v287_v57  ;;  %v681_v62 = vadd.f32 %v2787_v14, %v680_v58 }
  0xea   :  { %v2813_v63 = vmax.f32 %v417_v53, %v810_v54  ;;  %v418_v0 = vmax.f32 %v296_v55, 0.0  ;;  %v811_v1 = vmax.f32 %v689_v56, 0.0 }
  0xeb   :  { %v2815_v2 = vmax.f32 %v415_v59, %v808_v60  ;;  %v416_v3 = vmax.f32 %v288_v61, 0.0  ;;  %v809_v4 = vmax.f32 %v681_v62, 0.0 }
  0xec   :  { %v2817_v5 = vmax.f32 %v418_v0, %v811_v1 }
  0xed   :  { %v2819_v6 = vmax.f32 %v416_v3, %v809_v4  ;;  %v2232_v7 = vpop.f32.mrb[8].mxu0  ;;  %v2272_v8 = vpop.f32.mrb[8].mxu1 }
  0xee   :  { %v309_v9 = vadd.f32 %v2232_v7, %v2787_v14  ;;  %v702_v10 = vadd.f32 %v2272_v8, %v2787_v14  ;;  %v300_v11 = vpop.f32.mrb[9].mxu0  ;;  %v693_v12 = vpop.f32.mrb[9].mxu1 }
  0xef   :  { %v301_v13 = vadd.f32 %v2787_v14, %v300_v11  ;;  %v694_v15 = vadd.f32 %v2787_v14, %v693_v12  ;;  %v2233_v16 = vpop.f32.mrb[10].mxu0  ;;  %v2273_v17 = vpop.f32.mrb[10].mxu1 }
  0xf0   :  { %v421_v18 = vmax.f32 %v309_v9, 0.0  ;;  %v814_v19 = vmax.f32 %v702_v10, 0.0  ;;  %v312_v20 = vadd.f32 %v2233_v16, %v2787_v14  ;;  %v705_v21 = vadd.f32 %v2273_v17, %v2787_v14  ;;  %v303_v22 = vpop.f32.mrb[11].mxu0  ;;  %v696_v23 = vpop.f32.mrb[11].mxu1 }
  0xf1   :  { %v419_v24 = vmax.f32 %v301_v13, 0.0  ;;  %v812_v25 = vmax.f32 %v694_v15, 0.0  ;;  %v304_v26 = vadd.f32 %v2787_v14, %v303_v22  ;;  %v697_v27 = vadd.f32 %v2787_v14, %v696_v23 }
  0xf2   :  { %v2829_v28 = vmax.f32 %v421_v18, %v814_v19  ;;  %v422_v29 = vmax.f32 %v312_v20, 0.0  ;;  %v815_v30 = vmax.f32 %v705_v21, 0.0 }
  0xf3   :  { %v2831_v31 = vmax.f32 %v419_v24, %v812_v25  ;;  %v420_v32 = vmax.f32 %v304_v26, 0.0  ;;  %v813_v33 = vmax.f32 %v697_v27, 0.0 }
  0xf4   :  { %v2833_v34 = vmax.f32 %v422_v29, %v815_v30 }
  0xf5   :  { %v2835_v36 = vmax.f32 %v420_v32, %v813_v33  ;;  %v2236_v37 = vpop.f32.mrb[12].mxu0  ;;  %v2276_v39 = vpop.f32.mrb[12].mxu1 }
  0xf6   :  { %v325_v40 = vadd.f32 %v2236_v37, %v2787_v14  ;;  %v718_v43 = vadd.f32 %v2276_v39, %v2787_v14  ;;  %v316_v44 = vpop.f32.mrb[13].mxu0  ;;  %v709_v45 = vpop.f32.mrb[13].mxu1 }
  0xf7   :  { %v317_v46 = vadd.f32 %v2787_v14, %v316_v44  ;;  %v710_v47 = vadd.f32 %v2787_v14, %v709_v45  ;;  %v2237_v48 = vpop.f32.mrb[14].mxu0  ;;  %v2277_v49 = vpop.f32.mrb[14].mxu1 }
  0xf8   :  { %v425_v50 = vmax.f32 %v325_v40, 0.0  ;;  %v818_v51 = vmax.f32 %v718_v43, 0.0  ;;  %v328_v52 = vadd.f32 %v2237_v48, %v2787_v14  ;;  %v721_v53 = vadd.f32 %v2277_v49, %v2787_v14  ;;  %v319_v54 = vpop.f32.mrb[15].mxu0  ;;  %v712_v55 = vpop.f32.mrb[15].mxu1 }
  0xf9   :  { %v423_v56 = vmax.f32 %v317_v46, 0.0  ;;  %v816_v57 = vmax.f32 %v710_v47, 0.0  ;;  %v320_v58 = vadd.f32 %v2787_v14, %v319_v54  ;;  %v713_v59 = vadd.f32 %v2787_v14, %v712_v55 }
  0xfa   :  { %v2845_v60 = vmax.f32 %v425_v50, %v818_v51  ;;  %v426_v61 = vmax.f32 %v328_v52, 0.0  ;;  %v819_v62 = vmax.f32 %v721_v53, 0.0 }
  0xfb   :  { %v2847_v0 = vmax.f32 %v423_v56, %v816_v57  ;;  %v424_v1 = vmax.f32 %v320_v58, 0.0  ;;  %v817_v3 = vmax.f32 %v713_v59, 0.0 }
  0xfc   :  { %v2849_v4 = vmax.f32 %v426_v61, %v819_v62 }
  0xfd   :  { %v2851_v7 = vmax.f32 %v424_v1, %v817_v3  ;;  %v2240_v8 = vpop.f32.mrb[16].mxu0  ;;  %v2280_v9 = vpop.f32.mrb[16].mxu1 }
  0xfe   :  { %v341_v10 = vadd.f32 %v2240_v8, %v2787_v14  ;;  %v734_v11 = vadd.f32 %v2280_v9, %v2787_v14  ;;  %v332_v12 = vpop.f32.mrb[17].mxu0  ;;  %v725_v13 = vpop.f32.mrb[17].mxu1 }
  0xff   :  { %v333_v15 = vadd.f32 %v2787_v14, %v332_v12  ;;  %v726_v16 = vadd.f32 %v2787_v14, %v725_v13  ;;  %v2241_v17 = vpop.f32.mrb[18].mxu0  ;;  %v2281_v18 = vpop.f32.mrb[18].mxu1 }
 0x100   :  { %v429_v19 = vmax.f32 %v341_v10, 0.0  ;;  %v822_v20 = vmax.f32 %v734_v11, 0.0  ;;  %v344_v21 = vadd.f32 %v2241_v17, %v2787_v14  ;;  %v737_v22 = vadd.f32 %v2281_v18, %v2787_v14  ;;  %v335_v23 = vpop.f32.mrb[19].mxu0  ;;  %v728_v24 = vpop.f32.mrb[19].mxu1 }
 0x101   :  { %v427_v25 = vmax.f32 %v333_v15, 0.0  ;;  %v820_v26 = vmax.f32 %v726_v16, 0.0  ;;  %v336_v27 = vadd.f32 %v2787_v14, %v335_v23  ;;  %v729_v29 = vadd.f32 %v2787_v14, %v728_v24 }
 0x102   :  { %v2861_v30 = vmax.f32 %v429_v19, %v822_v20  ;;  %v430_v32 = vmax.f32 %v344_v21, 0.0  ;;  %v823_v33 = vmax.f32 %v737_v22, 0.0 }
 0x103   :  { %v2863_v37 = vmax.f32 %v427_v25, %v820_v26  ;;  %v428_v39 = vmax.f32 %v336_v27, 0.0  ;;  %v821_v40 = vmax.f32 %v729_v29, 0.0 }
 0x104   :  { %v2865_v43 = vmax.f32 %v430_v32, %v823_v33 }
 0x105   :  { %v2867_v44 = vmax.f32 %v428_v39, %v821_v40  ;;  %v2244_v45 = vpop.f32.mrb[20].mxu0  ;;  %v2284_v46 = vpop.f32.mrb[20].mxu1 }
 0x106   :  { %v357_v47 = vadd.f32 %v2244_v45, %v2787_v14  ;;  %v750_v48 = vadd.f32 %v2284_v46, %v2787_v14  ;;  %v348_v49 = vpop.f32.mrb[21].mxu0  ;;  %v741_v50 = vpop.f32.mrb[21].mxu1 }
 0x107   :  { %v349_v51 = vadd.f32 %v2787_v14, %v348_v49  ;;  %v742_v52 = vadd.f32 %v2787_v14, %v741_v50  ;;  %v2245_v53 = vpop.f32.mrb[22].mxu0  ;;  %v2285_v54 = vpop.f32.mrb[22].mxu1 }
 0x108   :  { %v433_v55 = vmax.f32 %v357_v47, 0.0  ;;  %v826_v56 = vmax.f32 %v750_v48, 0.0  ;;  %v360_v57 = vadd.f32 %v2245_v53, %v2787_v14  ;;  %v753_v58 = vadd.f32 %v2285_v54, %v2787_v14  ;;  %v351_v59 = vpop.f32.mrb[23].mxu0  ;;  %v744_v61 = vpop.f32.mrb[23].mxu1 }
 0x109   :  { %v431_v62 = vmax.f32 %v349_v51, 0.0  ;;  %v824_v1 = vmax.f32 %v742_v52, 0.0  ;;  %v352_v3 = vadd.f32 %v2787_v14, %v351_v59  ;;  %v745_v8 = vadd.f32 %v2787_v14, %v744_v61 }
 0x10a   :  { %v2877_v9 = vmax.f32 %v433_v55, %v826_v56  ;;  %v434_v10 = vmax.f32 %v360_v57, 0.0  ;;  %v827_v11 = vmax.f32 %v753_v58, 0.0 }
 0x10b   :  { %v2879_v12 = vmax.f32 %v431_v62, %v824_v1  ;;  %v432_v13 = vmax.f32 %v352_v3, 0.0  ;;  %v825_v15 = vmax.f32 %v745_v8, 0.0 }
 0x10c   :  { %v2881_v16 = vmax.f32 %v434_v10, %v827_v11 }
 0x10d   :  { %v2883_v17 = vmax.f32 %v432_v13, %v825_v15  ;;  %v2248_v18 = vpop.f32.mrb[24].mxu0  ;;  %v2288_v19 = vpop.f32.mrb[24].mxu1 }
 0x10e   :  { %v373_v20 = vadd.f32 %v2248_v18, %v2787_v14  ;;  %v766_v21 = vadd.f32 %v2288_v19, %v2787_v14  ;;  %v364_v22 = vpop.f32.mrb[25].mxu0  ;;  %v757_v23 = vpop.f32.mrb[25].mxu1 }
 0x10f   :  { %v365_v24 = vadd.f32 %v2787_v14, %v364_v22  ;;  %v758_v25 = vadd.f32 %v2787_v14, %v757_v23  ;;  %v2249_v26 = vpop.f32.mrb[26].mxu0  ;;  %v2289_v27 = vpop.f32.mrb[26].mxu1 }
 0x110   :  { %v437_v29 = vmax.f32 %v373_v20, 0.0  ;;  %v830_v32 = vmax.f32 %v766_v21, 0.0  ;;  %v376_v33 = vadd.f32 %v2249_v26, %v2787_v14  ;;  %v769_v39 = vadd.f32 %v2289_v27, %v2787_v14  ;;  %v367_v40 = vpop.f32.mrb[27].mxu0  ;;  %v760_v45 = vpop.f32.mrb[27].mxu1 }
 0x111   :  { %v435_v46 = vmax.f32 %v365_v24, 0.0  ;;  %v828_v47 = vmax.f32 %v758_v25, 0.0  ;;  %v368_v48 = vadd.f32 %v2787_v14, %v367_v40  ;;  %v761_v49 = vadd.f32 %v2787_v14, %v760_v45 }
 0x112   :  { %v2893_v50 = vmax.f32 %v437_v29, %v830_v32  ;;  %v438_v51 = vmax.f32 %v376_v33, 0.0  ;;  %v831_v52 = vmax.f32 %v769_v39, 0.0 }
 0x113   :  { %v2895_v53 = vmax.f32 %v435_v46, %v828_v47  ;;  %v436_v54 = vmax.f32 %v368_v48, 0.0  ;;  %v829_v55 = vmax.f32 %v761_v49, 0.0 }
 0x114   :  { %v2897_v56 = vmax.f32 %v438_v51, %v831_v52 }
 0x115   :  { %v2899_v57 = vmax.f32 %v436_v54, %v829_v55  ;;  %v2252_v58 = vpop.f32.mrb[28].mxu0  ;;  %v2292_v59 = vpop.f32.mrb[28].mxu1 }
 0x116   :  { %v389_v61 = vadd.f32 %v2252_v58, %v2787_v14  ;;  %v782_v62 = vadd.f32 %v2292_v59, %v2787_v14  ;;  %v380_v1 = vpop.f32.mrb[29].mxu0  ;;  %v773_v3 = vpop.f32.mrb[29].mxu1 }
 0x117   :  { %v381_v8 = vadd.f32 %v2787_v14, %v380_v1  ;;  %v774_v10 = vadd.f32 %v2787_v14, %v773_v3  ;;  %v2253_v11 = vpop.f32.mrb[30].mxu0  ;;  %v2293_v13 = vpop.f32.mrb[30].mxu1 }
 0x118   :  { %v441_v15 = vmax.f32 %v389_v61, 0.0  ;;  %v834_v18 = vmax.f32 %v782_v62, 0.0  ;;  %v392_v19 = vadd.f32 %v2253_v11, %v2787_v14  ;;  %v785_v20 = vadd.f32 %v2293_v13, %v2787_v14  ;;  %v383_v21 = vpop.f32.mrb[31].mxu0  ;;  %v776_v22 = vpop.f32.mrb[31].mxu1 }
 0x119   :  { %v439_v23 = vmax.f32 %v381_v8, 0.0  ;;  %v832_v24 = vmax.f32 %v774_v10, 0.0  ;;  %v384_v25 = vadd.f32 %v2787_v14, %v383_v21  ;;  %v777_v26 = vadd.f32 %v2787_v14, %v776_v22 }
 0x11a   :  { %v2909_v27 = vmax.f32 %v441_v15, %v834_v18  ;;  %v442_v29 = vmax.f32 %v392_v19, 0.0  ;;  %v835_v32 = vmax.f32 %v785_v20, 0.0 }
 0x11b   :  { %v2911_v33 = vmax.f32 %v439_v23, %v832_v24  ;;  %v440_v39 = vmax.f32 %v384_v25, 0.0  ;;  %v833_v40 = vmax.f32 %v777_v26, 0.0 }
 0x11c   :  { %v2913_v45 = vmax.f32 %v442_v29, %v835_v32 }
 0x11d   :  { %v2915_v46 = vmax.f32 %v440_v39, %v833_v40  ;;  %v2256_v47 = vpop.f32.mrb[32].mxu0  ;;  %v2296_v48 = vpop.f32.mrb[32].mxu1 }
 0x11e   :  { %v405_v49 = vadd.f32 %v2256_v47, %v2787_v14  ;;  %v798_v51 = vadd.f32 %v2296_v48, %v2787_v14  ;;  %v396_v52 = vpop.f32.mrb[33].mxu0  ;;  %v789_v54 = vpop.f32.mrb[33].mxu1 }
 0x11f   :  { %v397_v55 = vadd.f32 %v2787_v14, %v396_v52  ;;  %v790_v58 = vadd.f32 %v2787_v14, %v789_v54  ;;  %v2257_v59 = vpop.f32.mrb[34].mxu0  ;;  %v2297_v61 = vpop.f32.mrb[34].mxu1 }
 0x120   :  { %v445_v62 = vmax.f32 %v405_v49, 0.0  ;;  %v838_v1 = vmax.f32 %v798_v51, 0.0  ;;  %v408_v3 = vadd.f32 %v2257_v59, %v2787_v14  ;;  %v801_v8 = vadd.f32 %v2297_v61, %v2787_v14  ;;  %v399_v10 = vpop.f32.mrb[35].mxu0  ;;  %v792_v11 = vpop.f32.mrb[35].mxu1 }
 0x121   :  { %v443_v13 = vmax.f32 %v397_v55, 0.0  ;;  %v836_v15 = vmax.f32 %v790_v58, 0.0  ;;  %v400_v18 = vadd.f32 %v2787_v14, %v399_v10  ;;  %v793_v19 = vadd.f32 %v2787_v14, %v792_v11 }
 0x122   :  { %v2925_v20 = vmax.f32 %v445_v62, %v838_v1  ;;  %v446_v21 = vmax.f32 %v408_v3, 0.0  ;;  %v839_v22 = vmax.f32 %v801_v8, 0.0 }
 0x123   :  { %v2927_v23 = vmax.f32 %v443_v13, %v836_v15  ;;  %v444_v24 = vmax.f32 %v400_v18, 0.0  ;;  %v837_v25 = vmax.f32 %v793_v19, 0.0 }
 0x124   :  { %v2929_v26 = vmax.f32 %v446_v21, %v839_v22 }
 0x125   :  { %v2931_v29 = vmax.f32 %v444_v24, %v837_v25  ;;  %v2304_v32 = vpop.f32.mrb[36].mxu0  ;;  %v2344_v39 = vpop.f32.mrb[36].mxu1 }
 0x126   :  { %v1099_v40 = vadd.f32 %v2304_v32, %v2787_v14  ;;  %v1492_v47 = vadd.f32 %v2344_v39, %v2787_v14  ;;  %v1090_v48 = vpop.f32.mrb[37].mxu0  ;;  %v1483_v49 = vpop.f32.mrb[37].mxu1 }
 0x127   :  { %v1091_v51 = vadd.f32 %v2787_v14, %v1090_v48  ;;  %v1484_v52 = vadd.f32 %v2787_v14, %v1483_v49  ;;  %v2305_v54 = vpop.f32.mrb[38].mxu0  ;;  %v2345_v55 = vpop.f32.mrb[38].mxu1 }
 0x128   :  { %v1235_v58 = vmax.f32 %v1099_v40, 0.0  ;;  %v1628_v59 = vmax.f32 %v1492_v47, 0.0  ;;  %v1102_v61 = vadd.f32 %v2305_v54, %v2787_v14  ;;  %v1495_v62 = vadd.f32 %v2345_v55, %v2787_v14  ;;  %v1093_v1 = vpop.f32.mrb[39].mxu0  ;;  %v1486_v3 = vpop.f32.mrb[39].mxu1 }
 0x129   :  { %v1233_v8 = vmax.f32 %v1091_v51, 0.0  ;;  %v1626_v10 = vmax.f32 %v1484_v52, 0.0  ;;  %v1094_v11 = vadd.f32 %v2787_v14, %v1093_v1  ;;  %v1487_v13 = vadd.f32 %v2787_v14, %v1486_v3 }
 0x12a   :  { %v1664_v15 = vmax.f32 %v1235_v58, %v1628_v59  ;;  %v1236_v18 = vmax.f32 %v1102_v61, 0.0  ;;  %v1629_v19 = vmax.f32 %v1495_v62, 0.0 }
 0x12b   :  { %v1662_v21 = vmax.f32 %v1233_v8, %v1626_v10  ;;  %v1234_v22 = vmax.f32 %v1094_v11, 0.0  ;;  %v1627_v24 = vmax.f32 %v1487_v13, 0.0 }
 0x12c   :  { %v1700_v25 = vmax.f32 %v2797_v35, %v1664_v15  ;;  %v1665_v32 = vmax.f32 %v1236_v18, %v1629_v19 }
 0x12d   :  { %v1698_v39 = vmax.f32 %v2799_v38, %v1662_v21  ;;  %v1663_v40 = vmax.f32 %v1234_v22, %v1627_v24  ;;  %v2308_v47 = vpop.f32.mrb[40].mxu0  ;;  %v2348_v48 = vpop.f32.mrb[40].mxu1 }
 0x12e   :  { %v2104_v49 = vpack.c.bf16 %v1700_v25, %v1700_v25  ;;  %v1701_v51 = vmax.f32 %v2801_v41, %v1665_v32  ;;  %v1115_v52 = vadd.f32 %v2308_v47, %v2787_v14  ;;  %v1508_v54 = vadd.f32 %v2348_v48, %v2787_v14  ;;  %v1106_v55 = vpop.f32.mrb[41].mxu0  ;;  %v1499_v58 = vpop.f32.mrb[41].mxu1 }
 0x12f   :  { %v2102_v59 = vpack.c.bf16 %v1698_v39, %v1698_v39  ;;  %v1699_v61 = vmax.f32 %v2803_v42, %v1663_v40  ;;  %v1107_v35 = vadd.f32 %v2787_v14, %v1106_v55  ;;  %v1500_v62 = vadd.f32 %v2787_v14, %v1499_v58  ;;  %v2309_v38 = vpop.f32.mrb[42].mxu0  ;;  %v2349_v1 = vpop.f32.mrb[42].mxu1 }
 0x130   :  { %1881 = vst.msk [vmem:[%s3196_s6 + $0x8] sm:$0xf] %vm1878_vm3, %v2104_v49  ;;  %v2105_v41 = vpack.c.bf16 %v1701_v51, %v1701_v51  ;;  %v1239_v3 = vmax.f32 %v1115_v52, 0.0  ;;  %v1632_v8 = vmax.f32 %v1508_v54, 0.0  ;;  %v1118_v10 = vadd.f32 %v2309_v38, %v2787_v14  ;;  %v1109_v11 = vpop.f32.mrb[43].mxu0  ;;  %v1502_v13 = vpop.f32.mrb[43].mxu1 }
 0x131   :  { %1879 = vst.msk [vmem:[%s3196_s6] sm:$0xf] %vm1878_vm3, %v2102_v59  ;;  %v2103_v42 = vpack.c.bf16 %v1699_v61, %v1699_v61  ;;  %v1237_v15 = vmax.f32 %v1107_v35, 0.0  ;;  %v1630_v18 = vmax.f32 %v1500_v62, 0.0  ;;  %v1511_v19 = vadd.f32 %v2349_v1, %v2787_v14 }
 0x132   :  { %1882 = vst.msk [vmem:[%s3196_s6 + $0xc] sm:$0xf] %vm1878_vm3, %v2105_v41  ;;  %v1668_v21 = vmax.f32 %v1239_v3, %v1632_v8  ;;  %v1240_v22 = vmax.f32 %v1118_v10, 0.0  ;;  %v1110_v24 = vadd.f32 %v2787_v14, %v1109_v11  ;;  %v1503_v25 = vadd.f32 %v2787_v14, %v1502_v13 }
 0x133   :  { %1880 = vst.msk [vmem:[%s3196_s6 + $0x4] sm:$0xf] %vm1878_vm3, %v2103_v42  ;;  %v1666_v32 = vmax.f32 %v1237_v15, %v1630_v18  ;;  %v1633_v39 = vmax.f32 %v1511_v19, 0.0 }
 0x134   :  { %v1704_v40 = vmax.f32 %v2813_v63, %v1668_v21  ;;  %v1238_v47 = vmax.f32 %v1110_v24, 0.0  ;;  %v1631_v48 = vmax.f32 %v1503_v25, 0.0 }
 0x135   :  { %v1702_v49 = vmax.f32 %v2815_v2, %v1666_v32  ;;  %v1669_v51 = vmax.f32 %v1240_v22, %v1633_v39  ;;  %v2312_v52 = vpop.f32.mrb[44].mxu0  ;;  %v2352_v54 = vpop.f32.mrb[44].mxu1 }
 0x136   :  { %v2108_v55 = vpack.c.bf16 %v1704_v40, %v1704_v40  ;;  %v1667_v58 = vmax.f32 %v1238_v47, %v1631_v48  ;;  %v1131_v59 = vadd.f32 %v2312_v52, %v2787_v14  ;;  %v1524_v61 = vadd.f32 %v2352_v54, %v2787_v14  ;;  %v1122_v35 = vpop.f32.mrb[45].mxu0  ;;  %v1515_v62 = vpop.f32.mrb[45].mxu1 }
 0x137   :  { %v2106_v38 = vpack.c.bf16 %v1702_v49, %v1702_v49  ;;  %v1705_v1 = vmax.f32 %v2817_v5, %v1669_v51  ;;  %v1123_v63 = vadd.f32 %v2787_v14, %v1122_v35  ;;  %v1516_v41 = vadd.f32 %v2787_v14, %v1515_v62  ;;  %v2313_v3 = vpop.f32.mrb[46].mxu0  ;;  %v2353_v2 = vpop.f32.mrb[46].mxu1 }
 0x138   :  { %1885 = vst.msk [vmem:[%s3196_s6 + $0x18] sm:$0xf] %vm1878_vm3, %v2108_v55  ;;  %v1703_v8 = vmax.f32 %v2819_v6, %v1667_v58  ;;  %v1243_v10 = vmax.f32 %v1131_v59, 0.0  ;;  %v1636_v11 = vmax.f32 %v1524_v61, 0.0  ;;  %v1134_v13 = vadd.f32 %v2313_v3, %v2787_v14  ;;  %v1125_v42 = vpop.f32.mrb[47].mxu0  ;;  %v1518_v15 = vpop.f32.mrb[47].mxu1 }
 0x139   :  { %1883 = vst.msk [vmem:[%s3196_s6 + $0x10] sm:$0xf] %vm1878_vm3, %v2106_v38  ;;  %v2109_v5 = vpack.c.bf16 %v1705_v1, %v1705_v1  ;;  %v1241_v18 = vmax.f32 %v1123_v63, 0.0  ;;  %v1634_v19 = vmax.f32 %v1516_v41, 0.0  ;;  %v1527_v21 = vadd.f32 %v2353_v2, %v2787_v14 }
 0x13a   :  { %v2107_v22 = vpack.c.bf16 %v1703_v8, %v1703_v8  ;;  %v1672_v24 = vmax.f32 %v1243_v10, %v1636_v11  ;;  %v1244_v25 = vmax.f32 %v1134_v13, 0.0  ;;  %v1126_v6 = vadd.f32 %v2787_v14, %v1125_v42 }
 0x13b   :  { %1886 = vst.msk [vmem:[%s3196_s6 + $0x1c] sm:$0xf] %vm1878_vm3, %v2109_v5  ;;  %v1670_v32 = vmax.f32 %v1241_v18, %v1634_v19  ;;  %v1637_v39 = vmax.f32 %v1527_v21, 0.0  ;;  %v1519_v40 = vadd.f32 %v2787_v14, %v1518_v15 }
 0x13c   :  { %1884 = vst.msk [vmem:[%s3196_s6 + $0x14] sm:$0xf] %vm1878_vm3, %v2107_v22  ;;  %v1708_v47 = vmax.f32 %v2829_v28, %v1672_v24  ;;  %v1242_v48 = vmax.f32 %v1126_v6, 0.0 }
 0x13d   :  { %v1706_v49 = vmax.f32 %v2831_v31, %v1670_v32  ;;  %v1673_v51 = vmax.f32 %v1244_v25, %v1637_v39  ;;  %v1635_v52 = vmax.f32 %v1519_v40, 0.0  ;;  %v2316_v54 = vpop.f32.mrb[48].mxu0  ;;  %v2356_v55 = vpop.f32.mrb[48].mxu1 }
 0x13e   :  { %v2112_v58 = vpack.c.bf16 %v1708_v47, %v1708_v47  ;;  %v1147_v59 = vadd.f32 %v2316_v54, %v2787_v14  ;;  %v1540_v61 = vadd.f32 %v2356_v55, %v2787_v14  ;;  %v1138_v35 = vpop.f32.mrb[49].mxu0  ;;  %v1531_v62 = vpop.f32.mrb[49].mxu1 }
 0x13f   :  { %v2110_v38 = vpack.c.bf16 %v1706_v49, %v1706_v49  ;;  %v1709_v1 = vmax.f32 %v2833_v34, %v1673_v51  ;;  %v1671_v63 = vmax.f32 %v1242_v48, %v1635_v52  ;;  %v1139_v28 = vadd.f32 %v2787_v14, %v1138_v35  ;;  %v2317_v41 = vpop.f32.mrb[50].mxu0  ;;  %v2357_v3 = vpop.f32.mrb[50].mxu1 }
 0x140   :  { %1889 = vst.msk [vmem:[%s3196_s6 + $0x28] sm:$0xf] %vm1878_vm3, %v2112_v58  ;;  %v1247_v31 = vmax.f32 %v1147_v59, 0.0  ;;  %v1640_v2 = vmax.f32 %v1540_v61, 0.0  ;;  %v1532_v8 = vadd.f32 %v2787_v14, %v1531_v62  ;;  %v1150_v10 = vadd.f32 %v2317_v41, %v2787_v14  ;;  %v1141_v11 = vpop.f32.mrb[51].mxu0  ;;  %v1534_v13 = vpop.f32.mrb[51].mxu1 }
 0x141   :  { %1887 = vst.msk [vmem:[%s3196_s6 + $0x20] sm:$0xf] %vm1878_vm3, %v2110_v38  ;;  %v2113_v34 = vpack.c.bf16 %v1709_v1, %v1709_v1  ;;  %v1707_v42 = vmax.f32 %v2835_v36, %v1671_v63  ;;  %v1245_v15 = vmax.f32 %v1139_v28, 0.0  ;;  %v1543_v5 = vadd.f32 %v2357_v3, %v2787_v14 }
 0x142   :  { %v1676_v18 = vmax.f32 %v1247_v31, %v1640_v2  ;;  %v1638_v19 = vmax.f32 %v1532_v8, 0.0  ;;  %v1248_v21 = vmax.f32 %v1150_v10, 0.0  ;;  %v1142_v22 = vadd.f32 %v2787_v14, %v1141_v11 }
 0x143   :  { %1890 = vst.msk [vmem:[%s3196_s6 + $0x2c] sm:$0xf] %vm1878_vm3, %v2113_v34  ;;  %v2111_v24 = vpack.c.bf16 %v1707_v42, %v1707_v42  ;;  %v1641_v25 = vmax.f32 %v1543_v5, 0.0  ;;  %v1535_v6 = vadd.f32 %v2787_v14, %v1534_v13 }
 0x144   :  { %v1712_v32 = vmax.f32 %v2845_v60, %v1676_v18  ;;  %v1674_v36 = vmax.f32 %v1245_v15, %v1638_v19  ;;  %v1246_v39 = vmax.f32 %v1142_v22, 0.0 }
 0x145   :  { %1888 = vst.msk [vmem:[%s3196_s6 + $0x24] sm:$0xf] %vm1878_vm3, %v2111_v24  ;;  %v1677_v40 = vmax.f32 %v1248_v21, %v1641_v25  ;;  %v1639_v47 = vmax.f32 %v1535_v6, 0.0  ;;  %v2320_v48 = vpop.f32.mrb[52].mxu0  ;;  %v2360_v49 = vpop.f32.mrb[52].mxu1 }
 0x146   :  { %v2116_v51 = vpack.c.bf16 %v1712_v32, %v1712_v32  ;;  %v1710_v52 = vmax.f32 %v2847_v0, %v1674_v36  ;;  %v1163_v54 = vadd.f32 %v2320_v48, %v2787_v14  ;;  %v1556_v55 = vadd.f32 %v2360_v49, %v2787_v14  ;;  %v1154_v58 = vpop.f32.mrb[53].mxu0  ;;  %v1547_v60 = vpop.f32.mrb[53].mxu1 }
 0x147   :  { %v1713_v59 = vmax.f32 %v2849_v4, %v1677_v40  ;;  %v1675_v61 = vmax.f32 %v1246_v39, %v1639_v47  ;;  %v1155_v35 = vadd.f32 %v2787_v14, %v1154_v58  ;;  %v1548_v62 = vadd.f32 %v2787_v14, %v1547_v60  ;;  %v2321_v38 = vpop.f32.mrb[54].mxu0  ;;  %v2361_v1 = vpop.f32.mrb[54].mxu1 }
 0x148   :  { %1893 = vst.msk [vmem:[%s3196_s6 + $0x38] sm:$0xf] %vm1878_vm3, %v2116_v51  ;;  %v2114_v0 = vpack.c.bf16 %v1710_v52, %v1710_v52  ;;  %v1251_v63 = vmax.f32 %v1163_v54, 0.0  ;;  %v1644_v28 = vmax.f32 %v1556_v55, 0.0  ;;  %v1166_v41 = vadd.f32 %v2321_v38, %v2787_v14  ;;  %v1157_v3 = vpop.f32.mrb[55].mxu0  ;;  %v1550_v31 = vpop.f32.mrb[55].mxu1 }
 0x149   :  { %v2117_v4 = vpack.c.bf16 %v1713_v59, %v1713_v59  ;;  %v1711_v2 = vmax.f32 %v2851_v7, %v1675_v61  ;;  %v1249_v8 = vmax.f32 %v1155_v35, 0.0  ;;  %v1642_v10 = vmax.f32 %v1548_v62, 0.0 }
 0x14a   :  { %1891 = vst.msk [vmem:[%s3196_s6 + $0x30] sm:$0xf] %vm1878_vm3, %v2114_v0  ;;  %v1680_v11 = vmax.f32 %v1251_v63, %v1644_v28  ;;  %v1252_v13 = vmax.f32 %v1166_v41, 0.0  ;;  %v1559_v34 = vadd.f32 %v2361_v1, %v2787_v14  ;;  %v1158_v42 = vadd.f32 %v2787_v14, %v1157_v3 }
 0x14b   :  { %1894 = vst.msk [vmem:[%s3196_s6 + $0x3c] sm:$0xf] %vm1878_vm3, %v2117_v4  ;;  %v2115_v15 = vpack.c.bf16 %v1711_v2, %v1711_v2  ;;  %v1678_v7 = vmax.f32 %v1249_v8, %v1642_v10  ;;  %v1551_v5 = vadd.f32 %v2787_v14, %v1550_v31 }
 0x14c   :  { %v1716_v18 = vmax.f32 %v2861_v30, %v1680_v11  ;;  %v1645_v19 = vmax.f32 %v1559_v34, 0.0  ;;  %v1250_v21 = vmax.f32 %v1158_v42, 0.0 }
 0x14d   :  { %1892 = vst.msk [vmem:[%s3196_s6 + $0x34] sm:$0xf] %vm1878_vm3, %v2115_v15  ;;  %v1714_v22 = vmax.f32 %v2863_v37, %v1678_v7  ;;  %v1643_v24 = vmax.f32 %v1551_v5, 0.0  ;;  %v2324_v25 = vpop.f32.mrb[56].mxu0  ;;  %v2364_v6 = vpop.f32.mrb[56].mxu1 }
 0x14e   :  { %v2120_v32 = vpack.c.bf16 %v1716_v18, %v1716_v18  ;;  %v1681_v36 = vmax.f32 %v1252_v13, %v1645_v19  ;;  %v1179_v39 = vadd.f32 %v2324_v25, %v2787_v14  ;;  %v1572_v40 = vadd.f32 %v2364_v6, %v2787_v14  ;;  %v1170_v47 = vpop.f32.mrb[57].mxu0  ;;  %v1563_v30 = vpop.f32.mrb[57].mxu1 }
 0x14f   :  { %v2118_v48 = vpack.c.bf16 %v1714_v22, %v1714_v22  ;;  %v1679_v49 = vmax.f32 %v1250_v21, %v1643_v24  ;;  %v1171_v51 = vadd.f32 %v2787_v14, %v1170_v47  ;;  %v1564_v52 = vadd.f32 %v2787_v14, %v1563_v30  ;;  %v2325_v54 = vpop.f32.mrb[58].mxu0  ;;  %v2365_v55 = vpop.f32.mrb[58].mxu1 }
 0x150   :  { %1897 = vst.msk [vmem:[%s3196_s6 + $0x48] sm:$0xf] %vm1878_vm3, %v2120_v32  ;;  %v1717_v37 = vmax.f32 %v2865_v43, %v1681_v36  ;;  %v1255_v58 = vmax.f32 %v1179_v39, 0.0  ;;  %v1648_v60 = vmax.f32 %v1572_v40, 0.0  ;;  %v1182_v59 = vadd.f32 %v2325_v54, %v2787_v14  ;;  %v1173_v61 = vpop.f32.mrb[59].mxu0  ;;  %v1566_v35 = vpop.f32.mrb[59].mxu1 }
 0x151   :  { %1895 = vst.msk [vmem:[%s3196_s6 + $0x40] sm:$0xf] %vm1878_vm3, %v2118_v48  ;;  %v1715_v62 = vmax.f32 %v2867_v44, %v1679_v49  ;;  %v1253_v38 = vmax.f32 %v1171_v51, 0.0  ;;  %v1646_v1 = vmax.f32 %v1564_v52, 0.0  ;;  %v1575_v0 = vadd.f32 %v2365_v55, %v2787_v14  ;;  %v3102_v55 = vld [vmem:[%s3195_s5] ss:$0 sm:$0xff] }
 0x152   :  { %v2121_v63 = vpack.c.bf16 %v1717_v37, %v1717_v37  ;;  %v1684_v28 = vmax.f32 %v1255_v58, %v1648_v60  ;;  %v1256_v43 = vmax.f32 %v1182_v59, 0.0  ;;  %v1174_v41 = vadd.f32 %v2787_v14, %v1173_v61 }
 0x153   :  { %v2119_v3 = vpack.c.bf16 %v1715_v62, %v1715_v62  ;;  %v1682_v31 = vmax.f32 %v1253_v38, %v1646_v1  ;;  %v1649_v4 = vmax.f32 %v1575_v0, 0.0  ;;  %v1567_v2 = vadd.f32 %v2787_v14, %v1566_v35 }
 0x154   :  { %1898 = vst.msk [vmem:[%s3196_s6 + $0x4c] sm:$0xf] %vm1878_vm3, %v2121_v63  ;;  %v1720_v44 = vmax.f32 %v2877_v9, %v1684_v28  ;;  %v1254_v8 = vmax.f32 %v1174_v41, 0.0 }
 0x155   :  { %1896 = vst.msk [vmem:[%s3196_s6 + $0x44] sm:$0xf] %vm1878_vm3, %v2119_v3  ;;  %v1718_v10 = vmax.f32 %v2879_v12, %v1682_v31  ;;  %v1685_v11 = vmax.f32 %v1256_v43, %v1649_v4  ;;  %v1647_v13 = vmax.f32 %v1567_v2, 0.0  ;;  %v2328_v34 = vpop.f32.mrb[60].mxu0  ;;  %v2368_v42 = vpop.f32.mrb[60].mxu1 }
 0x156   :  { %v2124_v15 = vpack.c.bf16 %v1720_v44, %v1720_v44  ;;  %v1195_v7 = vadd.f32 %v2328_v34, %v2787_v14  ;;  %v1588_v5 = vadd.f32 %v2368_v42, %v2787_v14  ;;  %v1186_v18 = vpop.f32.mrb[61].mxu0  ;;  %v1579_v19 = vpop.f32.mrb[61].mxu1 }
 0x157   :  { %v2122_v9 = vpack.c.bf16 %v1718_v10, %v1718_v10  ;;  %v1721_v21 = vmax.f32 %v2881_v16, %v1685_v11  ;;  %v1683_v22 = vmax.f32 %v1254_v8, %v1647_v13  ;;  %v1187_v24 = vadd.f32 %v2787_v14, %v1186_v18  ;;  %v2329_v25 = vpop.f32.mrb[62].mxu0  ;;  %v2369_v6 = vpop.f32.mrb[62].mxu1 }
 0x158   :  { %1901 = vst.msk [vmem:[%s3196_s6 + $0x58] sm:$0xf] %vm1878_vm3, %v2124_v15  ;;  %v1259_v12 = vmax.f32 %v1195_v7, 0.0  ;;  %v1652_v32 = vmax.f32 %v1588_v5, 0.0  ;;  %v1580_v36 = vadd.f32 %v2787_v14, %v1579_v19  ;;  %v1198_v39 = vadd.f32 %v2329_v25, %v2787_v14  ;;  %v1189_v40 = vpop.f32.mrb[63].mxu0  ;;  %v1582_v47 = vpop.f32.mrb[63].mxu1 }
 0x159   :  { %1899 = vst.msk [vmem:[%s3196_s6 + $0x50] sm:$0xf] %vm1878_vm3, %v2122_v9  ;;  %v2125_v16 = vpack.c.bf16 %v1721_v21, %v1721_v21  ;;  %v1719_v30 = vmax.f32 %v2883_v17, %v1683_v22  ;;  %v1257_v48 = vmax.f32 %v1187_v24, 0.0  ;;  %v1591_v49 = vadd.f32 %v2369_v6, %v2787_v14 }
 0x15a   :  { %v1688_v51 = vmax.f32 %v1259_v12, %v1652_v32  ;;  %v1650_v52 = vmax.f32 %v1580_v36, 0.0  ;;  %v1260_v54 = vmax.f32 %v1198_v39, 0.0  ;;  %v1190_v37 = vadd.f32 %v3102_v55, %v1189_v40 }
 0x15b   :  { %1902 = vst.msk [vmem:[%s3196_s6 + $0x5c] sm:$0xf] %vm1878_vm3, %v2125_v16  ;;  %v2123_v58 = vpack.c.bf16 %v1719_v30, %v1719_v30  ;;  %v1653_v17 = vmax.f32 %v1591_v49, 0.0  ;;  %v1583_v60 = vadd.f32 %v3102_v55, %v1582_v47 }
 0x15c   :  { %v1724_v14 = vmax.f32 %v2893_v50, %v1688_v51  ;;  %v1686_v59 = vmax.f32 %v1257_v48, %v1650_v52  ;;  %v1258_v61 = vmax.f32 %v1190_v37, 0.0 }
 0x15d   :  { %1900 = vst.msk [vmem:[%s3196_s6 + $0x54] sm:$0xf] %vm1878_vm3, %v2123_v58  ;;  %v1689_v35 = vmax.f32 %v1260_v54, %v1653_v17  ;;  %v1651_v62 = vmax.f32 %v1583_v60, 0.0  ;;  %v2332_v38 = vpop.f32.mrb[64].mxu0  ;;  %v2372_v1 = vpop.f32.mrb[64].mxu1 }
 0x15e   :  { %v2128_v0 = vpack.c.bf16 %v1724_v14, %v1724_v14  ;;  %v1722_v63 = vmax.f32 %v2895_v53, %v1686_v59  ;;  %v1211_v28 = vadd.f32 %v3102_v55, %v2332_v38  ;;  %v1604_v43 = vadd.f32 %v3102_v55, %v2372_v1  ;;  %v1202_v41 = vpop.f32.mrb[65].mxu0  ;;  %v1595_v50 = vpop.f32.mrb[65].mxu1 }
 0x15f   :  { %v1725_v3 = vmax.f32 %v2897_v56, %v1689_v35  ;;  %v1687_v31 = vmax.f32 %v1258_v61, %v1651_v62  ;;  %v1203_v4 = vadd.f32 %v3102_v55, %v1202_v41  ;;  %v1596_v2 = vadd.f32 %v3102_v55, %v1595_v50  ;;  %v2333_v44 = vpop.f32.mrb[66].mxu0  ;;  %v2373_v8 = vpop.f32.mrb[66].mxu1 }
 0x160   :  { %1905 = vst.msk [vmem:[%s3196_s6 + $0x68] sm:$0xf] %vm1878_vm3, %v2128_v0  ;;  %v2126_v53 = vpack.c.bf16 %v1722_v63, %v1722_v63  ;;  %v1263_v10 = vmax.f32 %v1211_v28, 0.0  ;;  %v1656_v11 = vmax.f32 %v1604_v43, 0.0  ;;  %v1214_v13 = vadd.f32 %v3102_v55, %v2333_v44  ;;  %v1205_v34 = vpop.f32.mrb[67].mxu0  ;;  %v1598_v42 = vpop.f32.mrb[67].mxu1 }
 0x161   :  { %v2129_v56 = vpack.c.bf16 %v1725_v3, %v1725_v3  ;;  %v1723_v15 = vmax.f32 %v2899_v57, %v1687_v31  ;;  %v1261_v7 = vmax.f32 %v1203_v4, 0.0  ;;  %v1654_v5 = vmax.f32 %v1596_v2, 0.0 }
 0x162   :  { %1903 = vst.msk [vmem:[%s3196_s6 + $0x60] sm:$0xf] %vm1878_vm3, %v2126_v53  ;;  %v1692_v18 = vmax.f32 %v1263_v10, %v1656_v11  ;;  %v1264_v19 = vmax.f32 %v1214_v13, 0.0  ;;  %v1607_v9 = vadd.f32 %v3102_v55, %v2373_v8  ;;  %v1206_v21 = vadd.f32 %v3102_v55, %v1205_v34 }
 0x163   :  { %1906 = vst.msk [vmem:[%s3196_s6 + $0x6c] sm:$0xf] %vm1878_vm3, %v2129_v56  ;;  %v2127_v22 = vpack.c.bf16 %v1723_v15, %v1723_v15  ;;  %v1690_v57 = vmax.f32 %v1261_v7, %v1654_v5  ;;  %v1599_v24 = vadd.f32 %v3102_v55, %v1598_v42 }
 0x164   :  { %v1728_v25 = vmax.f32 %v2909_v27, %v1692_v18  ;;  %v1657_v6 = vmax.f32 %v1607_v9, 0.0  ;;  %v1262_v12 = vmax.f32 %v1206_v21, 0.0 }
 0x165   :  { %1904 = vst.msk [vmem:[%s3196_s6 + $0x64] sm:$0xf] %vm1878_vm3, %v2127_v22  ;;  %v1726_v32 = vmax.f32 %v2911_v33, %v1690_v57  ;;  %v1655_v36 = vmax.f32 %v1599_v24, 0.0  ;;  %v2336_v39 = vpop.f32.mrb[68].mxu0  ;;  %v2376_v40 = vpop.f32.mrb[68].mxu1 }
 0x166   :  { %v2132_v47 = vpack.c.bf16 %v1728_v25, %v1728_v25  ;;  %v1693_v16 = vmax.f32 %v1264_v19, %v1657_v6  ;;  %v1227_v30 = vadd.f32 %v3102_v55, %v2336_v39  ;;  %v1620_v48 = vadd.f32 %v3102_v55, %v2376_v40  ;;  %v1218_v49 = vpop.f32.mrb[69].mxu0  ;;  %v1611_v27 = vpop.f32.mrb[69].mxu1 }
 0x167   :  { %v2130_v51 = vpack.c.bf16 %v1726_v32, %v1726_v32  ;;  %v1691_v52 = vmax.f32 %v1262_v12, %v1655_v36  ;;  %v1219_v54 = vadd.f32 %v3102_v55, %v1218_v49  ;;  %v1612_v37 = vadd.f32 %v3102_v55, %v1611_v27  ;;  %v2337_v58 = vpop.f32.mrb[70].mxu0  ;;  %v2377_v17 = vpop.f32.mrb[70].mxu1 }
 0x168   :  { %1909 = vst.msk [vmem:[%s3196_s6 + $0x78] sm:$0xf] %vm1878_vm3, %v2132_v47  ;;  %v1729_v33 = vmax.f32 %v2913_v45, %v1693_v16  ;;  %v1267_v60 = vmax.f32 %v1227_v30, 0.0  ;;  %v1660_v14 = vmax.f32 %v1620_v48, 0.0  ;;  %v1230_v59 = vadd.f32 %v3102_v55, %v2337_v58  ;;  %v1221_v61 = vpop.f32.mrb[71].mxu0  ;;  %v1614_v35 = vpop.f32.mrb[71].mxu1 }
 0x169   :  { %1907 = vst.msk [vmem:[%s3196_s6 + $0x70] sm:$0xf] %vm1878_vm3, %v2130_v51  ;;  %v1727_v62 = vmax.f32 %v2915_v46, %v1691_v52  ;;  %v1265_v38 = vmax.f32 %v1219_v54, 0.0  ;;  %v1658_v1 = vmax.f32 %v1612_v37, 0.0  ;;  %v1623_v0 = vadd.f32 %v3102_v55, %v2377_v17 }
 0x16a   :  { %v2133_v63 = vpack.c.bf16 %v1729_v33, %v1729_v33  ;;  %v1696_v28 = vmax.f32 %v1267_v60, %v1660_v14  ;;  %v1268_v45 = vmax.f32 %v1230_v59, 0.0  ;;  %v1222_v43 = vadd.f32 %v3102_v55, %v1221_v61 }
 0x16b   :  { %v2131_v41 = vpack.c.bf16 %v1727_v62, %v1727_v62  ;;  %v1694_v50 = vmax.f32 %v1265_v38, %v1658_v1  ;;  %v1661_v3 = vmax.f32 %v1623_v0, 0.0  ;;  %v1615_v31 = vadd.f32 %v3102_v55, %v1614_v35 }
 0x16c   :  { %1910 = vst.msk [vmem:[%s3196_s6 + $0x7c] sm:$0xf] %vm1878_vm3, %v2133_v63  ;;  %v1732_v46 = vmax.f32 %v2925_v20, %v1696_v28  ;;  %v1266_v4 = vmax.f32 %v1222_v43, 0.0 }
 0x16d   :  { %1908 = vst.msk [vmem:[%s3196_s6 + $0x74] sm:$0xf] %vm1878_vm3, %v2131_v41  ;;  %v1730_v2 = vmax.f32 %v2927_v23, %v1694_v50  ;;  %v1697_v44 = vmax.f32 %v1268_v45, %v1661_v3  ;;  %v1659_v8 = vmax.f32 %v1615_v31, 0.0 }
 0x16e   :  { %v2136_v53 = vpack.c.bf16 %v1732_v46, %v1732_v46 }
 0x16f   :  { %v2134_v10 = vpack.c.bf16 %v1730_v2, %v1730_v2  ;;  %v1733_v55 = vmax.f32 %v2929_v26, %v1697_v44  ;;  %v1695_v11 = vmax.f32 %v1266_v4, %v1659_v8 }
 0x170   :  { %1913 = vst.msk [vmem:[%s3196_s6 + $0x88] sm:$0xf] %vm1878_vm3, %v2136_v53 }
 0x171   :  { %1911 = vst.msk [vmem:[%s3196_s6 + $0x80] sm:$0xf] %vm1878_vm3, %v2134_v10  ;;  %v2137_v20 = vpack.c.bf16 %v1733_v55, %v1733_v55  ;;  %v1731_v23 = vmax.f32 %v2931_v29, %v1695_v11 }
 0x173   :  { %1914 = vst.msk [vmem:[%s3196_s6 + $0x8c] sm:$0xf] %vm1878_vm3, %v2137_v20  ;;  %v2135_v26 = vpack.c.bf16 %v1731_v23, %v1731_v23 }
 0x175   :  { %1912 = vst.msk [vmem:[%s3196_s6 + $0x84] sm:$0xf] %vm1878_vm3, %v2135_v26 }

// kernel: fedavg_cnn_forward.4
= control target key start
LH: loop header
LB: loop body
LE: loop exit
PB: predicated region body
PF: predicated region fallthrough
CT: control target
= control target key end

     0   :  { %vm517_vm0 = vcmask 261120   ;;  %vm1628_vm1 = vcmask 519168   ;;  %s3016_s4 = inlined_call_operand.vmem [shape: bf16[800,64], index: 4, kind: input, shape index: {}]   ;;  %s3017_s0 = inlined_call_operand.vmem [shape: bf16[32,800], index: 0, kind: input, shape index: {}]   ;;  %s3018_s1 = inlined_call_operand.vmem [shape: bf16[32,800], index: 1, kind: input, shape index: {}]   ;;  %s3019_s2 = inlined_call_operand.vmem [shape: bf16[32,800], index: 2, kind: input, shape index: {}]   ;;  %s3020_s3 = inlined_call_operand.vmem [shape: bf16[32,800], index: 3, kind: input, shape index: {}]   ;;  %s3021_s5 = inlined_call_operand.vmem [shape: f32[1,64], index: 5, kind: input, shape index: {}]   ;;  %s3022_s6 = inlined_call_operand.vmem [shape: bf16[32,64], index: 6, kind: output, shape index: {}]  }
   0x1   :  { %v2312_v0 = vld [vmem:[%s3016_s4 + $0x40] sm:$0xff]   ;;  %v2335_v4 = vld [vmem:[%s3016_s4 + $0x48] sm:$0xff]   ;;  %v2359_v8 = vld [vmem:[%s3016_s4 + $0x50] sm:$0xff]  }
   0x2   :  { %v2317_v1 = vld [vmem:[%s3016_s4 + $0xc0] sm:$0xff]   ;;  %1760 = vmatprep.subr.bf16.mxu0 %v2312_v0  ;;  %v2341_v5 = vld [vmem:[%s3016_s4 + $0xc8] sm:$0xff]   ;;  %v2365_v9 = vld [vmem:[%s3016_s4 + $0xd0] sm:$0xff]  }
   0x3   :  { %v2323_v2 = vld [vmem:[%s3016_s4] sm:$0xff]   ;;  %1788 = vmatprep.subr.bf16.mxu1 %v2317_v1  ;;  %v2347_v6 = vld [vmem:[%s3016_s4 + $0x8] sm:$0xff]   ;;  %v2371_v10 = vld [vmem:[%s3016_s4 + $0x10] sm:$0xff]  }
   0x4   :  { %v2329_v3 = vld [vmem:[%s3016_s4 + $0x80] sm:$0xff]   ;;  %1761 = vmatpush3.bf16.msra.mxu0 %v2323_v2  ;;  %v2353_v7 = vld [vmem:[%s3016_s4 + $0x88] sm:$0xff]   ;;  %v2377_v11 = vld [vmem:[%s3016_s4 + $0x90] sm:$0xff]  }
   0x5   :  { %1789 = vmatpush3.bf16.msra.mxu1 %v2329_v3  ;;  %1762 = vmatprep.subr.bf16.mxu0 %v2335_v4  ;;  %v2383_v12 = vld [vmem:[%s3016_s4 + $0x58] sm:$0xff]   ;;  %v2407_v16 = vld [vmem:[%s3016_s4 + $0x60] sm:$0xff]   ;;  %v2431_v20 = vld [vmem:[%s3016_s4 + $0x68] sm:$0xff]  }
   0x6   :  { %1790 = vmatprep.subr.bf16.mxu1 %v2341_v5  ;;  %v2389_v13 = vld [vmem:[%s3016_s4 + $0xd8] sm:$0xff]   ;;  %v2413_v17 = vld [vmem:[%s3016_s4 + $0xe0] sm:$0xff]   ;;  %v2437_v21 = vld [vmem:[%s3016_s4 + $0xe8] sm:$0xff]  }
   0x7   :  { %v2395_v14 = vld [vmem:[%s3016_s4 + $0x18] sm:$0xff]   ;;  %v2419_v18 = vld [vmem:[%s3016_s4 + $0x20] sm:$0xff]   ;;  %v2443_v22 = vld [vmem:[%s3016_s4 + $0x28] sm:$0xff]  }
   0x8   :  { %1763 = vmatpush3.bf16.msra.mxu0 %v2347_v6  ;;  %v2401_v15 = vld [vmem:[%s3016_s4 + $0x98] sm:$0xff]   ;;  %v2425_v19 = vld [vmem:[%s3016_s4 + $0xa0] sm:$0xff]   ;;  %v2449_v23 = vld [vmem:[%s3016_s4 + $0xa8] sm:$0xff]  }
   0x9   :  { %1791 = vmatpush3.bf16.msra.mxu1 %v2353_v7  ;;  %1764 = vmatprep.subr.bf16.mxu0 %v2359_v8  ;;  %v2455_v24 = vld [vmem:[%s3016_s4 + $0x70] sm:$0xff]   ;;  %v2479_v28 = vld [vmem:[%s3016_s4 + $0x78] sm:$0xff]   ;;  %v2178_v33 = vld [vmem:[%s3017_s0 + $0x4] ss:$28 sps:$4 sm:$0xff]  }
   0xa   :  { %1792 = vmatprep.subr.bf16.mxu1 %v2365_v9  ;;  %v2461_v25 = vld [vmem:[%s3016_s4 + $0xf0] sm:$0xff]   ;;  %v2485_v29 = vld [vmem:[%s3016_s4 + $0xf8] sm:$0xff]   ;;  %v2179_v34 = vld [vmem:[%s3017_s0 + $0x8] ss:$28 sps:$4 sm:$0xff]   ;;  %556 = vmatprep.mubr.bf16.mxu0 %v2178_v33 }
   0xb   :  { %v2467_v26 = vld [vmem:[%s3016_s4 + $0x30] sm:$0xff]   ;;  %v2491_v30 = vld [vmem:[%s3016_s4 + $0x38] sm:$0xff]   ;;  %v2181_v35 = vld [vmem:[%s3017_s0 + $0xc] ss:$28 sps:$4 sm:$0xff]  }
   0xc   :  { %1765 = vmatpush3.bf16.msra.mxu0 %v2371_v10  ;;  %v2473_v27 = vld [vmem:[%s3016_s4 + $0xb0] sm:$0xff]   ;;  %v2497_v31 = vld [vmem:[%s3016_s4 + $0xb8] sm:$0xff]   ;;  %v2516_v36 = vld [vmem:[%s3016_s4 + $0x140] sm:$0xff]   ;;  %605 = vmatprep.mubr.bf16.mxu1 %v2181_v35 }
   0xd   :  { %1793 = vmatpush3.bf16.msra.mxu1 %v2377_v11  ;;  %1766 = vmatprep.subr.bf16.mxu0 %v2383_v12  ;;  %v2176_v32 = vld [vmem:[%s3017_s0] ss:$28 sps:$4 sm:$0xff]   ;;  %v2533_v39 = vld [vmem:[%s3016_s4 + $0x148] sm:$0xff]   ;;  %v2191_v43 = vld [vmem:[%s3017_s0 + $0x38] ss:$28 sps:$4 sm:$0xff]  }
   0xe   :  { %1794 = vmatprep.subr.bf16.mxu1 %v2389_v13  ;;  %v2521_v37 = vld [vmem:[%s3016_s4 + $0x180] sm:$0xff]   ;;  %v2540_v40 = vld [vmem:[%s3016_s4 + $0x108] sm:$0xff]   ;;  %v2187_v41 = vld [vmem:[%s3017_s0 + $0x3c] ss:$28 sps:$4 sm:$0xff]  }
   0xf   :  { %v2527_v38 = vld [vmem:[%s3016_s4 + $0x100] sm:$0xff]   ;;  %v2559_v45 = vld [vmem:[%s3016_s4 + $0x150] sm:$0xff]   ;;  %v2564_v46 = vld [vmem:[%s3016_s4 + $0x188] sm:$0xff]  }
  0x10   :  { %1767 = vmatpush3.bf16.msra.mxu0 %v2395_v14  ;;  %v2189_v42 = vld [vmem:[%s3017_s0 + $0x44] ss:$28 sps:$4 sm:$0xff]   ;;  %v2570_v47 = vld [vmem:[%s3016_s4 + $0x110] sm:$0xff]   ;;  %v2576_v48 = vld [vmem:[%s3016_s4 + $0x158] sm:$0xff]  }
  0x11   :  { %1795 = vmatpush3.bf16.msra.mxu1 %v2401_v15  ;;  %1768 = vmatprep.subr.bf16.mxu0 %v2407_v16  ;;  %v2192_v44 = vld [vmem:[%s3017_s0 + $0x40] ss:$28 sps:$4 sm:$0xff]   ;;  %v2198_v50 = vld [vmem:[%s3017_s0 + $0x18] ss:$28 sps:$4 sm:$0xff]   ;;  %v2200_v52 = vld [vmem:[%s3017_s0 + $0x50] ss:$28 sps:$4 sm:$0xff]  }
  0x12   :  { %1796 = vmatprep.subr.bf16.mxu1 %v2413_v17  ;;  %v2583_v49 = vld [vmem:[%s3016_s4 + $0x118] sm:$0xff]   ;;  %v2593_v51 = vld [vmem:[%s3016_s4 + $0x160] sm:$0xff]   ;;  %v2609_v54 = vld [vmem:[%s3016_s4 + $0x168] sm:$0xff]  }
  0x13   :  { %v2603_v53 = vld [vmem:[%s3016_s4 + $0x120] sm:$0xff]   ;;  %v2618_v55 = vld [vmem:[%s3016_s4 + $0x128] sm:$0xff]   ;;  %v2624_v56 = vld [vmem:[%s3016_s4 + $0x170] sm:$0xff]  }
  0x14   :  { %1769 = vmatpush3.bf16.msra.mxu0 %v2419_v18  ;;  %v2210_v57 = vld [vmem:[%s3017_s0 + $0x14] ss:$28 sps:$4 sm:$0xff]   ;;  %v2641_v59 = vld [vmem:[%s3016_s4 + $0x178] sm:$0xff]   ;;  %v2216_v60 = vld [vmem:[%s3018_s1 + $0x4] ss:$28 sps:$4 sm:$0xff]  }
  0x15   :  { %1797 = vmatpush3.bf16.msra.mxu1 %v2425_v19  ;;  %1770 = vmatprep.subr.bf16.mxu0 %v2431_v20  ;;  %v2635_v58 = vld [vmem:[%s3016_s4 + $0x130] sm:$0xff]   ;;  %v2652_v61 = vld [vmem:[%s3016_s4 + $0x138] sm:$0xff]   ;;  %v2211_v63 = vld [vmem:[%s3017_s0 + $0x4c] ss:$28 sps:$4 sm:$0xff]  }
  0x16   :  { %1798 = vmatprep.subr.bf16.mxu1 %v2437_v21  ;;  %v2208_v62 = vld [vmem:[%s3017_s0 + $0x10] ss:$28 sps:$4 sm:$0xff]   ;;  %v2220_v35 = vld [vmem:[%s3018_s1 + $0x3c] ss:$28 sps:$4 sm:$0xff]  }
  0x17   :  { %v2219_v33 = vld [vmem:[%s3018_s1 + $0xc] ss:$28 sps:$4 sm:$0xff]  }
  0x18   :  { %1771 = vmatpush3.bf16.msra.mxu0 %v2443_v22 }
  0x19   :  { %1799 = vmatpush3.bf16.msra.mxu1 %v2449_v23  ;;  %1772 = vmatprep.subr.bf16.mxu0 %v2455_v24 }
  0x1a   :  { %1800 = vmatprep.subr.bf16.mxu1 %v2461_v25 }
  0x1c   :  { %1773 = vmatpush3.bf16.msra.mxu0 %v2467_v26 }
  0x1d   :  { %1801 = vmatpush3.bf16.msra.mxu1 %v2473_v27  ;;  %1774 = vmatprep.subr.bf16.mxu0 %v2479_v28 }
  0x1e   :  { %1802 = vmatprep.subr.bf16.mxu1 %v2485_v29 }
  0x20   :  { %1775 = vmatpush3.bf16.msra.mxu0 %v2491_v30 }
  0x21   :  { %1803 = vmatpush3.bf16.msra.mxu1 %v2497_v31  ;;  %1816 = vmatprep.subr.bf16.mxu0 %v2516_v36 }
  0x22   :  { %2112 = vmatprep.subr.bf16.mxu1 %v2521_v37 }
  0x23   :  { %557 = vmatmul.mubr.bf16.vlgmr.msra.gmra.mrb[0].mxu0 %v2176_v32  ;;  %v2213_v32 = vld [vmem:[%s3017_s0 + $0x48] ss:$28 sps:$4 sm:$0xff]  }
  0x24   :  { %606 = vmatmul.mubr.bf16.vlgmr.msra.gmra.mrb[0].mxu1 %v2179_v34  ;;  %1817 = vmatpush3.bf16.msra.mxu0 %v2527_v38  ;;  %v2214_v34 = vld [vmem:[%s3018_s1] ss:$28 sps:$4 sm:$0xff]  }
  0x25   :  { %2113 = vmatpush3.bf16.msra.mxu1 %v2521_v37  ;;  %1818 = vmatprep.subr.bf16.mxu0 %v2533_v39 }
  0x26   :  { %564 = vmatprep.mubr.bf16.mxu0 %v2187_v41  ;;  %613 = vmatprep.mubr.bf16.mxu1 %v2189_v42  ;;  %v2222_v41 = vld [vmem:[%s3018_s1 + $0x38] ss:$28 sps:$4 sm:$0xff]  }
  0x27   :  { %2114 = vmatprep.subr.bf16.mxu1 %v2564_v46  ;;  %v2228_v42 = vld [vmem:[%s3018_s1 + $0x14] ss:$28 sps:$4 sm:$0xff]  }
  0x28   :  { %1819 = vmatpush3.bf16.msra.mxu0 %v2540_v40 }
  0x29   :  { %1820 = vmatprep.subr.bf16.mxu0 %v2559_v45  ;;  %2115 = vmatpush3.bf16.msra.mxu1 %v2564_v46 }
  0x2a   :  { %1848 = vmatprep.subr.bf16.mxu1 %v2312_v0 }
  0x2b   :  { %565 = vmatmul.mubr.bf16.gmra.mrb[4].mxu0 %v2191_v43  ;;  %v2217_v43 = vld [vmem:[%s3018_s1 + $0x8] ss:$28 sps:$4 sm:$0xff]  }
  0x2c   :  { %614 = vmatmul.mubr.bf16.gmra.mrb[4].mxu1 %v2192_v44  ;;  %1821 = vmatpush3.bf16.msra.mxu0 %v2570_v47  ;;  %v2223_v44 = vld [vmem:[%s3018_s1 + $0x44] ss:$28 sps:$4 sm:$0xff]  }
  0x2d   :  { %1822 = vmatprep.subr.bf16.mxu0 %v2576_v48  ;;  %2116 = vmatprep.mubr.msk.bf16.mxu1 %vm517_vm0, %v2198_v50  ;;  %v2225_v50 = vld [vmem:[%s3018_s1 + $0x40] ss:$28 sps:$4 sm:$0xff]  }
  0x2e   :  { %654 = vmatprep.mubr.bf16.mxu0 %v2210_v57  ;;  %v2226_v57 = vld [vmem:[%s3018_s1 + $0x10] ss:$28 sps:$4 sm:$0xff]  }
  0x30   :  { %1823 = vmatpush3.bf16.msra.mxu0 %v2583_v49 }
  0x31   :  { %1824 = vmatprep.subr.bf16.mxu0 %v2593_v51 }
  0x34   :  { %2117 = vmatmul.mubr.msk.bf16.vlgmr.msra.gmra.mrb[8].mxu1 %vm517_vm0, %v2200_v52  ;;  %1825 = vmatpush3.bf16.msra.mxu0 %v2603_v53  ;;  %v2229_v52 = vld [vmem:[%s3018_s1 + $0x18] ss:$28 sps:$4 sm:$0xff]  }
  0x35   :  { %1849 = vmatpush3.bf16.msra.mxu1 %v2323_v2  ;;  %1826 = vmatprep.subr.bf16.mxu0 %v2609_v54 }
  0x36   :  { %1850 = vmatprep.subr.bf16.mxu1 %v2335_v4  ;;  %848 = vmatprep.mubr.bf16.mxu1 %v2216_v60  ;;  %v2230_v60 = vld [vmem:[%s3018_s1 + $0x50] ss:$28 sps:$4 sm:$0xff]  }
  0x38   :  { %1827 = vmatpush3.bf16.msra.mxu0 %v2618_v55 }
  0x39   :  { %1851 = vmatpush3.bf16.msra.mxu1 %v2347_v6  ;;  %1828 = vmatprep.subr.bf16.mxu0 %v2624_v56 }
  0x3a   :  { %1852 = vmatprep.subr.bf16.mxu1 %v2359_v8 }
  0x3c   :  { %1829 = vmatpush3.bf16.msra.mxu0 %v2635_v58 }
  0x3d   :  { %1853 = vmatpush3.bf16.msra.mxu1 %v2371_v10  ;;  %1830 = vmatprep.subr.bf16.mxu0 %v2641_v59 }
  0x3e   :  { %1854 = vmatprep.subr.bf16.mxu1 %v2383_v12 }
  0x40   :  { %1831 = vmatpush3.bf16.msra.mxu0 %v2652_v61 }
  0x41   :  { %1855 = vmatpush3.bf16.msra.mxu1 %v2395_v14  ;;  %1876 = vmatprep.subr.bf16.mxu0 %v2317_v1 }
  0x42   :  { %1856 = vmatprep.subr.bf16.mxu1 %v2407_v16 }
  0x43   :  { %655 = vmatmul.mubr.bf16.vlgmr.msra.gmra.mrb[8].mxu0 %v2208_v62  ;;  %v2231_v62 = vld [vmem:[%s3018_s1 + $0x4c] ss:$28 sps:$4 sm:$0xff]  }
  0x44   :  { %1877 = vmatpush3.bf16.msra.mxu0 %v2329_v3  ;;  %662 = vmatprep.mubr.bf16.mxu0 %v2211_v63  ;;  %v2236_v63 = vld [vmem:[%s3019_s2 + $0x4] ss:$28 sps:$4 sm:$0xff]  }
  0x45   :  { %1857 = vmatpush3.bf16.msra.mxu1 %v2419_v18  ;;  %1878 = vmatprep.subr.bf16.mxu0 %v2341_v5 }
  0x46   :  { %1858 = vmatprep.subr.bf16.mxu1 %v2431_v20 }
  0x48   :  { %1879 = vmatpush3.bf16.msra.mxu0 %v2353_v7 }
  0x49   :  { %1859 = vmatpush3.bf16.msra.mxu1 %v2443_v22  ;;  %1880 = vmatprep.subr.bf16.mxu0 %v2365_v9 }
  0x4a   :  { %1860 = vmatprep.subr.bf16.mxu1 %v2455_v24 }
  0x4b   :  { %663 = vmatmul.mubr.bf16.gmra.mrb[12].mxu0 %v2213_v32  ;;  %v2233_v32 = vld [vmem:[%s3018_s1 + $0x48] ss:$28 sps:$4 sm:$0xff]  }
  0x4c   :  { %1881 = vmatpush3.bf16.msra.mxu0 %v2377_v11  ;;  %897 = vmatprep.mubr.bf16.mxu0 %v2219_v33  ;;  %v2239_v33 = vld [vmem:[%s3019_s2 + $0xc] ss:$28 sps:$4 sm:$0xff]  }
  0x4d   :  { %1861 = vmatpush3.bf16.msra.mxu1 %v2467_v26  ;;  %1882 = vmatprep.subr.bf16.mxu0 %v2389_v13 }
  0x4e   :  { %1862 = vmatprep.subr.bf16.mxu1 %v2479_v28 }
  0x50   :  { %1883 = vmatpush3.bf16.msra.mxu0 %v2401_v15 }
  0x51   :  { %1863 = vmatpush3.bf16.msra.mxu1 %v2491_v30  ;;  %1884 = vmatprep.subr.bf16.mxu0 %v2413_v17 }
  0x52   :  { %1904 = vmatprep.subr.bf16.mxu1 %v2516_v36 }
  0x54   :  { %849 = vmatmul.mubr.bf16.vlgmr.msra.gmra.mrb[12].mxu1 %v2214_v34  ;;  %1885 = vmatpush3.bf16.msra.mxu0 %v2425_v19  ;;  %v2237_v34 = vld [vmem:[%s3019_s2 + $0x8] ss:$28 sps:$4 sm:$0xff]  }
  0x55   :  { %1905 = vmatpush3.bf16.msra.mxu1 %v2527_v38  ;;  %856 = vmatprep.mubr.bf16.mxu1 %v2220_v35  ;;  %v2234_v35 = vld [vmem:[%s3019_s2] ss:$28 sps:$4 sm:$0xff]  }
  0x56   :  { %1906 = vmatprep.subr.bf16.mxu1 %v2533_v39  ;;  %1886 = vmatprep.subr.bf16.mxu0 %v2437_v21 }
  0x58   :  { %1887 = vmatpush3.bf16.msra.mxu0 %v2449_v23 }
  0x59   :  { %1907 = vmatpush3.bf16.msra.mxu1 %v2540_v40  ;;  %1888 = vmatprep.subr.bf16.mxu0 %v2461_v25 }
  0x5a   :  { %1908 = vmatprep.subr.bf16.mxu1 %v2559_v45 }
  0x5c   :  { %857 = vmatmul.mubr.bf16.gmra.mrb[16].mxu1 %v2222_v41  ;;  %1889 = vmatpush3.bf16.msra.mxu0 %v2473_v27  ;;  %v2240_v41 = vld [vmem:[%s3019_s2 + $0x3c] ss:$28 sps:$4 sm:$0xff]  }
  0x5d   :  { %1909 = vmatpush3.bf16.msra.mxu1 %v2570_v47  ;;  %946 = vmatprep.mubr.bf16.mxu1 %v2228_v42  ;;  %v2242_v42 = vld [vmem:[%s3019_s2 + $0x44] ss:$28 sps:$4 sm:$0xff]  }
  0x5e   :  { %1910 = vmatprep.subr.bf16.mxu1 %v2576_v48  ;;  %1890 = vmatprep.subr.bf16.mxu0 %v2485_v29 }
  0x60   :  { %1891 = vmatpush3.bf16.msra.mxu0 %v2497_v31 }
  0x61   :  { %1911 = vmatpush3.bf16.msra.mxu1 %v2583_v49  ;;  %2120 = vmatprep.subr.bf16.mxu0 %v2521_v37 }
  0x62   :  { %1912 = vmatprep.subr.bf16.mxu1 %v2593_v51 }
  0x63   :  { %898 = vmatmul.mubr.bf16.vlgmr.msra.gmra.mrb[16].mxu0 %v2217_v43  ;;  %v2245_v43 = vld [vmem:[%s3019_s2 + $0x40] ss:$28 sps:$4 sm:$0xff]  }
  0x64   :  { %905 = vmatprep.mubr.bf16.mxu0 %v2223_v44  ;;  %2121 = vmatpush3.bf16.msra.mxu0 %v2521_v37  ;;  %v2244_v44 = vld [vmem:[%s3019_s2 + $0x38] ss:$28 sps:$4 sm:$0xff]  }
  0x65   :  { %1913 = vmatpush3.bf16.msra.mxu1 %v2603_v53  ;;  %2122 = vmatprep.subr.bf16.mxu0 %v2564_v46 }
  0x66   :  { %1914 = vmatprep.subr.bf16.mxu1 %v2609_v54 }
  0x68   :  { %2123 = vmatpush3.bf16.msra.mxu0 %v2564_v46 }
  0x69   :  { %1915 = vmatpush3.bf16.msra.mxu1 %v2618_v55  ;;  %1936 = vmatprep.subr.bf16.mxu0 %v2312_v0 }
  0x6a   :  { %1916 = vmatprep.subr.bf16.mxu1 %v2624_v56 }
  0x6b   :  { %906 = vmatmul.mubr.bf16.gmra.mrb[20].mxu0 %v2225_v50  ;;  %v2246_v50 = vld [vmem:[%s3019_s2 + $0x18] ss:$28 sps:$4 sm:$0xff]  }
  0x6c   :  { %2124 = vmatprep.mubr.msk.bf16.mxu0 %vm517_vm0, %v2229_v52  ;;  %v2250_v52 = vld [vmem:[%s3019_s2 + $0x14] ss:$28 sps:$4 sm:$0xff]  }
  0x6d   :  { %1917 = vmatpush3.bf16.msra.mxu1 %v2635_v58 }
  0x6e   :  { %1918 = vmatprep.subr.bf16.mxu1 %v2641_v59 }
  0x71   :  { %1919 = vmatpush3.bf16.msra.mxu1 %v2652_v61 }
  0x72   :  { %1964 = vmatprep.subr.bf16.mxu1 %v2317_v1 }
  0x73   :  { %2125 = vmatmul.mubr.msk.bf16.vlgmr.msra.gmra.mrb[24].mxu0 %vm517_vm0, %v2230_v60 }
  0x74   :  { %947 = vmatmul.mubr.bf16.vlgmr.msra.gmra.mrb[20].mxu1 %v2226_v57  ;;  %1937 = vmatpush3.bf16.msra.mxu0 %v2323_v2  ;;  %v2247_v57 = vld [vmem:[%s3019_s2 + $0x50] ss:$28 sps:$4 sm:$0xff]  }
  0x75   :  { %1965 = vmatpush3.bf16.msra.mxu1 %v2329_v3  ;;  %1938 = vmatprep.subr.bf16.mxu0 %v2335_v4 }
  0x76   :  { %1966 = vmatprep.subr.bf16.mxu1 %v2341_v5  ;;  %954 = vmatprep.mubr.bf16.mxu1 %v2231_v62 }
  0x77   :  { %1144 = vmatprep.mubr.bf16.mxu0 %v2236_v63 }
  0x78   :  { %1939 = vmatpush3.bf16.msra.mxu0 %v2347_v6 }
  0x79   :  { %1967 = vmatpush3.bf16.msra.mxu1 %v2353_v7  ;;  %1940 = vmatprep.subr.bf16.mxu0 %v2359_v8 }
  0x7a   :  { %1968 = vmatprep.subr.bf16.mxu1 %v2365_v9 }
  0x7c   :  { %955 = vmatmul.mubr.bf16.gmra.mrb[24].mxu1 %v2233_v32  ;;  %1941 = vmatpush3.bf16.msra.mxu0 %v2371_v10 }
  0x7d   :  { %1969 = vmatpush3.bf16.msra.mxu1 %v2377_v11  ;;  %1193 = vmatprep.mubr.bf16.mxu1 %v2239_v33 }
  0x7e   :  { %1970 = vmatprep.subr.bf16.mxu1 %v2389_v13  ;;  %1942 = vmatprep.subr.bf16.mxu0 %v2383_v12 }
  0x80   :  { %1943 = vmatpush3.bf16.msra.mxu0 %v2395_v14 }
  0x81   :  { %1971 = vmatpush3.bf16.msra.mxu1 %v2401_v15  ;;  %1944 = vmatprep.subr.bf16.mxu0 %v2407_v16 }
  0x82   :  { %1972 = vmatprep.subr.bf16.mxu1 %v2413_v17 }
  0x84   :  { %1945 = vmatpush3.bf16.msra.mxu0 %v2419_v18 }
  0x85   :  { %1973 = vmatpush3.bf16.msra.mxu1 %v2425_v19  ;;  %1946 = vmatprep.subr.bf16.mxu0 %v2431_v20 }
  0x86   :  { %1974 = vmatprep.subr.bf16.mxu1 %v2437_v21 }
  0x88   :  { %1947 = vmatpush3.bf16.msra.mxu0 %v2443_v22 }
  0x89   :  { %1975 = vmatpush3.bf16.msra.mxu1 %v2449_v23  ;;  %1948 = vmatprep.subr.bf16.mxu0 %v2455_v24 }
  0x8a   :  { %1976 = vmatprep.subr.bf16.mxu1 %v2461_v25 }
  0x8c   :  { %1949 = vmatpush3.bf16.msra.mxu0 %v2467_v26 }
  0x8d   :  { %1977 = vmatpush3.bf16.msra.mxu1 %v2473_v27  ;;  %1950 = vmatprep.subr.bf16.mxu0 %v2479_v28 }
  0x8e   :  { %1978 = vmatprep.subr.bf16.mxu1 %v2485_v29 }
  0x90   :  { %1951 = vmatpush3.bf16.msra.mxu0 %v2491_v30 }
  0x91   :  { %1979 = vmatpush3.bf16.msra.mxu1 %v2497_v31  ;;  %1992 = vmatprep.subr.bf16.mxu0 %v2516_v36 }
  0x92   :  { %2128 = vmatprep.subr.bf16.mxu1 %v2521_v37 }
  0x93   :  { %1145 = vmatmul.mubr.bf16.vlgmr.msra.gmra.mrb[28].mxu0 %v2234_v35 }
  0x94   :  { %1194 = vmatmul.mubr.bf16.vlgmr.msra.gmra.mrb[28].mxu1 %v2237_v34  ;;  %1993 = vmatpush3.bf16.msra.mxu0 %v2527_v38 }
  0x95   :  { %2129 = vmatpush3.bf16.msra.mxu1 %v2521_v37  ;;  %1152 = vmatprep.mubr.bf16.mxu0 %v2240_v41 }
  0x96   :  { %1994 = vmatprep.subr.bf16.mxu0 %v2533_v39  ;;  %1201 = vmatprep.mubr.bf16.mxu1 %v2242_v42 }
  0x97   :  { %2130 = vmatprep.subr.bf16.mxu1 %v2564_v46 }
  0x98   :  { %1995 = vmatpush3.bf16.msra.mxu0 %v2540_v40 }
  0x99   :  { %2131 = vmatpush3.bf16.msra.mxu1 %v2564_v46  ;;  %1996 = vmatprep.subr.bf16.mxu0 %v2559_v45 }
  0x9a   :  { %2024 = vmatprep.subr.bf16.mxu1 %v2312_v0  ;;  %v2256_v0 = vld [vmem:[%s3020_s3 + $0x4] ss:$28 sps:$4 sm:$0xff]  }
  0x9b   :  { %1153 = vmatmul.mubr.bf16.gmra.mrb[32].mxu0 %v2244_v44 }
  0x9c   :  { %1202 = vmatmul.mubr.bf16.gmra.mrb[32].mxu1 %v2245_v43  ;;  %1997 = vmatpush3.bf16.msra.mxu0 %v2570_v47 }
  0x9d   :  { %2132 = vmatprep.mubr.msk.bf16.mxu1 %vm517_vm0, %v2246_v50  ;;  %1242 = vmatprep.mubr.bf16.mxu0 %v2250_v52 }
  0x9e   :  { %1998 = vmatprep.subr.bf16.mxu0 %v2576_v48 }
  0xa0   :  { %1999 = vmatpush3.bf16.msra.mxu0 %v2583_v49 }
  0xa1   :  { %2000 = vmatprep.subr.bf16.mxu0 %v2593_v51 }
  0xa4   :  { %2133 = vmatmul.mubr.msk.bf16.vlgmr.msra.gmra.mrb[36].mxu1 %vm517_vm0, %v2247_v57  ;;  %2001 = vmatpush3.bf16.msra.mxu0 %v2603_v53 }
  0xa5   :  { %2025 = vmatpush3.bf16.msra.mxu1 %v2323_v2  ;;  %1436 = vmatprep.mubr.bf16.mxu1 %v2256_v0  ;;  %v2248_v2 = vld [vmem:[%s3019_s2 + $0x10] ss:$28 sps:$4 sm:$0xff]  }
  0xa6   :  { %2026 = vmatprep.subr.bf16.mxu1 %v2335_v4  ;;  %2002 = vmatprep.subr.bf16.mxu0 %v2609_v54  ;;  %v2251_v4 = vld [vmem:[%s3019_s2 + $0x4c] ss:$28 sps:$4 sm:$0xff]  }
  0xa8   :  { %2003 = vmatpush3.bf16.msra.mxu0 %v2618_v55 }
  0xa9   :  { %2027 = vmatpush3.bf16.msra.mxu1 %v2347_v6  ;;  %2004 = vmatprep.subr.bf16.mxu0 %v2624_v56  ;;  %v2260_v6 = vld [vmem:[%s3020_s3 + $0x3c] ss:$28 sps:$4 sm:$0xff]  }
  0xaa   :  { %2028 = vmatprep.subr.bf16.mxu1 %v2359_v8  ;;  %v2268_v8 = vld [vmem:[%s3020_s3 + $0x14] ss:$28 sps:$4 sm:$0xff]  }
  0xac   :  { %2005 = vmatpush3.bf16.msra.mxu0 %v2635_v58 }
  0xad   :  { %2029 = vmatpush3.bf16.msra.mxu1 %v2371_v10  ;;  %2006 = vmatprep.subr.bf16.mxu0 %v2641_v59  ;;  %v2263_v10 = vld [vmem:[%s3020_s3 + $0x44] ss:$28 sps:$4 sm:$0xff]  }
  0xae   :  { %2030 = vmatprep.subr.bf16.mxu1 %v2383_v12  ;;  %v2269_v12 = vld [vmem:[%s3020_s3 + $0x18] ss:$28 sps:$4 sm:$0xff]  }
  0xb0   :  { %2007 = vmatpush3.bf16.msra.mxu0 %v2652_v61 }
  0xb1   :  { %2031 = vmatpush3.bf16.msra.mxu1 %v2395_v14  ;;  %2052 = vmatprep.subr.bf16.mxu0 %v2317_v1  ;;  %v2253_v1 = vld [vmem:[%s3019_s2 + $0x48] ss:$28 sps:$4 sm:$0xff]   ;;  %v2270_v14 = vld [vmem:[%s3020_s3 + $0x50] ss:$28 sps:$4 sm:$0xff]  }
  0xb2   :  { %2032 = vmatprep.subr.bf16.mxu1 %v2407_v16  ;;  %v2273_v16 = vld [vmem:[%s3020_s3 + $0x48] ss:$28 sps:$4 sm:$0xff]  }
  0xb3   :  { %1243 = vmatmul.mubr.bf16.vlgmr.msra.gmra.mrb[36].mxu0 %v2248_v2 }
  0xb4   :  { %2053 = vmatpush3.bf16.msra.mxu0 %v2329_v3  ;;  %1250 = vmatprep.mubr.bf16.mxu0 %v2251_v4  ;;  %v2259_v3 = vld [vmem:[%s3020_s3 + $0xc] ss:$28 sps:$4 sm:$0xff]  }
  0xb5   :  { %2033 = vmatpush3.bf16.msra.mxu1 %v2419_v18  ;;  %2054 = vmatprep.subr.bf16.mxu0 %v2341_v5  ;;  %v2254_v5 = vld [vmem:[%s3020_s3] ss:$28 sps:$4 sm:$0xff]  }
  0xb6   :  { %2034 = vmatprep.subr.bf16.mxu1 %v2431_v20 }
  0xb8   :  { %2055 = vmatpush3.bf16.msra.mxu0 %v2353_v7  ;;  %v2262_v7 = vld [vmem:[%s3020_s3 + $0x38] ss:$28 sps:$4 sm:$0xff]  }
  0xb9   :  { %2035 = vmatpush3.bf16.msra.mxu1 %v2443_v22  ;;  %2056 = vmatprep.subr.bf16.mxu0 %v2365_v9  ;;  %v2257_v9 = vld [vmem:[%s3020_s3 + $0x8] ss:$28 sps:$4 sm:$0xff]  }
  0xba   :  { %2036 = vmatprep.subr.bf16.mxu1 %v2455_v24 }
  0xbb   :  { %1251 = vmatmul.mubr.bf16.gmra.mrb[40].mxu0 %v2253_v1 }
  0xbc   :  { %2057 = vmatpush3.bf16.msra.mxu0 %v2377_v11  ;;  %1485 = vmatprep.mubr.bf16.mxu0 %v2259_v3  ;;  %v2265_v11 = vld [vmem:[%s3020_s3 + $0x40] ss:$28 sps:$4 sm:$0xff]  }
  0xbd   :  { %2037 = vmatpush3.bf16.msra.mxu1 %v2467_v26  ;;  %2058 = vmatprep.subr.bf16.mxu0 %v2389_v13  ;;  %v2266_v13 = vld [vmem:[%s3020_s3 + $0x10] ss:$28 sps:$4 sm:$0xff]  }
  0xbe   :  { %2038 = vmatprep.subr.bf16.mxu1 %v2479_v28 }
  0xc0   :  { %2059 = vmatpush3.bf16.msra.mxu0 %v2401_v15  ;;  %v2271_v15 = vld [vmem:[%s3020_s3 + $0x4c] ss:$28 sps:$4 sm:$0xff]  }
  0xc1   :  { %2039 = vmatpush3.bf16.msra.mxu1 %v2491_v30  ;;  %2060 = vmatprep.subr.bf16.mxu0 %v2413_v17 }
  0xc2   :  { %2080 = vmatprep.subr.bf16.mxu1 %v2516_v36 }
  0xc4   :  { %1437 = vmatmul.mubr.bf16.vlgmr.msra.gmra.mrb[40].mxu1 %v2254_v5  ;;  %2061 = vmatpush3.bf16.msra.mxu0 %v2425_v19  ;;  %v2946_v19 = vld [vmem:[%s3021_s5] ss:$0 sm:$0xff] }
  0xc5   :  { %2081 = vmatpush3.bf16.msra.mxu1 %v2527_v38  ;;  %1444 = vmatprep.mubr.bf16.mxu1 %v2260_v6 }
  0xc6   :  { %2082 = vmatprep.subr.bf16.mxu1 %v2533_v39  ;;  %2062 = vmatprep.subr.bf16.mxu0 %v2437_v21 }
  0xc8   :  { %2063 = vmatpush3.bf16.msra.mxu0 %v2449_v23 }
  0xc9   :  { %2083 = vmatpush3.bf16.msra.mxu1 %v2540_v40  ;;  %2064 = vmatprep.subr.bf16.mxu0 %v2461_v25 }
  0xca   :  { %2084 = vmatprep.subr.bf16.mxu1 %v2559_v45 }
  0xcc   :  { %1445 = vmatmul.mubr.bf16.gmra.mrb[44].mxu1 %v2262_v7  ;;  %2065 = vmatpush3.bf16.msra.mxu0 %v2473_v27 }
  0xcd   :  { %2085 = vmatpush3.bf16.msra.mxu1 %v2570_v47  ;;  %1534 = vmatprep.mubr.bf16.mxu1 %v2268_v8 }
  0xce   :  { %2086 = vmatprep.subr.bf16.mxu1 %v2576_v48  ;;  %2066 = vmatprep.subr.bf16.mxu0 %v2485_v29 }
  0xd0   :  { %2067 = vmatpush3.bf16.msra.mxu0 %v2497_v31 }
  0xd1   :  { %2087 = vmatpush3.bf16.msra.mxu1 %v2583_v49  ;;  %2136 = vmatprep.subr.bf16.mxu0 %v2521_v37 }
  0xd2   :  { %2088 = vmatprep.subr.bf16.mxu1 %v2593_v51 }
  0xd3   :  { %1486 = vmatmul.mubr.bf16.vlgmr.msra.gmra.mrb[44].mxu0 %v2257_v9 }
  0xd4   :  { %1493 = vmatprep.mubr.bf16.mxu0 %v2263_v10  ;;  %2137 = vmatpush3.bf16.msra.mxu0 %v2521_v37 }
  0xd5   :  { %2089 = vmatpush3.bf16.msra.mxu1 %v2603_v53  ;;  %2138 = vmatprep.subr.bf16.mxu0 %v2564_v46 }
  0xd6   :  { %2090 = vmatprep.subr.bf16.mxu1 %v2609_v54 }
  0xd8   :  { %2139 = vmatpush3.bf16.msra.mxu0 %v2564_v46 }
  0xd9   :  { %2091 = vmatpush3.bf16.msra.mxu1 %v2618_v55 }
  0xda   :  { %2092 = vmatprep.subr.bf16.mxu1 %v2624_v56 }
  0xdb   :  { %1494 = vmatmul.mubr.bf16.gmra.mrb[48].mxu0 %v2265_v11 }
  0xdc   :  { %2140 = vmatprep.mubr.msk.bf16.mxu0 %vm517_vm0, %v2269_v12 }
  0xdd   :  { %2093 = vmatpush3.bf16.msra.mxu1 %v2635_v58 }
  0xde   :  { %2094 = vmatprep.subr.bf16.mxu1 %v2641_v59 }
  0xe1   :  { %2095 = vmatpush3.bf16.msra.mxu1 %v2652_v61 }
  0xe3   :  { %2141 = vmatmul.mubr.msk.bf16.vlgmr.msra.gmra.mrb[52].mxu0 %vm517_vm0, %v2270_v14 }
  0xe4   :  { %1535 = vmatmul.mubr.bf16.vlgmr.msra.gmra.mrb[48].mxu1 %v2266_v13 }
  0xe5   :  { %1542 = vmatprep.mubr.bf16.mxu1 %v2271_v15 }
  0xec   :  { %1543 = vmatmul.mubr.bf16.gmra.mrb[52].mxu1 %v2273_v16 }
  0xf6   :  { %v1776_v17 = vpop.f32.mrb[0].mxu0 }
  0xf7   :  { %v1804_v18 = vpop.f32.mrb[0].mxu1  ;;  %v1777_v20 = vpop.f32.mrb[1].mxu0 }
  0xf8   :  { %v1778_v21 = vadd.f32 %v1777_v20, %v1776_v17  ;;  %v1805_v22 = vpop.f32.mrb[1].mxu1  ;;  %v1779_v23 = vpop.f32.mrb[2].mxu0 }
  0xf9   :  { %v1806_v24 = vadd.f32 %v1805_v22, %v1804_v18  ;;  %v1807_v25 = vpop.f32.mrb[2].mxu1  ;;  %v1780_v26 = vpop.f32.mrb[3].mxu0 }
  0xfa   :  { %v559_v27 = vadd.f32 %v1778_v21, %v2946_v19  ;;  %v1781_v28 = vadd.f32 %v1780_v26, %v1779_v23  ;;  %v1808_v29 = vpop.f32.mrb[3].mxu1 }
  0xfb   :  { %v1809_v30 = vadd.f32 %v1808_v29, %v1807_v25 }
  0xfc   :  { %v608_v31 = vadd.f32 %v1806_v24, %v559_v27  ;;  %v562_v36 = vadd.f32 %v1781_v28, %v2946_v19 }
  0xfe   :  { %v611_v37 = vadd.f32 %v1809_v30, %v562_v36  ;;  %v1782_v38 = vpop.f32.mrb[4].mxu0 }
  0xff   :  { %v1810_v39 = vpop.f32.mrb[4].mxu1  ;;  %v1783_v40 = vpop.f32.mrb[5].mxu0 }
 0x100   :  { %v1784_v45 = vadd.f32 %v1783_v40, %v1782_v38  ;;  %v1811_v46 = vpop.f32.mrb[5].mxu1  ;;  %v1785_v47 = vpop.f32.mrb[6].mxu0 }
 0x101   :  { %v1812_v48 = vadd.f32 %v1811_v46, %v1810_v39  ;;  %v1813_v49 = vpop.f32.mrb[6].mxu1  ;;  %v1786_v51 = vpop.f32.mrb[7].mxu0 }
 0x102   :  { %v567_v53 = vadd.f32 %v1784_v45, %v2946_v19  ;;  %v1787_v54 = vadd.f32 %v1786_v51, %v1785_v47  ;;  %v1814_v55 = vpop.f32.mrb[7].mxu1 }
 0x103   :  { %v1815_v56 = vadd.f32 %v1814_v55, %v1813_v49 }
 0x104   :  { %v616_v58 = vadd.f32 %v1812_v48, %v567_v53  ;;  %v570_v59 = vadd.f32 %v1787_v54, %v2946_v19 }
 0x106   :  { %v619_v61 = vadd.f32 %v1815_v56, %v570_v59 }
 0x107   :  { %v2118_v60 = vpop.f32.mrb[8].mxu1 }
 0x108   :  { %v705_v62 = vpop.f32.mrb[9].mxu1 }
 0x109   :  { %v2119_v63 = vpop.f32.mrb[10].mxu1 }
 0x10a   :  { %v708_v32 = vpop.f32.mrb[11].mxu1 }
 0x116   :  { %v1832_v33 = vpop.f32.mrb[8].mxu0 }
 0x117   :  { %v1833_v34 = vpop.f32.mrb[9].mxu0 }
 0x118   :  { %v1834_v35 = vadd.f32 %v1833_v34, %v1832_v33  ;;  %v1835_v41 = vpop.f32.mrb[10].mxu0 }
 0x119   :  { %v1836_v42 = vpop.f32.mrb[11].mxu0 }
 0x11a   :  { %v657_v43 = vadd.f32 %v1834_v35, %v608_v31  ;;  %v1837_v44 = vadd.f32 %v1836_v42, %v1835_v41 }
 0x11c   :  { %v2952_v50 = vadd.f32 %v705_v62, %v657_v43  ;;  %v660_v52 = vadd.f32 %v1837_v44, %v611_v37 }
 0x11e   :  { %v2954_v57 = vadd.f32 %v708_v32, %v660_v52  ;;  %v1838_v0 = vpop.f32.mrb[12].mxu0  ;;  %v720_v35 = vmax.f32 %v2952_v50, 0.0 }
 0x11f   :  { %v1839_v2 = vpop.f32.mrb[13].mxu0 }
 0x120   :  { %v1840_v4 = vadd.f32 %v1839_v2, %v1838_v0  ;;  %v1841_v1 = vpop.f32.mrb[14].mxu0  ;;  %v721_v0 = vmax.f32 %v2954_v57, 0.0 }
 0x121   :  { %v1842_v3 = vpop.f32.mrb[15].mxu0 }
 0x122   :  { %v665_v5 = vadd.f32 %v1840_v4, %v616_v58  ;;  %v1843_v6 = vadd.f32 %v1842_v3, %v1841_v1 }
 0x124   :  { %v2956_v7 = vadd.f32 %v2118_v60, %v665_v5  ;;  %v668_v8 = vadd.f32 %v1843_v6, %v619_v61 }
 0x126   :  { %v2958_v10 = vadd.f32 %v2119_v63, %v668_v8  ;;  %v722_v50 = vmax.f32 %v2956_v7, 0.0 }
 0x127   :  { %v1864_v9 = vpop.f32.mrb[12].mxu1 }
 0x128   :  { %v1865_v11 = vpop.f32.mrb[13].mxu1 }
 0x129   :  { %v1866_v12 = vadd.f32 %v1865_v11, %v1864_v9  ;;  %v1867_v13 = vpop.f32.mrb[14].mxu1 }
 0x12a   :  { %v1868_v14 = vpop.f32.mrb[15].mxu1 }
 0x12b   :  { %v1869_v15 = vadd.f32 %v1868_v14, %v1867_v13  ;;  %v851_v25 = vadd.f32 %v1866_v12, %v2946_v19  ;;  %v723_v14 = vmax.f32 %v2958_v10, 0.0 }
 0x12d   :  { %v854_v29 = vadd.f32 %v1869_v15, %v2946_v19 }
 0x12f   :  { %v1870_v16 = vpop.f32.mrb[16].mxu1 }
 0x130   :  { %v1871_v17 = vpop.f32.mrb[17].mxu1 }
 0x131   :  { %v1872_v18 = vadd.f32 %v1871_v17, %v1870_v16  ;;  %v1873_v20 = vpop.f32.mrb[18].mxu1 }
 0x132   :  { %v1874_v21 = vpop.f32.mrb[19].mxu1 }
 0x133   :  { %v1875_v22 = vadd.f32 %v1874_v21, %v1873_v20  ;;  %v859_v37 = vadd.f32 %v1872_v18, %v2946_v19 }
 0x135   :  { %v862_v40 = vadd.f32 %v1875_v22, %v2946_v19 }
 0x136   :  { %v1892_v23 = vpop.f32.mrb[16].mxu0 }
 0x137   :  { %v1893_v24 = vpop.f32.mrb[17].mxu0 }
 0x138   :  { %v1894_v26 = vadd.f32 %v1893_v24, %v1892_v23  ;;  %v1895_v27 = vpop.f32.mrb[18].mxu0 }
 0x139   :  { %v1896_v28 = vpop.f32.mrb[19].mxu0 }
 0x13a   :  { %v900_v30 = vadd.f32 %v1894_v26, %v851_v25  ;;  %v1897_v31 = vadd.f32 %v1896_v28, %v1895_v27 }
 0x13c   :  { %v903_v36 = vadd.f32 %v1897_v31, %v854_v29 }
 0x13e   :  { %v1898_v38 = vpop.f32.mrb[20].mxu0 }
 0x13f   :  { %v1899_v39 = vpop.f32.mrb[21].mxu0 }
 0x140   :  { %v1900_v45 = vadd.f32 %v1899_v39, %v1898_v38  ;;  %v1901_v46 = vpop.f32.mrb[22].mxu0 }
 0x141   :  { %v1902_v47 = vpop.f32.mrb[23].mxu0 }
 0x142   :  { %v908_v48 = vadd.f32 %v1900_v45, %v859_v37  ;;  %v1903_v49 = vadd.f32 %v1902_v47, %v1901_v46 }
 0x144   :  { %v911_v51 = vadd.f32 %v1903_v49, %v862_v40 }
 0x146   :  { %v2126_v55 = vpop.f32.mrb[24].mxu0 }
 0x147   :  { %v1920_v53 = vpop.f32.mrb[20].mxu1  ;;  %v997_v59 = vpop.f32.mrb[25].mxu0 }
 0x148   :  { %v1921_v54 = vpop.f32.mrb[21].mxu1  ;;  %v2127_v60 = vpop.f32.mrb[26].mxu0 }
 0x149   :  { %v1922_v56 = vadd.f32 %v1921_v54, %v1920_v53  ;;  %v1923_v58 = vpop.f32.mrb[22].mxu1  ;;  %v1000_v32 = vpop.f32.mrb[27].mxu0 }
 0x14a   :  { %v1924_v61 = vpop.f32.mrb[23].mxu1 }
 0x14b   :  { %v1925_v62 = vadd.f32 %v1924_v61, %v1923_v58  ;;  %v949_v63 = vadd.f32 %v1922_v56, %v900_v30 }
 0x14d   :  { %v998_v33 = vadd.f32 %v997_v59, %v949_v63  ;;  %v952_v34 = vadd.f32 %v1925_v62, %v903_v36 }
 0x14f   :  { %v1012_v41 = vmax.f32 %v998_v33, 0.0  ;;  %v1001_v42 = vadd.f32 %v1000_v32, %v952_v34  ;;  %v1926_v43 = vpop.f32.mrb[24].mxu1 }
 0x150   :  { %v1927_v44 = vpop.f32.mrb[25].mxu1 }
 0x151   :  { %v2965_v52 = vmax.f32 %v720_v35, %v1012_v41  ;;  %v1013_v2 = vmax.f32 %v1001_v42, 0.0  ;;  %v1928_v4 = vadd.f32 %v1927_v44, %v1926_v43  ;;  %v1929_v1 = vpop.f32.mrb[26].mxu1 }
 0x152   :  { %v1930_v3 = vpop.f32.mrb[27].mxu1 }
 0x153   :  { %v2968_v5 = vmax.f32 %v721_v0, %v1013_v2  ;;  %v957_v6 = vadd.f32 %v1928_v4, %v908_v48  ;;  %v1931_v8 = vadd.f32 %v1930_v3, %v1929_v1 }
 0x155   :  { %v1006_v9 = vadd.f32 %v2126_v55, %v957_v6  ;;  %v960_v11 = vadd.f32 %v1931_v8, %v911_v51 }
 0x157   :  { %v1014_v12 = vmax.f32 %v1006_v9, 0.0  ;;  %v1009_v13 = vadd.f32 %v2127_v60, %v960_v11 }
 0x159   :  { %v2972_v15 = vmax.f32 %v722_v50, %v1014_v12  ;;  %v1015_v16 = vmax.f32 %v1009_v13, 0.0 }
 0x15b   :  { %v2974_v57 = vmax.f32 %v723_v14, %v1015_v16 }
 0x166   :  { %v1952_v18 = vpop.f32.mrb[28].mxu0 }
 0x167   :  { %v1980_v17 = vpop.f32.mrb[28].mxu1  ;;  %v1953_v21 = vpop.f32.mrb[29].mxu0 }
 0x168   :  { %v1981_v20 = vpop.f32.mrb[29].mxu1  ;;  %v1954_v24 = vadd.f32 %v1953_v21, %v1952_v18  ;;  %v1955_v25 = vpop.f32.mrb[30].mxu0 }
 0x169   :  { %v1982_v22 = vadd.f32 %v1981_v20, %v1980_v17  ;;  %v1983_v23 = vpop.f32.mrb[30].mxu1  ;;  %v1956_v27 = vpop.f32.mrb[31].mxu0 }
 0x16a   :  { %v1984_v26 = vpop.f32.mrb[31].mxu1  ;;  %v1147_v28 = vadd.f32 %v1954_v24, %v2946_v19  ;;  %v1957_v29 = vadd.f32 %v1956_v27, %v1955_v25 }
 0x16b   :  { %v1985_v7 = vadd.f32 %v1984_v26, %v1983_v23 }
 0x16c   :  { %v1196_v10 = vadd.f32 %v1982_v22, %v1147_v28  ;;  %v1150_v30 = vadd.f32 %v1957_v29, %v2946_v19 }
 0x16e   :  { %v1199_v36 = vadd.f32 %v1985_v7, %v1150_v30  ;;  %v1958_v37 = vpop.f32.mrb[32].mxu0 }
 0x16f   :  { %v1986_v31 = vpop.f32.mrb[32].mxu1  ;;  %v1959_v39 = vpop.f32.mrb[33].mxu0 }
 0x170   :  { %v1987_v38 = vpop.f32.mrb[33].mxu1  ;;  %v1960_v46 = vadd.f32 %v1959_v39, %v1958_v37  ;;  %v1961_v47 = vpop.f32.mrb[34].mxu0 }
 0x171   :  { %v1988_v40 = vadd.f32 %v1987_v38, %v1986_v31  ;;  %v1989_v45 = vpop.f32.mrb[34].mxu1  ;;  %v1962_v49 = vpop.f32.mrb[35].mxu0 }
 0x172   :  { %v1990_v48 = vpop.f32.mrb[35].mxu1  ;;  %v1155_v53 = vadd.f32 %v1960_v46, %v2946_v19  ;;  %v1963_v54 = vadd.f32 %v1962_v49, %v1961_v47 }
 0x173   :  { %v1991_v51 = vadd.f32 %v1990_v48, %v1989_v45 }
 0x174   :  { %v1204_v55 = vadd.f32 %v1988_v40, %v1155_v53  ;;  %v1158_v56 = vadd.f32 %v1963_v54, %v2946_v19 }
 0x176   :  { %v1207_v59 = vadd.f32 %v1991_v51, %v1158_v56 }
 0x177   :  { %v2134_v58 = vpop.f32.mrb[36].mxu1 }
 0x178   :  { %v1293_v61 = vpop.f32.mrb[37].mxu1 }
 0x179   :  { %v2135_v60 = vpop.f32.mrb[38].mxu1 }
 0x17a   :  { %v1296_v62 = vpop.f32.mrb[39].mxu1 }
 0x186   :  { %v2008_v63 = vpop.f32.mrb[36].mxu0 }
 0x187   :  { %v2009_v32 = vpop.f32.mrb[37].mxu0 }
 0x188   :  { %v2010_v33 = vadd.f32 %v2009_v32, %v2008_v63  ;;  %v2011_v34 = vpop.f32.mrb[38].mxu0 }
 0x189   :  { %v2012_v35 = vpop.f32.mrb[39].mxu0 }
 0x18a   :  { %v1245_v41 = vadd.f32 %v2010_v33, %v1196_v10  ;;  %v2013_v42 = vadd.f32 %v2012_v35, %v2011_v34 }
 0x18c   :  { %v2980_v43 = vadd.f32 %v1293_v61, %v1245_v41  ;;  %v1248_v44 = vadd.f32 %v2013_v42, %v1199_v36 }
 0x18e   :  { %v2982_v0 = vadd.f32 %v1296_v62, %v1248_v44  ;;  %v2014_v2 = vpop.f32.mrb[40].mxu0  ;;  %v1308_v42 = vmax.f32 %v2980_v43, 0.0 }
 0x18f   :  { %v2015_v4 = vpop.f32.mrb[41].mxu0 }
 0x190   :  { %v2016_v1 = vadd.f32 %v2015_v4, %v2014_v2  ;;  %v2017_v3 = vpop.f32.mrb[42].mxu0 }
 0x191   :  { %v2018_v6 = vpop.f32.mrb[43].mxu0 }
 0x192   :  { %v1253_v8 = vadd.f32 %v2016_v1, %v1204_v55  ;;  %v2019_v9 = vadd.f32 %v2018_v6, %v2017_v3  ;;  %v1309_v3 = vmax.f32 %v2982_v0, 0.0 }
 0x194   :  { %v2984_v11 = vadd.f32 %v2134_v58, %v1253_v8  ;;  %v1256_v50 = vadd.f32 %v2019_v9, %v1207_v59 }
 0x196   :  { %v2986_v13 = vadd.f32 %v2135_v60, %v1256_v50 }
 0x197   :  { %v2040_v12 = vpop.f32.mrb[40].mxu1 }
 0x198   :  { %v2041_v14 = vpop.f32.mrb[41].mxu1 }
 0x199   :  { %v2042_v16 = vadd.f32 %v2041_v14, %v2040_v12  ;;  %v2043_v17 = vpop.f32.mrb[42].mxu1 }
 0x19a   :  { %v2044_v18 = vpop.f32.mrb[43].mxu1 }
 0x19b   :  { %v2045_v20 = vadd.f32 %v2044_v18, %v2043_v17  ;;  %v1439_v28 = vadd.f32 %v2042_v16, %v2946_v19 }
 0x19d   :  { %v1442_v31 = vadd.f32 %v2045_v20, %v2946_v19 }
 0x19f   :  { %v2046_v21 = vpop.f32.mrb[44].mxu1 }
 0x1a0   :  { %v2047_v22 = vpop.f32.mrb[45].mxu1 }
 0x1a1   :  { %v2048_v23 = vadd.f32 %v2047_v22, %v2046_v21  ;;  %v2049_v24 = vpop.f32.mrb[46].mxu1  ;;  %v1310_v22 = vmax.f32 %v2984_v11, 0.0 }
 0x1a2   :  { %v2050_v25 = vpop.f32.mrb[47].mxu1 }
 0x1a3   :  { %v2051_v26 = vadd.f32 %v2050_v25, %v2049_v24  ;;  %v1447_v39 = vadd.f32 %v2048_v23, %v2946_v19 }
 0x1a5   :  { %v1450_v49 = vadd.f32 %v2051_v26, %v2946_v19 }
 0x1a6   :  { %v2068_v27 = vpop.f32.mrb[44].mxu0 }
 0x1a7   :  { %v2069_v7 = vpop.f32.mrb[45].mxu0 }
 0x1a8   :  { %v2070_v29 = vadd.f32 %v2069_v7, %v2068_v27  ;;  %v2071_v10 = vpop.f32.mrb[46].mxu0 }
 0x1a9   :  { %v2072_v30 = vpop.f32.mrb[47].mxu0 }
 0x1aa   :  { %v1488_v36 = vadd.f32 %v2070_v29, %v1439_v28  ;;  %v2073_v37 = vadd.f32 %v2072_v30, %v2071_v10 }
 0x1ac   :  { %v1491_v38 = vadd.f32 %v2073_v37, %v1442_v31 }
 0x1ae   :  { %v2074_v40 = vpop.f32.mrb[48].mxu0 }
 0x1af   :  { %v2075_v45 = vpop.f32.mrb[49].mxu0 }
 0x1b0   :  { %v2076_v46 = vadd.f32 %v2075_v45, %v2074_v40  ;;  %v2077_v47 = vpop.f32.mrb[50].mxu0 }
 0x1b1   :  { %v2078_v48 = vpop.f32.mrb[51].mxu0 }
 0x1b2   :  { %v1496_v51 = vadd.f32 %v2076_v46, %v1447_v39  ;;  %v2079_v53 = vadd.f32 %v2078_v48, %v2077_v47 }
 0x1b4   :  { %v1499_v54 = vadd.f32 %v2079_v53, %v1450_v49 }
 0x1b6   :  { %v2142_v58 = vpop.f32.mrb[52].mxu0 }
 0x1b7   :  { %v2096_v55 = vpop.f32.mrb[48].mxu1  ;;  %v1585_v60 = vpop.f32.mrb[53].mxu0 }
 0x1b8   :  { %v2097_v56 = vpop.f32.mrb[49].mxu1  ;;  %v2143_v63 = vpop.f32.mrb[54].mxu0 }
 0x1b9   :  { %v2098_v59 = vadd.f32 %v2097_v56, %v2096_v55  ;;  %v2099_v61 = vpop.f32.mrb[50].mxu1  ;;  %v1588_v34 = vpop.f32.mrb[55].mxu0 }
 0x1ba   :  { %v2100_v62 = vpop.f32.mrb[51].mxu1 }
 0x1bb   :  { %v2101_v32 = vadd.f32 %v2100_v62, %v2099_v61  ;;  %v1537_v33 = vadd.f32 %v2098_v59, %v1488_v36 }
 0x1bd   :  { %v1586_v35 = vadd.f32 %v1585_v60, %v1537_v33  ;;  %v1540_v41 = vadd.f32 %v2101_v32, %v1491_v38 }
 0x1bf   :  { %v1600_v44 = vmax.f32 %v1586_v35, 0.0  ;;  %v1589_v19 = vadd.f32 %v1588_v34, %v1540_v41  ;;  %v2102_v2 = vpop.f32.mrb[52].mxu1 }
 0x1c0   :  { %v2103_v4 = vpop.f32.mrb[53].mxu1 }
 0x1c1   :  { %v1604_v1 = vmax.f32 %v1308_v42, %v1600_v44  ;;  %v1601_v6 = vmax.f32 %v1589_v19, 0.0  ;;  %v2104_v8 = vadd.f32 %v2103_v4, %v2102_v2  ;;  %v2105_v9 = vpop.f32.mrb[54].mxu1 }
 0x1c2   :  { %v2106_v50 = vpop.f32.mrb[55].mxu1 }
 0x1c3   :  { %v1608_v12 = vmax.f32 %v2965_v52, %v1604_v1  ;;  %v1605_v14 = vmax.f32 %v1309_v3, %v1601_v6  ;;  %v1545_v16 = vadd.f32 %v2104_v8, %v1496_v51  ;;  %v2107_v17 = vadd.f32 %v2106_v50, %v2105_v9 }
 0x1c4   :  { %v1311_v52 = vmax.f32 %v2986_v13, 0.0 }
 0x1c5   :  { %v1756_v18 = vpack.c.bf16 %v1608_v12, %v1608_v12  ;;  %v1609_v43 = vmax.f32 %v2968_v5, %v1605_v14  ;;  %v1594_v20 = vadd.f32 %v2142_v58, %v1545_v16  ;;  %v1548_v21 = vadd.f32 %v2107_v17, %v1499_v54 }
 0x1c7   :  { %1629 = vst.msk [vmem:[%s3022_s6] sm:$0xf] %vm1628_vm1, %v1756_v18  ;;  %v1757_v0 = vpack.c.bf16 %v1609_v43, %v1609_v43  ;;  %v1602_v23 = vmax.f32 %v1594_v20, 0.0  ;;  %v1597_v24 = vadd.f32 %v2143_v63, %v1548_v21 }
 0x1c9   :  { %1630 = vst.msk [vmem:[%s3022_s6 + $0x4] sm:$0xf] %vm1628_vm1, %v1757_v0  ;;  %v1606_v5 = vmax.f32 %v1310_v22, %v1602_v23  ;;  %v1603_v25 = vmax.f32 %v1597_v24, 0.0 }
 0x1cb   :  { %v1610_v26 = vmax.f32 %v2972_v15, %v1606_v5  ;;  %v1607_v11 = vmax.f32 %v1311_v52, %v1603_v25 }
 0x1cd   :  { %v1758_v27 = vpack.c.bf16 %v1610_v26, %v1610_v26  ;;  %v1611_v7 = vmax.f32 %v2974_v57, %v1607_v11 }
 0x1cf   :  { %1631 = vst.msk [vmem:[%s3022_s6 + $0x8] sm:$0xf] %vm1628_vm1, %v1758_v27  ;;  %v1759_v28 = vpack.c.bf16 %v1611_v7, %v1611_v7 }
 0x1d1   :  { %1632 = vst.msk [vmem:[%s3022_s6 + $0xc] sm:$0xf] %vm1628_vm1, %v1759_v28 }

// kernel: fedavg_cnn_forward.5
= control target key start
LH: loop header
LB: loop body
LE: loop exit
PB: predicated region body
PF: predicated region fallthrough
CT: control target
= control target key end

     0   :  { %v281_v36 = vlaneseq  ;;  %v3137_v37 = vmov 1966171168   ;;  %s4087_s0 = inlined_call_operand.vmem [shape: bf16[2,1024], index: 0, kind: input, shape index: {}]   ;;  %s4088_s1 = inlined_call_operand.vmem [shape: bf16[1024,512], index: 1, kind: input, shape index: {}]   ;;  %s4089_s2 = inlined_call_operand.vmem [shape: f32[1,512], index: 2, kind: input, shape index: {}]   ;;  %s4090_s3 = inlined_call_operand.vmem [shape: bf16[512,128], index: 3, kind: input, shape index: {}]   ;;  %s4091_s4 = inlined_call_operand.vmem [shape: f32[1,128], index: 4, kind: input, shape index: {}]   ;;  %s4092_s5 = inlined_call_operand.hbm [shape: f32[2,128], index: 5, kind: output, shape index: {}]  }
   0x1   :  { %v2696_v0 = vld [vmem:[%s4088_s1 + $0x4] ss:$16 sps:$4 sm:$0xff]   ;;  %v2698_v1 = vld [vmem:[%s4088_s1 + $0xc] ss:$16 sps:$4 sm:$0xff]   ;;  %v2700_v2 = vld [vmem:[%s4088_s1] ss:$16 sps:$4 sm:$0xff]   ;;  %v304_v38 = vunpack.c.l.s4 %v3137_v37 }
   0x2   :  { %1639 = vmatprep.subr.bf16.mxu0 %v2696_v0  ;;  %v2701_v3 = vld [vmem:[%s4088_s1 + $0x8] ss:$16 sps:$4 sm:$0xff]   ;;  %1803 = vmatprep.subr.bf16.mxu1 %v2698_v1  ;;  %v2702_v4 = vld [vmem:[%s4088_s1 + $0x24] ss:$16 sps:$4 sm:$0xff]   ;;  %v2704_v5 = vld [vmem:[%s4088_s1 + $0x2c] ss:$16 sps:$4 sm:$0xff]  }
   0x3   :  { %1640 = vmatpush1.bf16.msra.mxu0 %v2700_v2  ;;  %1804 = vmatpush1.bf16.msra.mxu1 %v2701_v3  ;;  %v2706_v6 = vld [vmem:[%s4088_s1 + $0x20] ss:$16 sps:$4 sm:$0xff]   ;;  %v2707_v7 = vld [vmem:[%s4088_s1 + $0x28] ss:$16 sps:$4 sm:$0xff]   ;;  %v2708_v8 = vld [vmem:[%s4088_s1 + $0x44] ss:$16 sps:$4 sm:$0xff]   ;;  %v305_v43 = vunpack.c.0.s8 %v304_v38 }
   0x4   :  { %1641 = vmatprep.subr.bf16.mxu0 %v2702_v4  ;;  %1805 = vmatprep.subr.bf16.mxu1 %v2704_v5  ;;  %v2710_v9 = vld [vmem:[%s4088_s1 + $0x4c] ss:$16 sps:$4 sm:$0xff]   ;;  %v2712_v10 = vld [vmem:[%s4088_s1 + $0x40] ss:$16 sps:$4 sm:$0xff]   ;;  %v2713_v11 = vld [vmem:[%s4088_s1 + $0x48] ss:$16 sps:$4 sm:$0xff]  }
   0x5   :  { %v2714_v12 = vld [vmem:[%s4088_s1 + $0x64] ss:$16 sps:$4 sm:$0xff]   ;;  %v2716_v13 = vld [vmem:[%s4088_s1 + $0x6c] ss:$16 sps:$4 sm:$0xff]   ;;  %v2718_v14 = vld [vmem:[%s4088_s1 + $0x60] ss:$16 sps:$4 sm:$0xff]  }
   0x6   :  { %v2719_v15 = vld [vmem:[%s4088_s1 + $0x68] ss:$16 sps:$4 sm:$0xff]   ;;  %v2720_v16 = vld [vmem:[%s4088_s1 + $0x84] ss:$16 sps:$4 sm:$0xff]   ;;  %v2722_v17 = vld [vmem:[%s4088_s1 + $0x8c] ss:$16 sps:$4 sm:$0xff]  }
   0x7   :  { %1642 = vmatpush1.bf16.msra.mxu0 %v2706_v6  ;;  %1806 = vmatpush1.bf16.msra.mxu1 %v2707_v7  ;;  %v2724_v18 = vld [vmem:[%s4088_s1 + $0x80] ss:$16 sps:$4 sm:$0xff]   ;;  %v2725_v19 = vld [vmem:[%s4088_s1 + $0x88] ss:$16 sps:$4 sm:$0xff]   ;;  %v2726_v20 = vld [vmem:[%s4088_s1 + $0xa4] ss:$16 sps:$4 sm:$0xff]  }
   0x8   :  { %1643 = vmatprep.subr.bf16.mxu0 %v2708_v8  ;;  %1807 = vmatprep.subr.bf16.mxu1 %v2710_v9  ;;  %v2728_v21 = vld [vmem:[%s4088_s1 + $0xac] ss:$16 sps:$4 sm:$0xff]   ;;  %v2730_v22 = vld [vmem:[%s4088_s1 + $0xa0] ss:$16 sps:$4 sm:$0xff]   ;;  %v2731_v23 = vld [vmem:[%s4088_s1 + $0xa8] ss:$16 sps:$4 sm:$0xff]  }
   0x9   :  { %v2732_v24 = vld [vmem:[%s4088_s1 + $0xc4] ss:$16 sps:$4 sm:$0xff]   ;;  %v2734_v25 = vld [vmem:[%s4088_s1 + $0xcc] ss:$16 sps:$4 sm:$0xff]   ;;  %v2736_v26 = vld [vmem:[%s4088_s1 + $0xc0] ss:$16 sps:$4 sm:$0xff]  }
   0xa   :  { %v2737_v27 = vld [vmem:[%s4088_s1 + $0xc8] ss:$16 sps:$4 sm:$0xff]   ;;  %v2738_v28 = vld [vmem:[%s4088_s1 + $0xe4] ss:$16 sps:$4 sm:$0xff]   ;;  %v2740_v29 = vld [vmem:[%s4088_s1 + $0xec] ss:$16 sps:$4 sm:$0xff]  }
   0xb   :  { %1644 = vmatpush1.bf16.msra.mxu0 %v2712_v10  ;;  %1808 = vmatpush1.bf16.msra.mxu1 %v2713_v11  ;;  %v2742_v30 = vld [vmem:[%s4088_s1 + $0xe0] ss:$16 sps:$4 sm:$0xff]   ;;  %v2743_v31 = vld [vmem:[%s4088_s1 + $0xe8] ss:$16 sps:$4 sm:$0xff]   ;;  %v2744_v32 = vld [vmem:[%s4088_s1 + $0x104] ss:$16 sps:$4 sm:$0xff]  }
   0xc   :  { %1645 = vmatprep.subr.bf16.mxu0 %v2714_v12  ;;  %1809 = vmatprep.subr.bf16.mxu1 %v2716_v13  ;;  %v2746_v33 = vld [vmem:[%s4088_s1 + $0x10c] ss:$16 sps:$4 sm:$0xff]   ;;  %v2748_v34 = vld [vmem:[%s4088_s1 + $0x100] ss:$16 sps:$4 sm:$0xff]   ;;  %v2749_v35 = vld [vmem:[%s4088_s1 + $0x108] ss:$16 sps:$4 sm:$0xff]  }
   0xd   :  { %v2750_v39 = vld [vmem:[%s4088_s1 + $0x124] ss:$16 sps:$4 sm:$0xff]   ;;  %v2752_v40 = vld [vmem:[%s4088_s1 + $0x12c] ss:$16 sps:$4 sm:$0xff]   ;;  %v2754_v41 = vld [vmem:[%s4088_s1 + $0x120] ss:$16 sps:$4 sm:$0xff]  }
   0xe   :  { %v3286_v42 = vshrl.u32 %v281_v36, 7  ;;  %v2755_v44 = vld [vmem:[%s4088_s1 + $0x128] ss:$16 sps:$4 sm:$0xff]   ;;  %v2756_v45 = vld [vmem:[%s4088_s1 + $0x144] ss:$16 sps:$4 sm:$0xff]  }
   0xf   :  { %1646 = vmatpush1.bf16.msra.mxu0 %v2718_v14  ;;  %1810 = vmatpush1.bf16.msra.mxu1 %v2719_v15  ;;  %v2758_v46 = vld [vmem:[%s4088_s1 + $0x14c] ss:$16 sps:$4 sm:$0xff]   ;;  %v2760_v47 = vld [vmem:[%s4088_s1 + $0x140] ss:$16 sps:$4 sm:$0xff]   ;;  %v2761_v48 = vld [vmem:[%s4088_s1 + $0x148] ss:$16 sps:$4 sm:$0xff]  }
  0x10   :  { %1647 = vmatprep.subr.bf16.mxu0 %v2720_v16  ;;  %1811 = vmatprep.subr.bf16.mxu1 %v2722_v17  ;;  %v3304_v49 = vsub.s32 %v305_v43, %v3286_v42  ;;  %v2762_v50 = vld [vmem:[%s4088_s1 + $0x164] ss:$16 sps:$4 sm:$0xff]   ;;  %v2764_v51 = vld [vmem:[%s4088_s1 + $0x16c] ss:$16 sps:$4 sm:$0xff]   ;;  %v2766_v53 = vld [vmem:[%s4088_s1 + $0x160] ss:$16 sps:$4 sm:$0xff]  }
  0x11   :  { %v22_v52 = vld [vmem:[%s4087_s0] sm:$0xff]  ;;  %v2767_v55 = vld [vmem:[%s4088_s1 + $0x168] ss:$16 sps:$4 sm:$0xff]   ;;  %v2770_v57 = vld [vmem:[%s4088_s1 + $0x18c] ss:$16 sps:$4 sm:$0xff]  }
  0x12   :  { %v309_v54 = vrot.slane %v22_v52, %v3304_v49  ;;  %v2768_v56 = vld [vmem:[%s4088_s1 + $0x184] ss:$16 sps:$4 sm:$0xff]   ;;  %v2772_v59 = vld [vmem:[%s4088_s1 + $0x180] ss:$16 sps:$4 sm:$0xff]   ;;  %v2773_v61 = vld [vmem:[%s4088_s1 + $0x188] ss:$16 sps:$4 sm:$0xff]   ;;  %v302_v9 = vcombine.high %v22_v52, %v22_v52 }
  0x13   :  { %1648 = vmatpush1.bf16.msra.mxu0 %v2724_v18  ;;  %1812 = vmatpush1.bf16.msra.mxu1 %v2725_v19  ;;  %v2774_v62 = vld [vmem:[%s4088_s1 + $0x1a4] ss:$16 sps:$4 sm:$0xff]   ;;  %v2776_v63 = vld [vmem:[%s4088_s1 + $0x1ac] ss:$16 sps:$4 sm:$0xff]   ;;  %v2778_v0 = vld [vmem:[%s4088_s1 + $0x1a0] ss:$16 sps:$4 sm:$0xff]  }
  0x14   :  { %1649 = vmatprep.subr.bf16.mxu0 %v2726_v20  ;;  %1813 = vmatprep.subr.bf16.mxu1 %v2728_v21  ;;  %v317_v58 = vcombine.high %v309_v54, %v309_v54  ;;  %v2779_v1 = vld [vmem:[%s4088_s1 + $0x1a8] ss:$16 sps:$4 sm:$0xff]   ;;  %v2780_v2 = vld [vmem:[%s4088_s1 + $0x1c4] ss:$16 sps:$4 sm:$0xff]   ;;  %v2782_v3 = vld [vmem:[%s4088_s1 + $0x1cc] ss:$16 sps:$4 sm:$0xff]   ;;  %v316_v13 = vrot.slane %v302_v9, %v3304_v49  ;;  %v3382_v15 = vrot.slane %v309_v54, %v3304_v49 }
  0x15   :  { %v2784_v4 = vld [vmem:[%s4088_s1 + $0x1c0] ss:$16 sps:$4 sm:$0xff]   ;;  %v2785_v5 = vld [vmem:[%s4088_s1 + $0x1c8] ss:$16 sps:$4 sm:$0xff]   ;;  %v2786_v6 = vld [vmem:[%s4088_s1 + $0x1e4] ss:$16 sps:$4 sm:$0xff]  }
  0x16   :  { %v339_v60 = vrot.slane %v317_v58, %v3304_v49  ;;  %v2788_v7 = vld [vmem:[%s4088_s1 + $0x1ec] ss:$16 sps:$4 sm:$0xff]   ;;  %v2790_v8 = vld [vmem:[%s4088_s1 + $0x1e0] ss:$16 sps:$4 sm:$0xff]   ;;  %v2791_v10 = vld [vmem:[%s4088_s1 + $0x1e8] ss:$16 sps:$4 sm:$0xff]   ;;  %v318_v16 = vcombine.high %v316_v13, %v316_v13  ;;  %v3397_v21 = vrot.slane %v316_v13, %v3304_v49 }
  0x17   :  { %1650 = vmatpush1.bf16.msra.mxu0 %v2730_v22  ;;  %1814 = vmatpush1.bf16.msra.mxu1 %v2731_v23  ;;  %v2794_v11 = vld [vmem:[%s4088_s1 + $0x204] ss:$16 sps:$4 sm:$0xff]   ;;  %v2797_v12 = vld [vmem:[%s4088_s1 + $0x20c] ss:$16 sps:$4 sm:$0xff]   ;;  %v2792_v14 = vld [vmem:[%s4088_s1 + $0x200] ss:$16 sps:$4 sm:$0xff]  }
  0x18   :  { %1651 = vmatprep.subr.bf16.mxu0 %v2732_v24  ;;  %1815 = vmatprep.subr.bf16.mxu1 %v2734_v25  ;;  %v2795_v17 = vld [vmem:[%s4088_s1 + $0x208] ss:$16 sps:$4 sm:$0xff]   ;;  %v2800_v18 = vld [vmem:[%s4088_s1 + $0x224] ss:$16 sps:$4 sm:$0xff]   ;;  %v2803_v19 = vld [vmem:[%s4088_s1 + $0x22c] ss:$16 sps:$4 sm:$0xff]   ;;  %v3394_v20 = vrot.slane %v318_v16, %v3304_v49  ;;  %v349_v22 = vcombine.high %v339_v60, %v339_v60 }
  0x19   :  { %1671 = vmatprep.mubr.bf16.mxu0 %v339_v60  ;;  %1835 = vmatprep.mubr.bf16.mxu1 %v339_v60  ;;  %v2798_v23 = vld [vmem:[%s4088_s1 + $0x220] ss:$16 sps:$4 sm:$0xff]   ;;  %v2801_v24 = vld [vmem:[%s4088_s1 + $0x228] ss:$16 sps:$4 sm:$0xff]   ;;  %v2806_v25 = vld [vmem:[%s4088_s1 + $0x244] ss:$16 sps:$4 sm:$0xff]  }
  0x1a   :  { %v2819_v36 = vld [vmem:[%s4088_s1 + $0x288] ss:$16 sps:$4 sm:$0xff]   ;;  %v2824_v37 = vld [vmem:[%s4088_s1 + $0x2a4] ss:$16 sps:$4 sm:$0xff]   ;;  %v2827_v38 = vld [vmem:[%s4088_s1 + $0x2ac] ss:$16 sps:$4 sm:$0xff]  }
  0x1b   :  { %1652 = vmatpush1.bf16.msra.mxu0 %v2736_v26  ;;  %1816 = vmatpush1.bf16.msra.mxu1 %v2737_v27  ;;  %v2809_v26 = vld [vmem:[%s4088_s1 + $0x24c] ss:$16 sps:$4 sm:$0xff]   ;;  %v2804_v27 = vld [vmem:[%s4088_s1 + $0x240] ss:$16 sps:$4 sm:$0xff]   ;;  %v2837_v49 = vld [vmem:[%s4088_s1 + $0x2e8] ss:$16 sps:$4 sm:$0xff]  }
  0x1c   :  { %1653 = vmatprep.subr.bf16.mxu0 %v2738_v28  ;;  %1817 = vmatprep.subr.bf16.mxu1 %v2740_v29  ;;  %v2807_v28 = vld [vmem:[%s4088_s1 + $0x248] ss:$16 sps:$4 sm:$0xff]   ;;  %v2812_v29 = vld [vmem:[%s4088_s1 + $0x264] ss:$16 sps:$4 sm:$0xff]   ;;  %v2833_v43 = vld [vmem:[%s4088_s1 + $0x2cc] ss:$16 sps:$4 sm:$0xff]  }
  0x1d   :  { %v2840_v52 = vld [vmem:[%s4088_s1 + $0x300] ss:$16 sps:$4 sm:$0xff]   ;;  %v2848_v54 = vld [vmem:[%s4088_s1 + $0x324] ss:$16 sps:$4 sm:$0xff]   ;;  %v2873_v9 = vld [vmem:[%s4088_s1 + $0x3a8] ss:$16 sps:$4 sm:$0xff]  }
  0x1e   :  { %v2854_v58 = vld [vmem:[%s4088_s1 + $0x344] ss:$16 sps:$4 sm:$0xff]   ;;  %v2852_v60 = vld [vmem:[%s4088_s1 + $0x340] ss:$16 sps:$4 sm:$0xff]   ;;  %v2879_v13 = vld [vmem:[%s4088_s1 + $0x3c8] ss:$16 sps:$4 sm:$0xff]  }
  0x1f   :  { %1654 = vmatpush1.bf16.msra.mxu0 %v2742_v30  ;;  %1818 = vmatpush1.bf16.msra.mxu1 %v2743_v31  ;;  %v2815_v30 = vld [vmem:[%s4088_s1 + $0x26c] ss:$16 sps:$4 sm:$0xff]   ;;  %v2810_v31 = vld [vmem:[%s4088_s1 + $0x260] ss:$16 sps:$4 sm:$0xff]  }
  0x20   :  { %1655 = vmatprep.subr.bf16.mxu0 %v2744_v32  ;;  %1819 = vmatprep.subr.bf16.mxu1 %v2746_v33  ;;  %v2813_v32 = vld [vmem:[%s4088_s1 + $0x268] ss:$16 sps:$4 sm:$0xff]   ;;  %v2818_v33 = vld [vmem:[%s4088_s1 + $0x284] ss:$16 sps:$4 sm:$0xff]   ;;  %v2887_v16 = vld [vmem:[%s4088_s1 + $0x3ec] ss:$16 sps:$4 sm:$0xff]  }
  0x23   :  { %1656 = vmatpush1.bf16.msra.mxu0 %v2748_v34  ;;  %1820 = vmatpush1.bf16.msra.mxu1 %v2749_v35  ;;  %v2821_v34 = vld [vmem:[%s4088_s1 + $0x28c] ss:$16 sps:$4 sm:$0xff]   ;;  %v2816_v35 = vld [vmem:[%s4088_s1 + $0x280] ss:$16 sps:$4 sm:$0xff]  }
  0x24   :  { %1657 = vmatprep.subr.bf16.mxu0 %v2750_v39  ;;  %1821 = vmatprep.subr.bf16.mxu1 %v2752_v40  ;;  %v2822_v39 = vld [vmem:[%s4088_s1 + $0x2a0] ss:$16 sps:$4 sm:$0xff]   ;;  %v2825_v40 = vld [vmem:[%s4088_s1 + $0x2a8] ss:$16 sps:$4 sm:$0xff]  }
  0x27   :  { %1658 = vmatpush1.bf16.msra.mxu0 %v2754_v41  ;;  %1822 = vmatpush1.bf16.msra.mxu1 %v2755_v44  ;;  %v2830_v41 = vld [vmem:[%s4088_s1 + $0x2c4] ss:$16 sps:$4 sm:$0xff]   ;;  %v2828_v44 = vld [vmem:[%s4088_s1 + $0x2c0] ss:$16 sps:$4 sm:$0xff]  }
  0x28   :  { %1659 = vmatprep.subr.bf16.mxu0 %v2756_v45  ;;  %1823 = vmatprep.subr.bf16.mxu1 %v2758_v46  ;;  %v2831_v45 = vld [vmem:[%s4088_s1 + $0x2c8] ss:$16 sps:$4 sm:$0xff]   ;;  %v2836_v46 = vld [vmem:[%s4088_s1 + $0x2e4] ss:$16 sps:$4 sm:$0xff]  }
  0x2b   :  { %1660 = vmatpush1.bf16.msra.mxu0 %v2760_v47  ;;  %1824 = vmatpush1.bf16.msra.mxu1 %v2761_v48  ;;  %v2839_v47 = vld [vmem:[%s4088_s1 + $0x2ec] ss:$16 sps:$4 sm:$0xff]   ;;  %v2834_v48 = vld [vmem:[%s4088_s1 + $0x2e0] ss:$16 sps:$4 sm:$0xff]  }
  0x2c   :  { %1661 = vmatprep.subr.bf16.mxu0 %v2762_v50  ;;  %1825 = vmatprep.subr.bf16.mxu1 %v2764_v51  ;;  %v2842_v50 = vld [vmem:[%s4088_s1 + $0x304] ss:$16 sps:$4 sm:$0xff]   ;;  %v2845_v51 = vld [vmem:[%s4088_s1 + $0x30c] ss:$16 sps:$4 sm:$0xff]  }
  0x2f   :  { %1662 = vmatpush1.bf16.msra.mxu0 %v2766_v53  ;;  %1826 = vmatpush1.bf16.msra.mxu1 %v2767_v55  ;;  %v2843_v53 = vld [vmem:[%s4088_s1 + $0x308] ss:$16 sps:$4 sm:$0xff]   ;;  %v2851_v55 = vld [vmem:[%s4088_s1 + $0x32c] ss:$16 sps:$4 sm:$0xff]  }
  0x30   :  { %1663 = vmatprep.subr.bf16.mxu0 %v2768_v56  ;;  %1827 = vmatprep.subr.bf16.mxu1 %v2770_v57  ;;  %v2846_v56 = vld [vmem:[%s4088_s1 + $0x320] ss:$16 sps:$4 sm:$0xff]   ;;  %v2849_v57 = vld [vmem:[%s4088_s1 + $0x328] ss:$16 sps:$4 sm:$0xff]  }
  0x33   :  { %1664 = vmatpush1.bf16.msra.mxu0 %v2772_v59  ;;  %1828 = vmatpush1.bf16.msra.mxu1 %v2773_v61  ;;  %v2857_v59 = vld [vmem:[%s4088_s1 + $0x34c] ss:$16 sps:$4 sm:$0xff]   ;;  %v2855_v61 = vld [vmem:[%s4088_s1 + $0x348] ss:$16 sps:$4 sm:$0xff]  }
  0x34   :  { %1665 = vmatprep.subr.bf16.mxu0 %v2774_v62  ;;  %1829 = vmatprep.subr.bf16.mxu1 %v2776_v63  ;;  %v2860_v62 = vld [vmem:[%s4088_s1 + $0x364] ss:$16 sps:$4 sm:$0xff]   ;;  %v2863_v63 = vld [vmem:[%s4088_s1 + $0x36c] ss:$16 sps:$4 sm:$0xff]  }
  0x37   :  { %1666 = vmatpush1.bf16.msra.mxu0 %v2778_v0  ;;  %1830 = vmatpush1.bf16.msra.mxu1 %v2779_v1  ;;  %v2858_v0 = vld [vmem:[%s4088_s1 + $0x360] ss:$16 sps:$4 sm:$0xff]   ;;  %v2861_v1 = vld [vmem:[%s4088_s1 + $0x368] ss:$16 sps:$4 sm:$0xff]  }
  0x38   :  { %1667 = vmatprep.subr.bf16.mxu0 %v2780_v2  ;;  %1831 = vmatprep.subr.bf16.mxu1 %v2782_v3  ;;  %v2866_v2 = vld [vmem:[%s4088_s1 + $0x384] ss:$16 sps:$4 sm:$0xff]   ;;  %v2869_v3 = vld [vmem:[%s4088_s1 + $0x38c] ss:$16 sps:$4 sm:$0xff]  }
  0x3b   :  { %1668 = vmatpush1.bf16.msra.mxu0 %v2784_v4  ;;  %1832 = vmatpush1.bf16.msra.mxu1 %v2785_v5  ;;  %v2864_v4 = vld [vmem:[%s4088_s1 + $0x380] ss:$16 sps:$4 sm:$0xff]   ;;  %v2867_v5 = vld [vmem:[%s4088_s1 + $0x388] ss:$16 sps:$4 sm:$0xff]  }
  0x3c   :  { %1669 = vmatprep.subr.bf16.mxu0 %v2786_v6  ;;  %1833 = vmatprep.subr.bf16.mxu1 %v2788_v7  ;;  %v2872_v6 = vld [vmem:[%s4088_s1 + $0x3a4] ss:$16 sps:$4 sm:$0xff]   ;;  %v2875_v7 = vld [vmem:[%s4088_s1 + $0x3ac] ss:$16 sps:$4 sm:$0xff]  }
  0x3f   :  { %1670 = vmatpush1.bf16.msra.mxu0 %v2790_v8  ;;  %1834 = vmatpush1.bf16.msra.mxu1 %v2791_v10  ;;  %v2870_v8 = vld [vmem:[%s4088_s1 + $0x3a0] ss:$16 sps:$4 sm:$0xff]   ;;  %v2878_v10 = vld [vmem:[%s4088_s1 + $0x3c4] ss:$16 sps:$4 sm:$0xff]  }
  0x40   :  { %1680 = vmatprep.subr.bf16.mxu0 %v2794_v11  ;;  %1844 = vmatprep.subr.bf16.mxu1 %v2797_v12  ;;  %v2881_v11 = vld [vmem:[%s4088_s1 + $0x3cc] ss:$16 sps:$4 sm:$0xff]   ;;  %v2876_v12 = vld [vmem:[%s4088_s1 + $0x3c0] ss:$16 sps:$4 sm:$0xff]  }
  0x42   :  { %1672 = vmatmul.mubr.bf16.vlgmr.msra.gmra.mrb[0].mxu0 %v3382_v15  ;;  %1836 = vmatmul.mubr.bf16.vlgmr.msra.gmra.mrb[0].mxu1 %v3382_v15 }
  0x43   :  { %1681 = vmatpush1.bf16.msra.mxu0 %v2792_v14  ;;  %1845 = vmatpush1.bf16.msra.mxu1 %v2795_v17  ;;  %v2884_v14 = vld [vmem:[%s4088_s1 + $0x3e4] ss:$16 sps:$4 sm:$0xff]   ;;  %v2882_v17 = vld [vmem:[%s4088_s1 + $0x3e0] ss:$16 sps:$4 sm:$0xff]  }
  0x44   :  { %1682 = vmatprep.subr.bf16.mxu0 %v2800_v18  ;;  %1846 = vmatprep.subr.bf16.mxu1 %v2803_v19  ;;  %v2885_v18 = vld [vmem:[%s4088_s1 + $0x3e8] ss:$16 sps:$4 sm:$0xff]   ;;  %v2890_v19 = vld [vmem:[%s4088_s1 + $0x404] ss:$16 sps:$4 sm:$0xff]  }
  0x45   :  { %1712 = vmatprep.mubr.bf16.mxu0 %v349_v22  ;;  %1876 = vmatprep.mubr.bf16.mxu1 %v349_v22  ;;  %v2893_v22 = vld [vmem:[%s4088_s1 + $0x40c] ss:$16 sps:$4 sm:$0xff]  }
  0x47   :  { %1683 = vmatpush1.bf16.msra.mxu0 %v2798_v23  ;;  %1847 = vmatpush1.bf16.msra.mxu1 %v2801_v24  ;;  %v2888_v23 = vld [vmem:[%s4088_s1 + $0x400] ss:$16 sps:$4 sm:$0xff]   ;;  %v347_v24 = vcombine.high %v3382_v15, %v3382_v15 }
  0x48   :  { %1684 = vmatprep.subr.bf16.mxu0 %v2806_v25  ;;  %1848 = vmatprep.subr.bf16.mxu1 %v2809_v26  ;;  %v2891_v25 = vld [vmem:[%s4088_s1 + $0x408] ss:$16 sps:$4 sm:$0xff]   ;;  %v2896_v26 = vld [vmem:[%s4088_s1 + $0x424] ss:$16 sps:$4 sm:$0xff]   ;;  %v2894_v15 = vld [vmem:[%s4088_s1 + $0x420] ss:$16 sps:$4 sm:$0xff]  }
  0x4b   :  { %1685 = vmatpush1.bf16.msra.mxu0 %v2804_v27  ;;  %1849 = vmatpush1.bf16.msra.mxu1 %v2807_v28  ;;  %v2899_v27 = vld [vmem:[%s4088_s1 + $0x42c] ss:$16 sps:$4 sm:$0xff]   ;;  %v2897_v28 = vld [vmem:[%s4088_s1 + $0x428] ss:$16 sps:$4 sm:$0xff]  }
  0x4c   :  { %1686 = vmatprep.subr.bf16.mxu0 %v2812_v29  ;;  %1850 = vmatprep.subr.bf16.mxu1 %v2815_v30  ;;  %v2902_v29 = vld [vmem:[%s4088_s1 + $0x444] ss:$16 sps:$4 sm:$0xff]   ;;  %v2905_v30 = vld [vmem:[%s4088_s1 + $0x44c] ss:$16 sps:$4 sm:$0xff]  }
  0x4f   :  { %1687 = vmatpush1.bf16.msra.mxu0 %v2810_v31  ;;  %1851 = vmatpush1.bf16.msra.mxu1 %v2813_v32  ;;  %v2900_v31 = vld [vmem:[%s4088_s1 + $0x440] ss:$16 sps:$4 sm:$0xff]   ;;  %v2903_v32 = vld [vmem:[%s4088_s1 + $0x448] ss:$16 sps:$4 sm:$0xff]  }
  0x50   :  { %1688 = vmatprep.subr.bf16.mxu0 %v2818_v33  ;;  %1852 = vmatprep.subr.bf16.mxu1 %v2821_v34  ;;  %v2908_v33 = vld [vmem:[%s4088_s1 + $0x464] ss:$16 sps:$4 sm:$0xff]   ;;  %v2911_v34 = vld [vmem:[%s4088_s1 + $0x46c] ss:$16 sps:$4 sm:$0xff]  }
  0x53   :  { %1689 = vmatpush1.bf16.msra.mxu0 %v2816_v35  ;;  %1853 = vmatpush1.bf16.msra.mxu1 %v2819_v36  ;;  %v2906_v35 = vld [vmem:[%s4088_s1 + $0x460] ss:$16 sps:$4 sm:$0xff]   ;;  %v2909_v36 = vld [vmem:[%s4088_s1 + $0x468] ss:$16 sps:$4 sm:$0xff]  }
  0x54   :  { %1690 = vmatprep.subr.bf16.mxu0 %v2824_v37  ;;  %1854 = vmatprep.subr.bf16.mxu1 %v2827_v38  ;;  %v2914_v37 = vld [vmem:[%s4088_s1 + $0x484] ss:$16 sps:$4 sm:$0xff]   ;;  %v2917_v38 = vld [vmem:[%s4088_s1 + $0x48c] ss:$16 sps:$4 sm:$0xff]  }
  0x57   :  { %1691 = vmatpush1.bf16.msra.mxu0 %v2822_v39  ;;  %1855 = vmatpush1.bf16.msra.mxu1 %v2825_v40  ;;  %v2912_v39 = vld [vmem:[%s4088_s1 + $0x480] ss:$16 sps:$4 sm:$0xff]   ;;  %v2915_v40 = vld [vmem:[%s4088_s1 + $0x488] ss:$16 sps:$4 sm:$0xff]  }
  0x58   :  { %1692 = vmatprep.subr.bf16.mxu0 %v2830_v41  ;;  %1856 = vmatprep.subr.bf16.mxu1 %v2833_v43  ;;  %v2920_v41 = vld [vmem:[%s4088_s1 + $0x4a4] ss:$16 sps:$4 sm:$0xff]   ;;  %v2923_v43 = vld [vmem:[%s4088_s1 + $0x4ac] ss:$16 sps:$4 sm:$0xff]  }
  0x5b   :  { %1693 = vmatpush1.bf16.msra.mxu0 %v2828_v44  ;;  %1857 = vmatpush1.bf16.msra.mxu1 %v2831_v45  ;;  %v2918_v44 = vld [vmem:[%s4088_s1 + $0x4a0] ss:$16 sps:$4 sm:$0xff]   ;;  %v2921_v45 = vld [vmem:[%s4088_s1 + $0x4a8] ss:$16 sps:$4 sm:$0xff]  }
  0x5c   :  { %1694 = vmatprep.subr.bf16.mxu0 %v2836_v46  ;;  %1858 = vmatprep.subr.bf16.mxu1 %v2839_v47  ;;  %v2926_v46 = vld [vmem:[%s4088_s1 + $0x4c4] ss:$16 sps:$4 sm:$0xff]   ;;  %v2929_v47 = vld [vmem:[%s4088_s1 + $0x4cc] ss:$16 sps:$4 sm:$0xff]  }
  0x5f   :  { %1695 = vmatpush1.bf16.msra.mxu0 %v2834_v48  ;;  %1859 = vmatpush1.bf16.msra.mxu1 %v2837_v49  ;;  %v2924_v48 = vld [vmem:[%s4088_s1 + $0x4c0] ss:$16 sps:$4 sm:$0xff]   ;;  %v2927_v49 = vld [vmem:[%s4088_s1 + $0x4c8] ss:$16 sps:$4 sm:$0xff]  }
  0x60   :  { %1696 = vmatprep.subr.bf16.mxu0 %v2842_v50  ;;  %1860 = vmatprep.subr.bf16.mxu1 %v2845_v51  ;;  %v2932_v50 = vld [vmem:[%s4088_s1 + $0x4e4] ss:$16 sps:$4 sm:$0xff]   ;;  %v2935_v51 = vld [vmem:[%s4088_s1 + $0x4ec] ss:$16 sps:$4 sm:$0xff]  }
  0x63   :  { %1697 = vmatpush1.bf16.msra.mxu0 %v2840_v52  ;;  %1861 = vmatpush1.bf16.msra.mxu1 %v2843_v53  ;;  %v2930_v52 = vld [vmem:[%s4088_s1 + $0x4e0] ss:$16 sps:$4 sm:$0xff]   ;;  %v2933_v53 = vld [vmem:[%s4088_s1 + $0x4e8] ss:$16 sps:$4 sm:$0xff]  }
  0x64   :  { %1698 = vmatprep.subr.bf16.mxu0 %v2848_v54  ;;  %1862 = vmatprep.subr.bf16.mxu1 %v2851_v55  ;;  %v2938_v54 = vld [vmem:[%s4088_s1 + $0x504] ss:$16 sps:$4 sm:$0xff]   ;;  %v2941_v55 = vld [vmem:[%s4088_s1 + $0x50c] ss:$16 sps:$4 sm:$0xff]  }
  0x67   :  { %1699 = vmatpush1.bf16.msra.mxu0 %v2846_v56  ;;  %1863 = vmatpush1.bf16.msra.mxu1 %v2849_v57  ;;  %v2936_v56 = vld [vmem:[%s4088_s1 + $0x500] ss:$16 sps:$4 sm:$0xff]   ;;  %v2939_v57 = vld [vmem:[%s4088_s1 + $0x508] ss:$16 sps:$4 sm:$0xff]  }
  0x68   :  { %1700 = vmatprep.subr.bf16.mxu0 %v2854_v58  ;;  %1864 = vmatprep.subr.bf16.mxu1 %v2857_v59  ;;  %v2944_v58 = vld [vmem:[%s4088_s1 + $0x524] ss:$16 sps:$4 sm:$0xff]   ;;  %v2947_v59 = vld [vmem:[%s4088_s1 + $0x52c] ss:$16 sps:$4 sm:$0xff]  }
  0x6b   :  { %1701 = vmatpush1.bf16.msra.mxu0 %v2852_v60  ;;  %1865 = vmatpush1.bf16.msra.mxu1 %v2855_v61  ;;  %v2942_v60 = vld [vmem:[%s4088_s1 + $0x520] ss:$16 sps:$4 sm:$0xff]   ;;  %v2945_v61 = vld [vmem:[%s4088_s1 + $0x528] ss:$16 sps:$4 sm:$0xff]  }
  0x6c   :  { %1702 = vmatprep.subr.bf16.mxu0 %v2860_v62  ;;  %1866 = vmatprep.subr.bf16.mxu1 %v2863_v63  ;;  %v2950_v62 = vld [vmem:[%s4088_s1 + $0x544] ss:$16 sps:$4 sm:$0xff]   ;;  %v2953_v63 = vld [vmem:[%s4088_s1 + $0x54c] ss:$16 sps:$4 sm:$0xff]  }
  0x6f   :  { %1703 = vmatpush1.bf16.msra.mxu0 %v2858_v0  ;;  %1867 = vmatpush1.bf16.msra.mxu1 %v2861_v1  ;;  %v2948_v0 = vld [vmem:[%s4088_s1 + $0x540] ss:$16 sps:$4 sm:$0xff]   ;;  %v2951_v1 = vld [vmem:[%s4088_s1 + $0x548] ss:$16 sps:$4 sm:$0xff]  }
  0x70   :  { %1704 = vmatprep.subr.bf16.mxu0 %v2866_v2  ;;  %1868 = vmatprep.subr.bf16.mxu1 %v2869_v3  ;;  %v2956_v2 = vld [vmem:[%s4088_s1 + $0x564] ss:$16 sps:$4 sm:$0xff]   ;;  %v2959_v3 = vld [vmem:[%s4088_s1 + $0x56c] ss:$16 sps:$4 sm:$0xff]  }
  0x73   :  { %1705 = vmatpush1.bf16.msra.mxu0 %v2864_v4  ;;  %1869 = vmatpush1.bf16.msra.mxu1 %v2867_v5  ;;  %v2954_v4 = vld [vmem:[%s4088_s1 + $0x560] ss:$16 sps:$4 sm:$0xff]   ;;  %v2957_v5 = vld [vmem:[%s4088_s1 + $0x568] ss:$16 sps:$4 sm:$0xff]  }
  0x74   :  { %1706 = vmatprep.subr.bf16.mxu0 %v2872_v6  ;;  %1870 = vmatprep.subr.bf16.mxu1 %v2875_v7  ;;  %v2962_v6 = vld [vmem:[%s4088_s1 + $0x584] ss:$16 sps:$4 sm:$0xff]   ;;  %v2965_v7 = vld [vmem:[%s4088_s1 + $0x58c] ss:$16 sps:$4 sm:$0xff]  }
  0x77   :  { %1707 = vmatpush1.bf16.msra.mxu0 %v2870_v8  ;;  %1871 = vmatpush1.bf16.msra.mxu1 %v2873_v9  ;;  %v2960_v8 = vld [vmem:[%s4088_s1 + $0x580] ss:$16 sps:$4 sm:$0xff]   ;;  %v2963_v9 = vld [vmem:[%s4088_s1 + $0x588] ss:$16 sps:$4 sm:$0xff]  }
  0x78   :  { %1708 = vmatprep.subr.bf16.mxu0 %v2878_v10  ;;  %1872 = vmatprep.subr.bf16.mxu1 %v2881_v11  ;;  %v2968_v10 = vld [vmem:[%s4088_s1 + $0x5a4] ss:$16 sps:$4 sm:$0xff]   ;;  %v2971_v11 = vld [vmem:[%s4088_s1 + $0x5ac] ss:$16 sps:$4 sm:$0xff]  }
  0x7b   :  { %1709 = vmatpush1.bf16.msra.mxu0 %v2876_v12  ;;  %1873 = vmatpush1.bf16.msra.mxu1 %v2879_v13  ;;  %v2966_v12 = vld [vmem:[%s4088_s1 + $0x5a0] ss:$16 sps:$4 sm:$0xff]   ;;  %v2969_v13 = vld [vmem:[%s4088_s1 + $0x5a8] ss:$16 sps:$4 sm:$0xff]  }
  0x7c   :  { %1710 = vmatprep.subr.bf16.mxu0 %v2884_v14  ;;  %1874 = vmatprep.subr.bf16.mxu1 %v2887_v16  ;;  %v2974_v14 = vld [vmem:[%s4088_s1 + $0x5c4] ss:$16 sps:$4 sm:$0xff]   ;;  %v2977_v16 = vld [vmem:[%s4088_s1 + $0x5cc] ss:$16 sps:$4 sm:$0xff]  }
  0x7f   :  { %1711 = vmatpush1.bf16.msra.mxu0 %v2882_v17  ;;  %1875 = vmatpush1.bf16.msra.mxu1 %v2885_v18  ;;  %v2972_v17 = vld [vmem:[%s4088_s1 + $0x5c0] ss:$16 sps:$4 sm:$0xff]   ;;  %v2975_v18 = vld [vmem:[%s4088_s1 + $0x5c8] ss:$16 sps:$4 sm:$0xff]  }
  0x80   :  { %1721 = vmatprep.subr.bf16.mxu0 %v2890_v19  ;;  %1885 = vmatprep.subr.bf16.mxu1 %v2893_v22  ;;  %v2980_v19 = vld [vmem:[%s4088_s1 + $0x5e4] ss:$16 sps:$4 sm:$0xff]   ;;  %v2983_v22 = vld [vmem:[%s4088_s1 + $0x5ec] ss:$16 sps:$4 sm:$0xff]  }
  0x82   :  { %1713 = vmatmul.mubr.bf16.vlgmr.msra.gmra.mrb[0].mxu0 %v347_v24  ;;  %1877 = vmatmul.mubr.bf16.vlgmr.msra.gmra.mrb[0].mxu1 %v347_v24  ;;  %v2981_v24 = vld [vmem:[%s4088_s1 + $0x5e8] ss:$16 sps:$4 sm:$0xff]  }
  0x83   :  { %1722 = vmatpush1.bf16.msra.mxu0 %v2888_v23  ;;  %1886 = vmatpush1.bf16.msra.mxu1 %v2891_v25  ;;  %v2978_v23 = vld [vmem:[%s4088_s1 + $0x5e0] ss:$16 sps:$4 sm:$0xff]   ;;  %v2987_v25 = vld [vmem:[%s4088_s1 + $0x604] ss:$16 sps:$4 sm:$0xff]  }
  0x84   :  { %1723 = vmatprep.subr.bf16.mxu0 %v2896_v26  ;;  %1887 = vmatprep.subr.bf16.mxu1 %v2899_v27  ;;  %v2990_v26 = vld [vmem:[%s4088_s1 + $0x60c] ss:$16 sps:$4 sm:$0xff]   ;;  %v2985_v27 = vld [vmem:[%s4088_s1 + $0x600] ss:$16 sps:$4 sm:$0xff]  }
  0x85   :  { %1753 = vmatprep.mubr.bf16.mxu0 %v3394_v20  ;;  %1917 = vmatprep.mubr.bf16.mxu1 %v3394_v20 }
  0x87   :  { %1724 = vmatpush1.bf16.msra.mxu0 %v2894_v15  ;;  %1888 = vmatpush1.bf16.msra.mxu1 %v2897_v28  ;;  %v2988_v15 = vld [vmem:[%s4088_s1 + $0x608] ss:$16 sps:$4 sm:$0xff]   ;;  %v2993_v28 = vld [vmem:[%s4088_s1 + $0x624] ss:$16 sps:$4 sm:$0xff]  }
  0x88   :  { %1725 = vmatprep.subr.bf16.mxu0 %v2902_v29  ;;  %1889 = vmatprep.subr.bf16.mxu1 %v2905_v30  ;;  %v2996_v29 = vld [vmem:[%s4088_s1 + $0x62c] ss:$16 sps:$4 sm:$0xff]   ;;  %v2991_v30 = vld [vmem:[%s4088_s1 + $0x620] ss:$16 sps:$4 sm:$0xff]  }
  0x8b   :  { %1726 = vmatpush1.bf16.msra.mxu0 %v2900_v31  ;;  %1890 = vmatpush1.bf16.msra.mxu1 %v2903_v32  ;;  %v2994_v31 = vld [vmem:[%s4088_s1 + $0x628] ss:$16 sps:$4 sm:$0xff]   ;;  %v350_v32 = vcombine.high %v3394_v20, %v3394_v20  ;;  %v2997_v20 = vld [vmem:[%s4088_s1 + $0x640] ss:$16 sps:$4 sm:$0xff]  }
  0x8c   :  { %1727 = vmatprep.subr.bf16.mxu0 %v2908_v33  ;;  %1891 = vmatprep.subr.bf16.mxu1 %v2911_v34  ;;  %v2999_v33 = vld [vmem:[%s4088_s1 + $0x644] ss:$16 sps:$4 sm:$0xff]   ;;  %v3002_v34 = vld [vmem:[%s4088_s1 + $0x64c] ss:$16 sps:$4 sm:$0xff]  }
  0x8f   :  { %1728 = vmatpush1.bf16.msra.mxu0 %v2906_v35  ;;  %1892 = vmatpush1.bf16.msra.mxu1 %v2909_v36  ;;  %v3000_v35 = vld [vmem:[%s4088_s1 + $0x648] ss:$16 sps:$4 sm:$0xff]  }
  0x90   :  { %1729 = vmatprep.subr.bf16.mxu0 %v2914_v37  ;;  %1893 = vmatprep.subr.bf16.mxu1 %v2917_v38 }
  0x93   :  { %1730 = vmatpush1.bf16.msra.mxu0 %v2912_v39  ;;  %1894 = vmatpush1.bf16.msra.mxu1 %v2915_v40 }
  0x94   :  { %1731 = vmatprep.subr.bf16.mxu0 %v2920_v41  ;;  %1895 = vmatprep.subr.bf16.mxu1 %v2923_v43 }
  0x97   :  { %1732 = vmatpush1.bf16.msra.mxu0 %v2918_v44  ;;  %1896 = vmatpush1.bf16.msra.mxu1 %v2921_v45 }
  0x98   :  { %1733 = vmatprep.subr.bf16.mxu0 %v2926_v46  ;;  %1897 = vmatprep.subr.bf16.mxu1 %v2929_v47 }
  0x9b   :  { %1734 = vmatpush1.bf16.msra.mxu0 %v2924_v48  ;;  %1898 = vmatpush1.bf16.msra.mxu1 %v2927_v49 }
  0x9c   :  { %1735 = vmatprep.subr.bf16.mxu0 %v2932_v50  ;;  %1899 = vmatprep.subr.bf16.mxu1 %v2935_v51 }
  0x9f   :  { %1736 = vmatpush1.bf16.msra.mxu0 %v2930_v52  ;;  %1900 = vmatpush1.bf16.msra.mxu1 %v2933_v53 }
  0xa0   :  { %1737 = vmatprep.subr.bf16.mxu0 %v2938_v54  ;;  %1901 = vmatprep.subr.bf16.mxu1 %v2941_v55 }
  0xa3   :  { %1738 = vmatpush1.bf16.msra.mxu0 %v2936_v56  ;;  %1902 = vmatpush1.bf16.msra.mxu1 %v2939_v57 }
  0xa4   :  { %1739 = vmatprep.subr.bf16.mxu0 %v2944_v58  ;;  %1903 = vmatprep.subr.bf16.mxu1 %v2947_v59 }
  0xa7   :  { %1740 = vmatpush1.bf16.msra.mxu0 %v2942_v60  ;;  %1904 = vmatpush1.bf16.msra.mxu1 %v2945_v61 }
  0xa8   :  { %1741 = vmatprep.subr.bf16.mxu0 %v2950_v62  ;;  %1905 = vmatprep.subr.bf16.mxu1 %v2953_v63 }
  0xab   :  { %1742 = vmatpush1.bf16.msra.mxu0 %v2948_v0  ;;  %1906 = vmatpush1.bf16.msra.mxu1 %v2951_v1 }
  0xac   :  { %1743 = vmatprep.subr.bf16.mxu0 %v2956_v2  ;;  %1907 = vmatprep.subr.bf16.mxu1 %v2959_v3 }
  0xaf   :  { %1744 = vmatpush1.bf16.msra.mxu0 %v2954_v4  ;;  %1908 = vmatpush1.bf16.msra.mxu1 %v2957_v5 }
  0xb0   :  { %1745 = vmatprep.subr.bf16.mxu0 %v2962_v6  ;;  %1909 = vmatprep.subr.bf16.mxu1 %v2965_v7 }
  0xb3   :  { %1746 = vmatpush1.bf16.msra.mxu0 %v2960_v8  ;;  %1910 = vmatpush1.bf16.msra.mxu1 %v2963_v9 }
  0xb4   :  { %1747 = vmatprep.subr.bf16.mxu0 %v2968_v10  ;;  %1911 = vmatprep.subr.bf16.mxu1 %v2971_v11 }
  0xb7   :  { %1748 = vmatpush1.bf16.msra.mxu0 %v2966_v12  ;;  %1912 = vmatpush1.bf16.msra.mxu1 %v2969_v13 }
  0xb8   :  { %1749 = vmatprep.subr.bf16.mxu0 %v2974_v14  ;;  %1913 = vmatprep.subr.bf16.mxu1 %v2977_v16 }
  0xbb   :  { %1750 = vmatpush1.bf16.msra.mxu0 %v2972_v17  ;;  %1914 = vmatpush1.bf16.msra.mxu1 %v2975_v18 }
  0xbc   :  { %1751 = vmatprep.subr.bf16.mxu0 %v2980_v19  ;;  %1915 = vmatprep.subr.bf16.mxu1 %v2983_v22 }
  0xbf   :  { %1752 = vmatpush1.bf16.msra.mxu0 %v2978_v23  ;;  %1916 = vmatpush1.bf16.msra.mxu1 %v2981_v24 }
  0xc0   :  { %1762 = vmatprep.subr.bf16.mxu0 %v2987_v25  ;;  %1926 = vmatprep.subr.bf16.mxu1 %v2990_v26 }
  0xc2   :  { %1754 = vmatmul.mubr.bf16.vlgmr.msra.gmra.mrb[0].mxu0 %v3397_v21  ;;  %1918 = vmatmul.mubr.bf16.vlgmr.msra.gmra.mrb[0].mxu1 %v3397_v21 }
  0xc3   :  { %1763 = vmatpush1.bf16.msra.mxu0 %v2985_v27  ;;  %1927 = vmatpush1.bf16.msra.mxu1 %v2988_v15 }
  0xc4   :  { %1764 = vmatprep.subr.bf16.mxu0 %v2993_v28  ;;  %1928 = vmatprep.subr.bf16.mxu1 %v2996_v29 }
  0xc5   :  { %1794 = vmatprep.mubr.bf16.mxu0 %v350_v32  ;;  %1958 = vmatprep.mubr.bf16.mxu1 %v350_v32 }
  0xc7   :  { %1765 = vmatpush1.bf16.msra.mxu0 %v2991_v30  ;;  %1929 = vmatpush1.bf16.msra.mxu1 %v2994_v31 }
  0xc8   :  { %10 = vsyncpa [#allocation3], 0  ;;  %1766 = vmatprep.subr.bf16.mxu0 %v2999_v33  ;;  %1930 = vmatprep.subr.bf16.mxu1 %v3002_v34  ;;  %v3005_v36 = vld [vmem:[%s4088_s1 + $0x664] ss:$16 sps:$4 sm:$0xff]   ;;  %v3008_v37 = vld [vmem:[%s4088_s1 + $0x66c] ss:$16 sps:$4 sm:$0xff]   ;;  %v348_v29 = vcombine.high %v3397_v21, %v3397_v21 }
  0xc9   :  { %v3003_v38 = vld [vmem:[%s4088_s1 + $0x660] ss:$16 sps:$4 sm:$0xff]   ;;  %v3006_v39 = vld [vmem:[%s4088_s1 + $0x668] ss:$16 sps:$4 sm:$0xff]   ;;  %v3011_v40 = vld [vmem:[%s4088_s1 + $0x684] ss:$16 sps:$4 sm:$0xff]  }
  0xca   :  { %v3014_v41 = vld [vmem:[%s4088_s1 + $0x68c] ss:$16 sps:$4 sm:$0xff]   ;;  %v3009_v43 = vld [vmem:[%s4088_s1 + $0x680] ss:$16 sps:$4 sm:$0xff]   ;;  %v3012_v44 = vld [vmem:[%s4088_s1 + $0x688] ss:$16 sps:$4 sm:$0xff]  }
  0xcb   :  { %1767 = vmatpush1.bf16.msra.mxu0 %v2997_v20  ;;  %1931 = vmatpush1.bf16.msra.mxu1 %v3000_v35  ;;  %v3017_v45 = vld [vmem:[%s4088_s1 + $0x6a4] ss:$16 sps:$4 sm:$0xff]   ;;  %v3020_v46 = vld [vmem:[%s4088_s1 + $0x6ac] ss:$16 sps:$4 sm:$0xff]   ;;  %v3015_v47 = vld [vmem:[%s4088_s1 + $0x6a0] ss:$16 sps:$4 sm:$0xff]  }
  0xcc   :  { %1768 = vmatprep.subr.bf16.mxu0 %v3005_v36  ;;  %1932 = vmatprep.subr.bf16.mxu1 %v3008_v37  ;;  %v3018_v48 = vld [vmem:[%s4088_s1 + $0x6a8] ss:$16 sps:$4 sm:$0xff]   ;;  %v3023_v49 = vld [vmem:[%s4088_s1 + $0x6c4] ss:$16 sps:$4 sm:$0xff]   ;;  %v3026_v50 = vld [vmem:[%s4088_s1 + $0x6cc] ss:$16 sps:$4 sm:$0xff]  }
  0xcd   :  { %v3021_v51 = vld [vmem:[%s4088_s1 + $0x6c0] ss:$16 sps:$4 sm:$0xff]   ;;  %v3024_v52 = vld [vmem:[%s4088_s1 + $0x6c8] ss:$16 sps:$4 sm:$0xff]   ;;  %v3029_v53 = vld [vmem:[%s4088_s1 + $0x6e4] ss:$16 sps:$4 sm:$0xff]  }
  0xce   :  { %v3032_v54 = vld [vmem:[%s4088_s1 + $0x6ec] ss:$16 sps:$4 sm:$0xff]   ;;  %v3027_v55 = vld [vmem:[%s4088_s1 + $0x6e0] ss:$16 sps:$4 sm:$0xff]   ;;  %v3030_v56 = vld [vmem:[%s4088_s1 + $0x6e8] ss:$16 sps:$4 sm:$0xff]  }
  0xcf   :  { %1769 = vmatpush1.bf16.msra.mxu0 %v3003_v38  ;;  %1933 = vmatpush1.bf16.msra.mxu1 %v3006_v39  ;;  %v3035_v57 = vld [vmem:[%s4088_s1 + $0x704] ss:$16 sps:$4 sm:$0xff]   ;;  %v3038_v58 = vld [vmem:[%s4088_s1 + $0x70c] ss:$16 sps:$4 sm:$0xff]   ;;  %v3033_v59 = vld [vmem:[%s4088_s1 + $0x700] ss:$16 sps:$4 sm:$0xff]  }
  0xd0   :  { %1770 = vmatprep.subr.bf16.mxu0 %v3011_v40  ;;  %1934 = vmatprep.subr.bf16.mxu1 %v3014_v41  ;;  %v3036_v60 = vld [vmem:[%s4088_s1 + $0x708] ss:$16 sps:$4 sm:$0xff]   ;;  %v3041_v61 = vld [vmem:[%s4088_s1 + $0x724] ss:$16 sps:$4 sm:$0xff]   ;;  %v3044_v62 = vld [vmem:[%s4088_s1 + $0x72c] ss:$16 sps:$4 sm:$0xff]  }
  0xd1   :  { %v3039_v63 = vld [vmem:[%s4088_s1 + $0x720] ss:$16 sps:$4 sm:$0xff]   ;;  %v3042_v0 = vld [vmem:[%s4088_s1 + $0x728] ss:$16 sps:$4 sm:$0xff]   ;;  %v3047_v1 = vld [vmem:[%s4088_s1 + $0x744] ss:$16 sps:$4 sm:$0xff]  }
  0xd2   :  { %v3050_v2 = vld [vmem:[%s4088_s1 + $0x74c] ss:$16 sps:$4 sm:$0xff]   ;;  %v3045_v3 = vld [vmem:[%s4088_s1 + $0x740] ss:$16 sps:$4 sm:$0xff]   ;;  %v3048_v4 = vld [vmem:[%s4088_s1 + $0x748] ss:$16 sps:$4 sm:$0xff]  }
  0xd3   :  { %1771 = vmatpush1.bf16.msra.mxu0 %v3009_v43  ;;  %1935 = vmatpush1.bf16.msra.mxu1 %v3012_v44  ;;  %v3053_v5 = vld [vmem:[%s4088_s1 + $0x764] ss:$16 sps:$4 sm:$0xff]   ;;  %v3056_v6 = vld [vmem:[%s4088_s1 + $0x76c] ss:$16 sps:$4 sm:$0xff]   ;;  %v3051_v7 = vld [vmem:[%s4088_s1 + $0x760] ss:$16 sps:$4 sm:$0xff]  }
  0xd4   :  { %1772 = vmatprep.subr.bf16.mxu0 %v3017_v45  ;;  %1936 = vmatprep.subr.bf16.mxu1 %v3020_v46  ;;  %v3054_v8 = vld [vmem:[%s4088_s1 + $0x768] ss:$16 sps:$4 sm:$0xff]   ;;  %v3059_v9 = vld [vmem:[%s4088_s1 + $0x784] ss:$16 sps:$4 sm:$0xff]   ;;  %v3062_v10 = vld [vmem:[%s4088_s1 + $0x78c] ss:$16 sps:$4 sm:$0xff]  }
  0xd5   :  { %v3057_v11 = vld [vmem:[%s4088_s1 + $0x780] ss:$16 sps:$4 sm:$0xff]   ;;  %v3060_v12 = vld [vmem:[%s4088_s1 + $0x788] ss:$16 sps:$4 sm:$0xff]   ;;  %v3065_v13 = vld [vmem:[%s4088_s1 + $0x7a4] ss:$16 sps:$4 sm:$0xff]  }
  0xd6   :  { %v3068_v14 = vld [vmem:[%s4088_s1 + $0x7ac] ss:$16 sps:$4 sm:$0xff]   ;;  %v3063_v16 = vld [vmem:[%s4088_s1 + $0x7a0] ss:$16 sps:$4 sm:$0xff]   ;;  %v3066_v17 = vld [vmem:[%s4088_s1 + $0x7a8] ss:$16 sps:$4 sm:$0xff]  }
  0xd7   :  { %1773 = vmatpush1.bf16.msra.mxu0 %v3015_v47  ;;  %1937 = vmatpush1.bf16.msra.mxu1 %v3018_v48  ;;  %v3071_v18 = vld [vmem:[%s4088_s1 + $0x7c4] ss:$16 sps:$4 sm:$0xff]   ;;  %v3074_v19 = vld [vmem:[%s4088_s1 + $0x7cc] ss:$16 sps:$4 sm:$0xff]   ;;  %v3069_v22 = vld [vmem:[%s4088_s1 + $0x7c0] ss:$16 sps:$4 sm:$0xff]  }
  0xd8   :  { %1774 = vmatprep.subr.bf16.mxu0 %v3023_v49  ;;  %1938 = vmatprep.subr.bf16.mxu1 %v3026_v50  ;;  %v3072_v23 = vld [vmem:[%s4088_s1 + $0x7c8] ss:$16 sps:$4 sm:$0xff]   ;;  %v3077_v24 = vld [vmem:[%s4088_s1 + $0x7e4] ss:$16 sps:$4 sm:$0xff]   ;;  %v3080_v25 = vld [vmem:[%s4088_s1 + $0x7ec] ss:$16 sps:$4 sm:$0xff]  }
  0xd9   :  { %v3075_v26 = vld [vmem:[%s4088_s1 + $0x7e0] ss:$16 sps:$4 sm:$0xff]   ;;  %v3078_v27 = vld [vmem:[%s4088_s1 + $0x7e8] ss:$16 sps:$4 sm:$0xff]   ;;  %s3138_s26 = smov [#allocation2]  }
  0xda   :  { %v3081_v15 = vld [vmem:[%s4090_s3 + $0x40] sm:$0xff]   ;;  %v3085_v32 = vld [vmem:[%s4090_s3 + $0x48] sm:$0xff]   ;;  %v3089_v20 = vld [vmem:[%s4090_s3 + $0x50] sm:$0xff]   ;;  %s2325_s27 = sshll.u32 %s3138_s26, 4  ;;  %s2326_s27 = int_to_ptr.vmem [resolvable:$true] %s2325_s27 }
  0xdb   :  { %1775 = vmatpush1.bf16.msra.mxu0 %v3021_v51  ;;  %1939 = vmatpush1.bf16.msra.mxu1 %v3024_v52  ;;  %v3082_v28 = vld [vmem:[%s4090_s3 + $0xc0] sm:$0xff]   ;;  %v3086_v21 = vld [vmem:[%s4090_s3 + $0xc8] sm:$0xff]   ;;  %v3090_v35 = vld [vmem:[%s4090_s3 + $0xd0] sm:$0xff]   ;;  %s3113_s28 = scalar_lea.vmem %s2326_s27, 32  ;;  %p3118_p1 = scmp.lt.s32.totalorder %s2326_s27, %s2326_s27 }
  0xdc   :  { %1776 = vmatprep.subr.bf16.mxu0 %v3029_v53  ;;  %1940 = vmatprep.subr.bf16.mxu1 %v3032_v54  ;;  %v3083_v30 = vld [vmem:[%s4090_s3] sm:$0xff]   ;;  %v3087_v33 = vld [vmem:[%s4090_s3 + $0x8] sm:$0xff]   ;;  %v3091_v36 = vld [vmem:[%s4090_s3 + $0x10] sm:$0xff]   ;;  %p3114_p0 = scmp.ne.s32.totalorder %s2326_s27, %s3113_s28  ;;  %p3119_p2 = scmp.lt.s32.totalorder %s3113_s28, %s3113_s28 }
  0xdd   :  { %v3084_v31 = vld [vmem:[%s4090_s3 + $0x80] sm:$0xff]   ;;  %v3088_v34 = vld [vmem:[%s4090_s3 + $0x88] sm:$0xff]   ;;  %v3092_v37 = vld [vmem:[%s4090_s3 + $0x90] sm:$0xff]  }
  0xde   :  { %v3093_v38 = vld [vmem:[%s4090_s3 + $0x58] sm:$0xff]   ;;  %v3097_v43 = vld [vmem:[%s4090_s3 + $0x60] sm:$0xff]   ;;  %v3101_v47 = vld [vmem:[%s4090_s3 + $0x68] sm:$0xff]   ;;  %p3120_p3 = por %p3119_p2, %p3118_p1 }
  0xdf   :  { %1777 = vmatpush1.bf16.msra.mxu0 %v3027_v55  ;;  %1941 = vmatpush1.bf16.msra.mxu1 %v3030_v56  ;;  %v3094_v39 = vld [vmem:[%s4090_s3 + $0xd8] sm:$0xff]   ;;  %v3098_v44 = vld [vmem:[%s4090_s3 + $0xe0] sm:$0xff]   ;;  %v3102_v48 = vld [vmem:[%s4090_s3 + $0xe8] sm:$0xff]  }
  0xe0   :  { %1778 = vmatprep.subr.bf16.mxu0 %v3035_v57  ;;  %1942 = vmatprep.subr.bf16.mxu1 %v3038_v58  ;;  %v3095_v40 = vld [vmem:[%s4090_s3 + $0x18] sm:$0xff]   ;;  %v3099_v45 = vld [vmem:[%s4090_s3 + $0x20] sm:$0xff]   ;;  %v3103_v49 = vld [vmem:[%s4090_s3 + $0x28] sm:$0xff]   ;;  %p3121_p4 = pnand %p3120_p3, %p3114_p0 }
  0xe1   :  { %v3096_v41 = vld [vmem:[%s4090_s3 + $0x98] sm:$0xff]   ;;  %v3100_v46 = vld [vmem:[%s4090_s3 + $0xa0] sm:$0xff]   ;;  %v3104_v50 = vld [vmem:[%s4090_s3 + $0xa8] sm:$0xff]  }
  0xe2   :  { %v3105_v51 = vld [vmem:[%s4090_s3 + $0x70] sm:$0xff]   ;;  %v3109_v55 = vld [vmem:[%s4090_s3 + $0x78] sm:$0xff]  }
  0xe3   :  { %1779 = vmatpush1.bf16.msra.mxu0 %v3033_v59  ;;  %1943 = vmatpush1.bf16.msra.mxu1 %v3036_v60  ;;  %v3106_v52 = vld [vmem:[%s4090_s3 + $0xf0] sm:$0xff]   ;;  %v3110_v56 = vld [vmem:[%s4090_s3 + $0xf8] sm:$0xff]   ;;  %v283_v59 = vsub.s32 0, %v3286_v42  ;;  %v291_v60 = vsub.s32 2, %v3286_v42 }
  0xe4   :  { %1780 = vmatprep.subr.bf16.mxu0 %v3041_v61  ;;  %1944 = vmatprep.subr.bf16.mxu1 %v3044_v62  ;;  %v3107_v53 = vld [vmem:[%s4090_s3 + $0x30] sm:$0xff]   ;;  %v3111_v57 = vld [vmem:[%s4090_s3 + $0x38] sm:$0xff]   ;;  %v279_v61 = vld [vmem:[%s4089_s2] sm:$0xf]  ;;  %v287_v62 = vsub.s32 1, %v3286_v42 }
  0xe5   :  { %v3108_v54 = vld [vmem:[%s4090_s3 + $0xb0] sm:$0xff]   ;;  %v3112_v58 = vld [vmem:[%s4090_s3 + $0xb8] sm:$0xff]  }
  0xe7   :  { %1781 = vmatpush1.bf16.msra.mxu0 %v3039_v63  ;;  %1945 = vmatpush1.bf16.msra.mxu1 %v3042_v0  ;;  %v295_v63 = vsub.s32 3, %v3286_v42  ;;  %v284_v0 = vrot.slane %v279_v61, %v283_v59 }
  0xe8   :  { %1782 = vmatprep.subr.bf16.mxu0 %v3047_v1  ;;  %1946 = vmatprep.subr.bf16.mxu1 %v3050_v2  ;;  %v292_v1 = vrot.slane %v279_v61, %v291_v60  ;;  %v288_v2 = vrot.slane %v279_v61, %v287_v62 }
  0xeb   :  { %1783 = vmatpush1.bf16.msra.mxu0 %v3045_v3  ;;  %1947 = vmatpush1.bf16.msra.mxu1 %v3048_v4  ;;  %v296_v3 = vrot.slane %v279_v61, %v295_v63 }
  0xec   :  { %1784 = vmatprep.subr.bf16.mxu0 %v3053_v5  ;;  %1948 = vmatprep.subr.bf16.mxu1 %v3056_v6 }
  0xef   :  { %1785 = vmatpush1.bf16.msra.mxu0 %v3051_v7  ;;  %1949 = vmatpush1.bf16.msra.mxu1 %v3054_v8 }
  0xf0   :  { %1786 = vmatprep.subr.bf16.mxu0 %v3059_v9  ;;  %1950 = vmatprep.subr.bf16.mxu1 %v3062_v10 }
  0xf3   :  { %1787 = vmatpush1.bf16.msra.mxu0 %v3057_v11  ;;  %1951 = vmatpush1.bf16.msra.mxu1 %v3060_v12 }
  0xf4   :  { %1788 = vmatprep.subr.bf16.mxu0 %v3065_v13  ;;  %1952 = vmatprep.subr.bf16.mxu1 %v3068_v14 }
  0xf7   :  { %1789 = vmatpush1.bf16.msra.mxu0 %v3063_v16  ;;  %1953 = vmatpush1.bf16.msra.mxu1 %v3066_v17 }
  0xf8   :  { %1790 = vmatprep.subr.bf16.mxu0 %v3071_v18  ;;  %1954 = vmatprep.subr.bf16.mxu1 %v3074_v19 }
  0xfb   :  { %1791 = vmatpush1.bf16.msra.mxu0 %v3069_v22  ;;  %1955 = vmatpush1.bf16.msra.mxu1 %v3072_v23 }
  0xfc   :  { %1792 = vmatprep.subr.bf16.mxu0 %v3077_v24  ;;  %1956 = vmatprep.subr.bf16.mxu1 %v3080_v25 }
  0xff   :  { %1793 = vmatpush1.bf16.msra.mxu0 %v3075_v26  ;;  %1957 = vmatpush1.bf16.msra.mxu1 %v3078_v27 }
 0x100   :  { %2622 = vmatprep.subr.bf16.mxu0 %v3081_v15  ;;  %2644 = vmatprep.subr.bf16.mxu1 %v3082_v28  ;;  %v2589_v15 = vld [vmem:[%s4091_s4] ss:$0 sm:$0xff] }
 0x102   :  { %1795 = vmatmul.mubr.bf16.vlgmr.msra.gmra.mrb[0].mxu0 %v348_v29  ;;  %1959 = vmatmul.mubr.bf16.vlgmr.msra.gmra.mrb[0].mxu1 %v348_v29 }
 0x103   :  { %2623 = vmatpush3.bf16.msra.mxu0 %v3083_v30  ;;  %2645 = vmatpush3.bf16.msra.mxu1 %v3084_v31 }
 0x104   :  { %2624 = vmatprep.subr.bf16.mxu0 %v3085_v32  ;;  %2646 = vmatprep.subr.bf16.mxu1 %v3086_v21 }
 0x107   :  { %2625 = vmatpush3.bf16.msra.mxu0 %v3087_v33  ;;  %2647 = vmatpush3.bf16.msra.mxu1 %v3088_v34 }
 0x108   :  { %2626 = vmatprep.subr.bf16.mxu0 %v3089_v20  ;;  %2648 = vmatprep.subr.bf16.mxu1 %v3090_v35 }
 0x10b   :  { %2627 = vmatpush3.bf16.msra.mxu0 %v3091_v36  ;;  %2649 = vmatpush3.bf16.msra.mxu1 %v3092_v37 }
 0x10c   :  { %2628 = vmatprep.subr.bf16.mxu0 %v3093_v38  ;;  %2650 = vmatprep.subr.bf16.mxu1 %v3094_v39 }
 0x10f   :  { %2629 = vmatpush3.bf16.msra.mxu0 %v3095_v40  ;;  %2651 = vmatpush3.bf16.msra.mxu1 %v3096_v41 }
 0x110   :  { %2630 = vmatprep.subr.bf16.mxu0 %v3097_v43  ;;  %2652 = vmatprep.subr.bf16.mxu1 %v3098_v44 }
 0x113   :  { %2631 = vmatpush3.bf16.msra.mxu0 %v3099_v45  ;;  %2653 = vmatpush3.bf16.msra.mxu1 %v3100_v46 }
 0x114   :  { %2632 = vmatprep.subr.bf16.mxu0 %v3101_v47  ;;  %2654 = vmatprep.subr.bf16.mxu1 %v3102_v48 }
 0x117   :  { %2633 = vmatpush3.bf16.msra.mxu0 %v3103_v49  ;;  %2655 = vmatpush3.bf16.msra.mxu1 %v3104_v50 }
 0x118   :  { %2634 = vmatprep.subr.bf16.mxu0 %v3105_v51  ;;  %2656 = vmatprep.subr.bf16.mxu1 %v3106_v52 }
 0x11b   :  { %2635 = vmatpush3.bf16.msra.mxu0 %v3107_v53  ;;  %2657 = vmatpush3.bf16.msra.mxu1 %v3108_v54 }
 0x11c   :  { %2636 = vmatprep.subr.bf16.mxu0 %v3109_v55  ;;  %2658 = vmatprep.subr.bf16.mxu1 %v3110_v56 }
 0x11f   :  { %2637 = vmatpush3.bf16.msra.mxu0 %v3111_v57  ;;  %2659 = vmatpush3.bf16.msra.mxu1 %v3112_v58 }
 0x1d5   :  { %v1796_v4 = vpop.f32.mrb[0].mxu0  ;;  %v1960_v5 = vpop.f32.mrb[0].mxu1 }
 0x1d6   :  { %v2666_v6 = vadd.f32 %v1796_v4, %v284_v0  ;;  %v2668_v7 = vadd.f32 %v1960_v5, %v292_v1  ;;  %v1798_v8 = vpop.f32.mrb[1].mxu0  ;;  %v1962_v9 = vpop.f32.mrb[1].mxu1 }
 0x1d7   :  { %v2667_v10 = vadd.f32 %v1798_v8, %v288_v2  ;;  %v2669_v11 = vadd.f32 %v1962_v9, %v296_v3  ;;  %v1800_v12 = vpop.f32.mrb[2].mxu0  ;;  %v1964_v13 = vpop.f32.mrb[2].mxu1 }
 0x1d8   :  { %v1967_v14 = vmax.f32 %v2666_v6, 0.0  ;;  %v1969_v16 = vmax.f32 %v2668_v7, 0.0  ;;  %v1801_v17 = vpop.f32.mrb[3].mxu0  ;;  %v1965_v18 = vpop.f32.mrb[3].mxu1 }
 0x1d9   :  { %v1968_v19 = vmax.f32 %v2667_v10, 0.0  ;;  %v1970_v42 = vmax.f32 %v2669_v11, 0.0 }
 0x1da   :  { %v1971_v24 = vpack.c.bf16 %v1967_v14, %v1967_v14  ;;  %v1973_v25 = vpack.c.bf16 %v1969_v16, %v1969_v16 }
 0x1db   :  { %v1972_v22 = vpack.c.bf16 %v1968_v19, %v1968_v19  ;;  %v1974_v23 = vpack.c.bf16 %v1970_v42, %v1970_v42 }
 0x1dd   :  { %2270 = vmatprep.mubr.bf16.mxu0 %v1972_v22  ;;  %2310 = vmatprep.mubr.bf16.mxu1 %v1974_v23 }
 0x1de   :  { %2271 = vmatmul.mubr.bf16.vlgmr.msra.gmra.mrb[4].mxu0 %v1971_v24  ;;  %2311 = vmatmul.mubr.bf16.vlgmr.msra.gmra.mrb[4].mxu1 %v1973_v25 }
 0x2b1   :  { %v2638_v26 = vpop.f32.mrb[4].mxu0  ;;  %v2660_v27 = vpop.f32.mrb[4].mxu1 }
 0x2b2   :  { %v2639_v28 = vpop.f32.mrb[5].mxu0  ;;  %v2661_v29 = vpop.f32.mrb[5].mxu1 }
 0x2b3   :  { %v2640_v30 = vadd.f32 %v2639_v28, %v2638_v26  ;;  %v2662_v31 = vadd.f32 %v2661_v29, %v2660_v27  ;;  %v2641_v32 = vpop.f32.mrb[6].mxu0  ;;  %v2663_v21 = vpop.f32.mrb[6].mxu1 }
 0x2b4   :  { %v2642_v33 = vpop.f32.mrb[7].mxu0  ;;  %v2664_v34 = vpop.f32.mrb[7].mxu1 }
 0x2b5   :  { %v2273_v20 = vadd.f32 %v2640_v30, %v2589_v15 }
 0x2b7   :  { %v2313_v35 = vadd.f32 %v2662_v31, %v2273_v20 }
 0x2b9   :  { %2318 = vst [vmem:[#allocation2] sm:$0x3] %v2313_v35 }
 0x2ba   :  { %3124 = shalt.err (!%p3121_p4)
}
 0x2bb   :  { %s3125_s30 = scalar_lea.hbm %s4092_s5, 32 }
 0x2bc   :  { %p3126_p5 = scmp.ne.s32.totalorder %s4092_s5, %s3125_s30  ;;  %p3129_p6 = scmp.lt.u32.totalorder %s3125_s30, %s4092_s5 }
 0x2be   :  { %p3131_p7 = pnand %p3129_p6, %p3126_p5 }
 0x2c0   :  { %3134 = shalt.err (!%p3131_p7)
}
 0x2c1   :  { %2328 = dma.vmem_to_hbm [thread:$0]  %s2326_s27, 32, %s4092_s5, [#allocation3]  }
 0x2c2   :  { %3135 = dma.done.wait [#allocation3], 32  }
 0x2c3   :  { %3136 = vsyncadd [#allocation3], 4294967264 }
 0x2c4   :  { %2332 = vsyncpa [#allocation3], 1 }

</bundles_post_ra>
